<compile_context>
chip_gen: v6e
topology: v6e:2x2x1
jax: 0.10.0
libtpu: 0.0.40
codegen_flags: <defaults>
</compile_context>

<pallas_src>
import functools

import jax
import jax.numpy as jnp
from jax.experimental import pallas as pl
from jax.experimental.pallas import tpu as pltpu


# ----------------------------- fused forward kernel -----------------------------

def make_graph_unet_kernel(num_layers, hidden_dim):
    H = hidden_dim

    def kernel(*refs):
        out_ref = refs[-1]
        in_refs = refs[:-1]
        state = {"pos": 0, "blk": 0}

        def take():
            r = in_refs[state["pos"]]
            state["pos"] += 1
            return r

        def silu(v):
            return v * jax.nn.sigmoid(v)

        def layer_norm(h, g, b):
            mu = jnp.mean(h, axis=-1, keepdims=True)
            var = jnp.mean(jnp.square(h - mu), axis=-1, keepdims=True)
            return (h - mu) * jax.lax.rsqrt(var + 1e-5) * g + b

        # ---- inputs (order must match flatten_args) ----
        t_ref = take()                      # SMEM scalar [1,1]
        x = take()[...]                     # [N, node_dim]
        adj = take()[...]                   # [N, N]
        tw1 = take()[...]                   # [1, H]   Linear(1,H) weight row
        tb1e = take()[...]                  # [1, H]
        tw2 = take()[...]                   # [H, H]
        tb2e = take()[...]                  # [1, H]
        wt_all = take()[...]                # [H, 2*nblocks*H]  stacked time_proj weights
        bt_all = take()[...]                # [1, 2*nblocks*H]
        iw = take()[...]                    # [node_dim, H]
        ib = take()[...]                    # [1, H]

        # ---- time embedding: Linear(1,H) as VPU broadcast, SiLU, Linear(H,H) ----
        t = t_ref[0, 0]
        te = silu(t * tw1 + tb1e)                                               # [1, H]
        temb = jnp.dot(te, tw2, preferred_element_type=jnp.float32) + tb2e      # [1, H]

        # ---- all per-conv time-conditioning biases in one matmul ----
        tb_all = jnp.dot(temb, wt_all, preferred_element_type=jnp.float32) + bt_all

        def tbias(j):
            return tb_all[:, j * H:(j + 1) * H]                                 # [1, H]

        # ---- input projection ----
        h = jnp.dot(x, iw, preferred_element_type=jnp.float32) + ib             # [N, H]

        def same_block(h_in):
            # GraphConvBlock with cin == cout == H: skip is identity (no matmul).
            ln1g = take()[...]; ln1b = take()[...]
            w1 = take()[...]; b1 = take()[...]
            ln2g = take()[...]; ln2b = take()[...]
            w2 = take()[...]; b2 = take()[...]
            j = state["blk"]; state["blk"] += 1

            z = layer_norm(h_in, ln1g, ln1b)
            z = jnp.dot(adj, jnp.dot(z, w1, preferred_element_type=jnp.float32),
                        preferred_element_type=jnp.float32) + b1 + tbias(2 * j)
            z = silu(z)
            z = layer_norm(z, ln2g, ln2b)
            z = jnp.dot(adj, jnp.dot(z, w2, preferred_element_type=jnp.float32),
                        preferred_element_type=jnp.float32) + b2 + tbias(2 * j + 1)
            z = silu(z)
            return z + h_in

        def up_block(h_in, skip_in):
            # GraphConvBlock with cin == 2H: the concat([h, skip]) is never
            # materialized; weights are pre-split into [H,H] halves.
            ln1g_h = take()[...]; ln1g_s = take()[...]
            ln1b_h = take()[...]; ln1b_s = take()[...]
            w1t = take()[...]; w1b = take()[...]; b1 = take()[...]
            ln2g = take()[...]; ln2b = take()[...]
            w2 = take()[...]; b2 = take()[...]
            skwt = take()[...]; skwb = take()[...]; skb = take()[...]
            j = state["blk"]; state["blk"] += 1

            # LayerNorm over the virtual 2H-channel concat.
            two_h = 2.0 * H
            mu = (jnp.sum(h_in, axis=-1, keepdims=True)
                  + jnp.sum(skip_in, axis=-1, keepdims=True)) / two_h
            var = (jnp.sum(jnp.square(h_in - mu), axis=-1, keepdims=True)
                   + jnp.sum(jnp.square(skip_in - mu), axis=-1, keepdims=True)) / two_h
            inv = jax.lax.rsqrt(var + 1e-5)
            hn = (h_in - mu) * inv * ln1g_h + ln1b_h
            sn = (skip_in - mu) * inv * ln1g_s + ln1b_s

            z = (jnp.dot(hn, w1t, preferred_element_type=jnp.float32)
                 + jnp.dot(sn, w1b, preferred_element_type=jnp.float32))
            z = jnp.dot(adj, z, preferred_element_type=jnp.float32) + b1 + tbias(2 * j)
            z = silu(z)
            z = layer_norm(z, ln2g, ln2b)
            z = jnp.dot(adj, jnp.dot(z, w2, preferred_element_type=jnp.float32),
                        preferred_element_type=jnp.float32) + b2 + tbias(2 * j + 1)
            z = silu(z)

            sk = (jnp.dot(h_in, skwt, preferred_element_type=jnp.float32)
                  + jnp.dot(skip_in, skwb, preferred_element_type=jnp.float32) + skb)
            return z + sk

        # ---- U-Net path ----
        skips = [h]
        for _ in range(num_layers):
            h = same_block(h)
            skips.append(h)
        h = same_block(h)                              # middle
        # Matches PyTorch: zip(up_layers, reversed(skips)) -> skips[-1], skips[-2], ...
        rev_skips = skips[::-1]
        for i in range(num_layers):
            h = up_block(h, rev_skips[i])

        # ---- output projection ----
        ow = take()[...]; ob = take()[...]
        out_ref[...] = jnp.dot(h, ow, preferred_element_type=jnp.float32) + ob

    return kernel


# ----------------------------- parameter init (deterministic) -----------------------------

def init_linear(key, cin, cout, scale=0.1):
    kw, kb = jax.random.split(key)
    w = jax.random.normal(kw, (cin, cout), jnp.float32) * scale
    b = jax.random.normal(kb, (1, cout), jnp.float32) * scale
    return w, b


def init_block(key, cin, hidden):
    ks = jax.random.split(key, 5)
    p = {
        "ln1_g": jnp.ones((1, cin), jnp.float32),
        "ln1_b": jnp.zeros((1, cin), jnp.float32),
        "ln2_g": jnp.ones((1, hidden), jnp.float32),
        "ln2_b": jnp.zeros((1, hidden), jnp.float32),
    }
    p["w1"], p["b1"] = init_linear(ks[0], cin, hidden)        # GCNConv weight + bias
    p["wt1"], p["bt1"] = init_linear(ks[1], hidden, hidden)   # conv1.time_proj
    p["w2"], p["b2"] = init_linear(ks[2], hidden, hidden)
    p["wt2"], p["bt2"] = init_linear(ks[3], hidden, hidden)   # conv2.time_proj
    if cin != hidden:
        p["skip_w"], p["skip_b"] = init_linear(ks[4], cin, hidden)
    # cin == hidden -> nn.Identity(): handled structurally in-kernel (no params).
    return p


def init_graph_unet(key, node_dim, hidden_dim, num_layers):
    keys = jax.random.split(key, 4 + 2 * num_layers + 1)
    params = {}
    w1, b1 = init_linear(keys[0], 1, hidden_dim)
    w2, b2 = init_linear(keys[1], hidden_dim, hidden_dim)
    params["time_embed"] = (w1, b1, w2, b2)
    params["input_proj"] = init_linear(keys[2], node_dim, hidden_dim)
    params["output_proj"] = init_linear(keys[3], hidden_dim, node_dim)
    params["down"] = [init_block(keys[4 + i], hidden_dim, hidden_dim)
                      for i in range(num_layers)]
    params["middle"] = init_block(keys[4 + num_layers], hidden_dim, hidden_dim)
    params["up"] = [init_block(keys[5 + num_layers + i], 2 * hidden_dim, hidden_dim)
                    for i in range(num_layers)]
    return params


# ----------------------------- glue: adjacency + forward -----------------------------

def build_norm_adj(edge_index, num_nodes):
    """Dense Ahat = D^-1/2 (A + I_remaining) D^-1/2, matching torch_geometric
    gcn_norm: self-loops added only where missing; Ahat[dst, src] entries."""
    src, dst = edge_index[0], edge_index[1]
    a = jnp.zeros((num_nodes, num_nodes), jnp.float32).at[dst, src].add(1.0)
    diag = jnp.diagonal(a)
    a = a + jnp.diag(jnp.where(diag > 0, 0.0, 1.0))       # add_remaining_self_loops
    deg = jnp.sum(a, axis=1)
    dinv = jnp.where(deg > 0, jax.lax.rsqrt(deg), 0.0)
    return a * dinv[:, None] * dinv[None, :]


def flatten_args(params, x, adj, t, hidden_dim):
    """Flatten everything into the exact ref order the fused kernel consumes."""
    H = hidden_dim
    t2 = jnp.reshape(t, (1, 1)).astype(jnp.float32)

    blocks = list(params["down"]) + [params["middle"]] + list(params["up"])
    wt_all = jnp.concatenate(
        [jnp.concatenate([b["wt1"], b["wt2"]], axis=1) for b in blocks], axis=1)
    bt_all = jnp.concatenate(
        [jnp.concatenate([b["bt1"], b["bt2"]], axis=1) for b in blocks], axis=1)

    tw1, tb1e, tw2, tb2e = params["time_embed"]
    iw, ib = params["input_proj"]
    ow, ob = params["output_proj"]

    args = [t2, x, adj, tw1, tb1e, tw2, tb2e, wt_all, bt_all, iw, ib]
    for b in list(params["down"]) + [params["middle"]]:
        args += [b["ln1_g"], b["ln1_b"], b["w1"], b["b1"],
                 b["ln2_g"], b["ln2_b"], b["w2"], b["b2"]]
    for b in params["up"]:
        args += [b["ln1_g"][:, :H], b["ln1_g"][:, H:],
                 b["ln1_b"][:, :H], b["ln1_b"][:, H:],
                 b["w1"][:H, :], b["w1"][H:, :], b["b1"],
                 b["ln2_g"], b["ln2_b"], b["w2"], b["b2"],
                 b["skip_w"][:H, :], b["skip_w"][H:, :], b["skip_b"]]
    args += [ow, ob]
    return args


def graph_unet_forward(params, x, t, adj):
    num_layers = len(params["down"])
    hidden_dim = params["input_proj"][0].shape[1]
    node_dim = params["output_proj"][0].shape[1]
    n = x.shape[0]

    args = flatten_args(params, x, adj, t, hidden_dim)

    # Explicit VMEM budget: actual footprint (weights + activations) * 2 + headroom.
    total_bytes = sum(int(a.size) * a.dtype.itemsize for a in args[1:])
    total_bytes += n * node_dim * 4
    vmem_limit = max(2 * total_bytes + (2 << 20), 8 << 20)

    in_specs = ([pl.BlockSpec(memory_space=pltpu.MemorySpace.SMEM)]
                + [pl.BlockSpec(memory_space=pltpu.MemorySpace.VMEM)] * (len(args) - 1))

    # TODO(synk): for large N the dense [N,N] adjacency should be tiled on a grid
    # (bf16 adj, "parallel" node-row axis for v7x's 2 TCs) or replaced by a
    # scalar-prefetch neighbor-gather; at N=16 it is VMEM-resident and tiny.
    return pl.pallas_call(
        make_graph_unet_kernel(num_layers, hidden_dim),
        out_shape=jax.ShapeDtypeStruct((n, node_dim), jnp.float32),
        in_specs=in_specs,
        out_specs=pl.BlockSpec(memory_space=pltpu.MemorySpace.VMEM),
        compiler_params=pltpu.CompilerParams(vmem_limit_bytes=int(vmem_limit)),
    )(*args)


# TODO(synk): Dropout(p=0.1) is treated as eval-mode identity (no RNG masking in-kernel).


# ----------------------------- main -----------------------------

if __name__ == "__main__":
    NODE_DIM = 8
    HIDDEN_DIM = 128   # module default; keeps channels lane-dense (128 lanes/vreg)
    NUM_LAYERS = 2
    N_NODES = 16

    key = jax.random.PRNGKey(0)
    k_param, k_x = jax.random.split(key)

    params = init_graph_unet(k_param, NODE_DIM, HIDDEN_DIM, NUM_LAYERS)

    # Node features
    x = jax.random.normal(k_x, (N_NODES, NODE_DIM), jnp.float32)

    # Diffusion timestep (scalar)
    t = jnp.float32(0.5)

    # Ring graph, both directions: edge_index [2, 2*N]
    idx = jnp.arange(N_NODES, dtype=jnp.int32)
    src = jnp.concatenate([idx, (idx + 1) % N_NODES])
    dst = jnp.concatenate([(idx + 1) % N_NODES, idx])
    edge_index = jnp.stack([src, dst], axis=0)

    adj = build_norm_adj(edge_index, N_NODES)

    fwd = jax.jit(graph_unet_forward)
    out = fwd(params, x, t, adj)
    out = jax.block_until_ready(out)
    assert out.shape == (N_NODES, NODE_DIM), out.shape
    assert bool(jnp.all(jnp.isfinite(out)))
    print("KERNEL_OK")
</pallas_src>

<mosaic_0001>
module attributes {stable_mosaic.version = 11 : i64} {
  func.func @kernel(%arg0: memref<1x1xf32, #tpu.memory_space<smem>>, %arg1: memref<16x8xf32, #tpu.memory_space<vmem>>, %arg2: memref<16x16xf32, #tpu.memory_space<vmem>>, %arg3: memref<1x128xf32, #tpu.memory_space<vmem>>, %arg4: memref<1x128xf32, #tpu.memory_space<vmem>>, %arg5: memref<128x128xf32, #tpu.memory_space<vmem>>, %arg6: memref<1x128xf32, #tpu.memory_space<vmem>>, %arg7: memref<128x1280xf32, #tpu.memory_space<vmem>>, %arg8: memref<1x1280xf32, #tpu.memory_space<vmem>>, %arg9: memref<8x128xf32, #tpu.memory_space<vmem>>, %arg10: memref<1x128xf32, #tpu.memory_space<vmem>>, %arg11: memref<1x128xf32, #tpu.memory_space<vmem>>, %arg12: memref<1x128xf32, #tpu.memory_space<vmem>>, %arg13: memref<128x128xf32, #tpu.memory_space<vmem>>, %arg14: memref<1x128xf32, #tpu.memory_space<vmem>>, %arg15: memref<1x128xf32, #tpu.memory_space<vmem>>, %arg16: memref<1x128xf32, #tpu.memory_space<vmem>>, %arg17: memref<128x128xf32, #tpu.memory_space<vmem>>, %arg18: memref<1x128xf32, #tpu.memory_space<vmem>>, %arg19: memref<1x128xf32, #tpu.memory_space<vmem>>, %arg20: memref<1x128xf32, #tpu.memory_space<vmem>>, %arg21: memref<128x128xf32, #tpu.memory_space<vmem>>, %arg22: memref<1x128xf32, #tpu.memory_space<vmem>>, %arg23: memref<1x128xf32, #tpu.memory_space<vmem>>, %arg24: memref<1x128xf32, #tpu.memory_space<vmem>>, %arg25: memref<128x128xf32, #tpu.memory_space<vmem>>, %arg26: memref<1x128xf32, #tpu.memory_space<vmem>>, %arg27: memref<1x128xf32, #tpu.memory_space<vmem>>, %arg28: memref<1x128xf32, #tpu.memory_space<vmem>>, %arg29: memref<128x128xf32, #tpu.memory_space<vmem>>, %arg30: memref<1x128xf32, #tpu.memory_space<vmem>>, %arg31: memref<1x128xf32, #tpu.memory_space<vmem>>, %arg32: memref<1x128xf32, #tpu.memory_space<vmem>>, %arg33: memref<128x128xf32, #tpu.memory_space<vmem>>, %arg34: memref<1x128xf32, #tpu.memory_space<vmem>>, %arg35: memref<1x128xf32, #tpu.memory_space<vmem>>, %arg36: memref<1x128xf32, #tpu.memory_space<vmem>>, %arg37: memref<1x128xf32, #tpu.memory_space<vmem>>, %arg38: memref<1x128xf32, #tpu.memory_space<vmem>>, %arg39: memref<128x128xf32, #tpu.memory_space<vmem>>, %arg40: memref<128x128xf32, #tpu.memory_space<vmem>>, %arg41: memref<1x128xf32, #tpu.memory_space<vmem>>, %arg42: memref<1x128xf32, #tpu.memory_space<vmem>>, %arg43: memref<1x128xf32, #tpu.memory_space<vmem>>, %arg44: memref<128x128xf32, #tpu.memory_space<vmem>>, %arg45: memref<1x128xf32, #tpu.memory_space<vmem>>, %arg46: memref<128x128xf32, #tpu.memory_space<vmem>>, %arg47: memref<128x128xf32, #tpu.memory_space<vmem>>, %arg48: memref<1x128xf32, #tpu.memory_space<vmem>>, %arg49: memref<1x128xf32, #tpu.memory_space<vmem>>, %arg50: memref<1x128xf32, #tpu.memory_space<vmem>>, %arg51: memref<1x128xf32, #tpu.memory_space<vmem>>, %arg52: memref<1x128xf32, #tpu.memory_space<vmem>>, %arg53: memref<128x128xf32, #tpu.memory_space<vmem>>, %arg54: memref<128x128xf32, #tpu.memory_space<vmem>>, %arg55: memref<1x128xf32, #tpu.memory_space<vmem>>, %arg56: memref<1x128xf32, #tpu.memory_space<vmem>>, %arg57: memref<1x128xf32, #tpu.memory_space<vmem>>, %arg58: memref<128x128xf32, #tpu.memory_space<vmem>>, %arg59: memref<1x128xf32, #tpu.memory_space<vmem>>, %arg60: memref<128x128xf32, #tpu.memory_space<vmem>>, %arg61: memref<128x128xf32, #tpu.memory_space<vmem>>, %arg62: memref<1x128xf32, #tpu.memory_space<vmem>>, %arg63: memref<128x8xf32, #tpu.memory_space<vmem>>, %arg64: memref<1x8xf32, #tpu.memory_space<vmem>>, %arg65: memref<16x8xf32, #tpu.memory_space<vmem>>) attributes {dimension_semantics = [], scalar_prefetch = 0 : i64, scratch_operands = 0 : i64, tpu.core_type = #tpu.core_type<tc>} {
    %c0 = arith.constant 0 : index
    %c0_0 = arith.constant 0 : index
    %0 = vector.load %arg1[%c0, %c0_0] : memref<16x8xf32, #tpu.memory_space<vmem>>, vector<16x8xf32>
    %c0_1 = arith.constant 0 : index
    %c0_2 = arith.constant 0 : index
    %1 = vector.load %arg2[%c0_1, %c0_2] : memref<16x16xf32, #tpu.memory_space<vmem>>, vector<16x16xf32>
    %c0_3 = arith.constant 0 : index
    %c0_4 = arith.constant 0 : index
    %2 = vector.load %arg3[%c0_3, %c0_4] : memref<1x128xf32, #tpu.memory_space<vmem>>, vector<1x128xf32>
    %c0_5 = arith.constant 0 : index
    %c0_6 = arith.constant 0 : index
    %3 = vector.load %arg4[%c0_5, %c0_6] : memref<1x128xf32, #tpu.memory_space<vmem>>, vector<1x128xf32>
    %c0_7 = arith.constant 0 : index
    %c0_8 = arith.constant 0 : index
    %4 = vector.load %arg5[%c0_7, %c0_8] : memref<128x128xf32, #tpu.memory_space<vmem>>, vector<128x128xf32>
    %c0_9 = arith.constant 0 : index
    %c0_10 = arith.constant 0 : index
    %5 = vector.load %arg6[%c0_9, %c0_10] : memref<1x128xf32, #tpu.memory_space<vmem>>, vector<1x128xf32>
    %c0_11 = arith.constant 0 : index
    %c0_12 = arith.constant 0 : index
    %6 = vector.load %arg7[%c0_11, %c0_12] : memref<128x1280xf32, #tpu.memory_space<vmem>>, vector<128x1280xf32>
    %c0_13 = arith.constant 0 : index
    %c0_14 = arith.constant 0 : index
    %7 = vector.load %arg8[%c0_13, %c0_14] : memref<1x1280xf32, #tpu.memory_space<vmem>>, vector<1x1280xf32>
    %c0_15 = arith.constant 0 : index
    %c0_16 = arith.constant 0 : index
    %8 = vector.load %arg9[%c0_15, %c0_16] : memref<8x128xf32, #tpu.memory_space<vmem>>, vector<8x128xf32>
    %c0_17 = arith.constant 0 : index
    %c0_18 = arith.constant 0 : index
    %9 = vector.load %arg10[%c0_17, %c0_18] : memref<1x128xf32, #tpu.memory_space<vmem>>, vector<1x128xf32>
    %c0_19 = arith.constant 0 : index
    %c0_20 = arith.constant 0 : index
    %10 = memref.load %arg0[%c0_19, %c0_20] : memref<1x1xf32, #tpu.memory_space<smem>>
    %11 = vector.broadcast %10 : f32 to vector<1x128xf32>
    %12 = arith.mulf %11, %2 : vector<1x128xf32>
    %13 = arith.addf %12, %3 : vector<1x128xf32>
    %14 = arith.negf %13 : vector<1x128xf32>
    %15 = math.exp %14 : vector<1x128xf32>
    %cst = arith.constant 1.000000e+00 : f32
    %16 = vector.broadcast %cst : f32 to vector<1x128xf32>
    %17 = arith.addf %16, %15 : vector<1x128xf32>
    %18 = arith.divf %16, %17 : vector<1x128xf32>
    %19 = arith.mulf %13, %18 : vector<1x128xf32>
    %cst_21 = arith.constant dense<0.000000e+00> : vector<1x128xf32>
    %20 = tpu.matmul %19, %4, %cst_21 {dimension_numbers = #tpu.dot_dimension_numbers<[1], [0], [0], [1], [0, 0, 1, 1], [], []>} : vector<1x128xf32>, vector<128x128xf32>, vector<1x128xf32> -> vector<1x128xf32>
    %21 = arith.addf %20, %5 : vector<1x128xf32>
    %cst_22 = arith.constant dense<0.000000e+00> : vector<1x1280xf32>
    %22 = tpu.matmul %21, %6, %cst_22 {dimension_numbers = #tpu.dot_dimension_numbers<[1], [0], [0], [1], [0, 0, 1, 1], [], []>} : vector<1x128xf32>, vector<128x1280xf32>, vector<1x1280xf32> -> vector<1x1280xf32>
    %23 = arith.addf %22, %7 : vector<1x1280xf32>
    %cst_23 = arith.constant dense<0.000000e+00> : vector<16x128xf32>
    %24 = tpu.matmul %0, %8, %cst_23 {dimension_numbers = #tpu.dot_dimension_numbers<[1], [0], [0], [1], [0, 0, 1, 1], [], []>} : vector<16x8xf32>, vector<8x128xf32>, vector<16x128xf32> -> vector<16x128xf32>
    %25 = vector.broadcast %9 : vector<1x128xf32> to vector<16x128xf32>
    %26 = arith.addf %24, %25 : vector<16x128xf32>
    %c0_24 = arith.constant 0 : index
    %c0_25 = arith.constant 0 : index
    %27 = vector.load %arg11[%c0_24, %c0_25] : memref<1x128xf32, #tpu.memory_space<vmem>>, vector<1x128xf32>
    %c0_26 = arith.constant 0 : index
    %c0_27 = arith.constant 0 : index
    %28 = vector.load %arg12[%c0_26, %c0_27] : memref<1x128xf32, #tpu.memory_space<vmem>>, vector<1x128xf32>
    %c0_28 = arith.constant 0 : index
    %c0_29 = arith.constant 0 : index
    %29 = vector.load %arg13[%c0_28, %c0_29] : memref<128x128xf32, #tpu.memory_space<vmem>>, vector<128x128xf32>
    %c0_30 = arith.constant 0 : index
    %c0_31 = arith.constant 0 : index
    %30 = vector.load %arg14[%c0_30, %c0_31] : memref<1x128xf32, #tpu.memory_space<vmem>>, vector<1x128xf32>
    %c0_32 = arith.constant 0 : index
    %c0_33 = arith.constant 0 : index
    %31 = vector.load %arg15[%c0_32, %c0_33] : memref<1x128xf32, #tpu.memory_space<vmem>>, vector<1x128xf32>
    %c0_34 = arith.constant 0 : index
    %c0_35 = arith.constant 0 : index
    %32 = vector.load %arg16[%c0_34, %c0_35] : memref<1x128xf32, #tpu.memory_space<vmem>>, vector<1x128xf32>
    %c0_36 = arith.constant 0 : index
    %c0_37 = arith.constant 0 : index
    %33 = vector.load %arg17[%c0_36, %c0_37] : memref<128x128xf32, #tpu.memory_space<vmem>>, vector<128x128xf32>
    %c0_38 = arith.constant 0 : index
    %c0_39 = arith.constant 0 : index
    %34 = vector.load %arg18[%c0_38, %c0_39] : memref<1x128xf32, #tpu.memory_space<vmem>>, vector<1x128xf32>
    %cst_40 = arith.constant dense<0.000000e+00> : vector<16xf32>
    %35 = vector.multi_reduction <add>, %26, %cst_40 [1] : vector<16x128xf32> to vector<16xf32>
    %36 = vector.shape_cast %35 : vector<16xf32> to vector<16x1xf32>
    %cst_41 = arith.constant 1.280000e+02 : f32
    %37 = vector.broadcast %cst_41 : f32 to vector<16x1xf32>
    %38 = arith.divf %36, %37 : vector<16x1xf32>
    %39 = vector.broadcast %38 : vector<16x1xf32> to vector<16x128xf32>
    %40 = arith.subf %26, %39 : vector<16x128xf32>
    %41 = arith.mulf %40, %40 : vector<16x128xf32>
    %cst_42 = arith.constant dense<0.000000e+00> : vector<16xf32>
    %42 = vector.multi_reduction <add>, %41, %cst_42 [1] : vector<16x128xf32> to vector<16xf32>
    %43 = vector.shape_cast %42 : vector<16xf32> to vector<16x1xf32>
    %cst_43 = arith.constant 1.280000e+02 : f32
    %44 = vector.broadcast %cst_43 : f32 to vector<16x1xf32>
    %45 = arith.divf %43, %44 : vector<16x1xf32>
    %46 = vector.broadcast %38 : vector<16x1xf32> to vector<16x128xf32>
    %47 = arith.subf %26, %46 : vector<16x128xf32>
    %cst_44 = arith.constant 9.99999974E-6 : f32
    %48 = vector.broadcast %cst_44 : f32 to vector<16x1xf32>
    %49 = arith.addf %45, %48 : vector<16x1xf32>
    %50 = math.rsqrt %49 : vector<16x1xf32>
    %51 = vector.broadcast %50 : vector<16x1xf32> to vector<16x128xf32>
    %52 = arith.mulf %47, %51 : vector<16x128xf32>
    %53 = vector.broadcast %27 : vector<1x128xf32> to vector<16x128xf32>
    %54 = arith.mulf %52, %53 : vector<16x128xf32>
    %55 = vector.broadcast %28 : vector<1x128xf32> to vector<16x128xf32>
    %56 = arith.addf %54, %55 : vector<16x128xf32>
    %cst_45 = arith.constant dense<0.000000e+00> : vector<16x128xf32>
    %57 = tpu.matmul %56, %29, %cst_45 {dimension_numbers = #tpu.dot_dimension_numbers<[1], [0], [0], [1], [0, 0, 1, 1], [], []>} : vector<16x128xf32>, vector<128x128xf32>, vector<16x128xf32> -> vector<16x128xf32>
    %cst_46 = arith.constant dense<0.000000e+00> : vector<16x128xf32>
    %58 = tpu.matmul %1, %57, %cst_46 {dimension_numbers = #tpu.dot_dimension_numbers<[1], [0], [0], [1], [0, 0, 1, 1], [], []>} : vector<16x16xf32>, vector<16x128xf32>, vector<16x128xf32> -> vector<16x128xf32>
    %59 = vector.broadcast %30 : vector<1x128xf32> to vector<16x128xf32>
    %60 = arith.addf %58, %59 : vector<16x128xf32>
    %61 = vector.extract_strided_slice %23 {offsets = [0, 0], sizes = [1, 128], strides = [1, 1]} : vector<1x1280xf32> to vector<1x128xf32>
    %62 = vector.broadcast %61 : vector<1x128xf32> to vector<16x128xf32>
    %63 = arith.addf %60, %62 : vector<16x128xf32>
    %64 = arith.negf %63 : vector<16x128xf32>
    %65 = math.exp %64 : vector<16x128xf32>
    %cst_47 = arith.constant 1.000000e+00 : f32
    %66 = vector.broadcast %cst_47 : f32 to vector<16x128xf32>
    %67 = arith.addf %66, %65 : vector<16x128xf32>
    %68 = arith.divf %66, %67 : vector<16x128xf32>
    %69 = arith.mulf %63, %68 : vector<16x128xf32>
    %cst_48 = arith.constant dense<0.000000e+00> : vector<16xf32>
    %70 = vector.multi_reduction <add>, %69, %cst_48 [1] : vector<16x128xf32> to vector<16xf32>
    %71 = vector.shape_cast %70 : vector<16xf32> to vector<16x1xf32>
    %cst_49 = arith.constant 1.280000e+02 : f32
    %72 = vector.broadcast %cst_49 : f32 to vector<16x1xf32>
    %73 = arith.divf %71, %72 : vector<16x1xf32>
    %74 = vector.broadcast %73 : vector<16x1xf32> to vector<16x128xf32>
    %75 = arith.subf %69, %74 : vector<16x128xf32>
    %76 = arith.mulf %75, %75 : vector<16x128xf32>
    %cst_50 = arith.constant dense<0.000000e+00> : vector<16xf32>
    %77 = vector.multi_reduction <add>, %76, %cst_50 [1] : vector<16x128xf32> to vector<16xf32>
    %78 = vector.shape_cast %77 : vector<16xf32> to vector<16x1xf32>
    %cst_51 = arith.constant 1.280000e+02 : f32
    %79 = vector.broadcast %cst_51 : f32 to vector<16x1xf32>
    %80 = arith.divf %78, %79 : vector<16x1xf32>
    %81 = vector.broadcast %73 : vector<16x1xf32> to vector<16x128xf32>
    %82 = arith.subf %69, %81 : vector<16x128xf32>
    %cst_52 = arith.constant 9.99999974E-6 : f32
    %83 = vector.broadcast %cst_52 : f32 to vector<16x1xf32>
    %84 = arith.addf %80, %83 : vector<16x1xf32>
    %85 = math.rsqrt %84 : vector<16x1xf32>
    %86 = vector.broadcast %85 : vector<16x1xf32> to vector<16x128xf32>
    %87 = arith.mulf %82, %86 : vector<16x128xf32>
    %88 = vector.broadcast %31 : vector<1x128xf32> to vector<16x128xf32>
    %89 = arith.mulf %87, %88 : vector<16x128xf32>
    %90 = vector.broadcast %32 : vector<1x128xf32> to vector<16x128xf32>
    %91 = arith.addf %89, %90 : vector<16x128xf32>
    %cst_53 = arith.constant dense<0.000000e+00> : vector<16x128xf32>
    %92 = tpu.matmul %91, %33, %cst_53 {dimension_numbers = #tpu.dot_dimension_numbers<[1], [0], [0], [1], [0, 0, 1, 1], [], []>} : vector<16x128xf32>, vector<128x128xf32>, vector<16x128xf32> -> vector<16x128xf32>
    %cst_54 = arith.constant dense<0.000000e+00> : vector<16x128xf32>
    %93 = tpu.matmul %1, %92, %cst_54 {dimension_numbers = #tpu.dot_dimension_numbers<[1], [0], [0], [1], [0, 0, 1, 1], [], []>} : vector<16x16xf32>, vector<16x128xf32>, vector<16x128xf32> -> vector<16x128xf32>
    %94 = vector.broadcast %34 : vector<1x128xf32> to vector<16x128xf32>
    %95 = arith.addf %93, %94 : vector<16x128xf32>
    %96 = vector.extract_strided_slice %23 {offsets = [0, 128], sizes = [1, 128], strides = [1, 1]} : vector<1x1280xf32> to vector<1x128xf32>
    %97 = vector.broadcast %96 : vector<1x128xf32> to vector<16x128xf32>
    %98 = arith.addf %95, %97 : vector<16x128xf32>
    %99 = arith.negf %98 : vector<16x128xf32>
    %100 = math.exp %99 : vector<16x128xf32>
    %cst_55 = arith.constant 1.000000e+00 : f32
    %101 = vector.broadcast %cst_55 : f32 to vector<16x128xf32>
    %102 = arith.addf %101, %100 : vector<16x128xf32>
    %103 = arith.divf %101, %102 : vector<16x128xf32>
    %104 = arith.mulf %98, %103 : vector<16x128xf32>
    %105 = arith.addf %104, %26 : vector<16x128xf32>
    %c0_56 = arith.constant 0 : index
    %c0_57 = arith.constant 0 : index
    %106 = vector.load %arg19[%c0_56, %c0_57] : memref<1x128xf32, #tpu.memory_space<vmem>>, vector<1x128xf32>
    %c0_58 = arith.constant 0 : index
    %c0_59 = arith.constant 0 : index
    %107 = vector.load %arg20[%c0_58, %c0_59] : memref<1x128xf32, #tpu.memory_space<vmem>>, vector<1x128xf32>
    %c0_60 = arith.constant 0 : index
    %c0_61 = arith.constant 0 : index
    %108 = vector.load %arg21[%c0_60, %c0_61] : memref<128x128xf32, #tpu.memory_space<vmem>>, vector<128x128xf32>
    %c0_62 = arith.constant 0 : index
    %c0_63 = arith.constant 0 : index
    %109 = vector.load %arg22[%c0_62, %c0_63] : memref<1x128xf32, #tpu.memory_space<vmem>>, vector<1x128xf32>
    %c0_64 = arith.constant 0 : index
    %c0_65 = arith.constant 0 : index
    %110 = vector.load %arg23[%c0_64, %c0_65] : memref<1x128xf32, #tpu.memory_space<vmem>>, vector<1x128xf32>
    %c0_66 = arith.constant 0 : index
    %c0_67 = arith.constant 0 : index
    %111 = vector.load %arg24[%c0_66, %c0_67] : memref<1x128xf32, #tpu.memory_space<vmem>>, vector<1x128xf32>
    %c0_68 = arith.constant 0 : index
    %c0_69 = arith.constant 0 : index
    %112 = vector.load %arg25[%c0_68, %c0_69] : memref<128x128xf32, #tpu.memory_space<vmem>>, vector<128x128xf32>
    %c0_70 = arith.constant 0 : index
    %c0_71 = arith.constant 0 : index
    %113 = vector.load %arg26[%c0_70, %c0_71] : memref<1x128xf32, #tpu.memory_space<vmem>>, vector<1x128xf32>
    %cst_72 = arith.constant dense<0.000000e+00> : vector<16xf32>
    %114 = vector.multi_reduction <add>, %105, %cst_72 [1] : vector<16x128xf32> to vector<16xf32>
    %115 = vector.shape_cast %114 : vector<16xf32> to vector<16x1xf32>
    %cst_73 = arith.constant 1.280000e+02 : f32
    %116 = vector.broadcast %cst_73 : f32 to vector<16x1xf32>
    %117 = arith.divf %115, %116 : vector<16x1xf32>
    %118 = vector.broadcast %117 : vector<16x1xf32> to vector<16x128xf32>
    %119 = arith.subf %105, %118 : vector<16x128xf32>
    %120 = arith.mulf %119, %119 : vector<16x128xf32>
    %cst_74 = arith.constant dense<0.000000e+00> : vector<16xf32>
    %121 = vector.multi_reduction <add>, %120, %cst_74 [1] : vector<16x128xf32> to vector<16xf32>
    %122 = vector.shape_cast %121 : vector<16xf32> to vector<16x1xf32>
    %cst_75 = arith.constant 1.280000e+02 : f32
    %123 = vector.broadcast %cst_75 : f32 to vector<16x1xf32>
    %124 = arith.divf %122, %123 : vector<16x1xf32>
    %125 = vector.broadcast %117 : vector<16x1xf32> to vector<16x128xf32>
    %126 = arith.subf %105, %125 : vector<16x128xf32>
    %cst_76 = arith.constant 9.99999974E-6 : f32
    %127 = vector.broadcast %cst_76 : f32 to vector<16x1xf32>
    %128 = arith.addf %124, %127 : vector<16x1xf32>
    %129 = math.rsqrt %128 : vector<16x1xf32>
    %130 = vector.broadcast %129 : vector<16x1xf32> to vector<16x128xf32>
    %131 = arith.mulf %126, %130 : vector<16x128xf32>
    %132 = vector.broadcast %106 : vector<1x128xf32> to vector<16x128xf32>
    %133 = arith.mulf %131, %132 : vector<16x128xf32>
    %134 = vector.broadcast %107 : vector<1x128xf32> to vector<16x128xf32>
    %135 = arith.addf %133, %134 : vector<16x128xf32>
    %cst_77 = arith.constant dense<0.000000e+00> : vector<16x128xf32>
    %136 = tpu.matmul %135, %108, %cst_77 {dimension_numbers = #tpu.dot_dimension_numbers<[1], [0], [0], [1], [0, 0, 1, 1], [], []>} : vector<16x128xf32>, vector<128x128xf32>, vector<16x128xf32> -> vector<16x128xf32>
    %cst_78 = arith.constant dense<0.000000e+00> : vector<16x128xf32>
    %137 = tpu.matmul %1, %136, %cst_78 {dimension_numbers = #tpu.dot_dimension_numbers<[1], [0], [0], [1], [0, 0, 1, 1], [], []>} : vector<16x16xf32>, vector<16x128xf32>, vector<16x128xf32> -> vector<16x128xf32>
    %138 = vector.broadcast %109 : vector<1x128xf32> to vector<16x128xf32>
    %139 = arith.addf %137, %138 : vector<16x128xf32>
    %140 = vector.extract_strided_slice %23 {offsets = [0, 256], sizes = [1, 128], strides = [1, 1]} : vector<1x1280xf32> to vector<1x128xf32>
    %141 = vector.broadcast %140 : vector<1x128xf32> to vector<16x128xf32>
    %142 = arith.addf %139, %141 : vector<16x128xf32>
    %143 = arith.negf %142 : vector<16x128xf32>
    %144 = math.exp %143 : vector<16x128xf32>
    %cst_79 = arith.constant 1.000000e+00 : f32
    %145 = vector.broadcast %cst_79 : f32 to vector<16x128xf32>
    %146 = arith.addf %145, %144 : vector<16x128xf32>
    %147 = arith.divf %145, %146 : vector<16x128xf32>
    %148 = arith.mulf %142, %147 : vector<16x128xf32>
    %cst_80 = arith.constant dense<0.000000e+00> : vector<16xf32>
    %149 = vector.multi_reduction <add>, %148, %cst_80 [1] : vector<16x128xf32> to vector<16xf32>
    %150 = vector.shape_cast %149 : vector<16xf32> to vector<16x1xf32>
    %cst_81 = arith.constant 1.280000e+02 : f32
    %151 = vector.broadcast %cst_81 : f32 to vector<16x1xf32>
    %152 = arith.divf %150, %151 : vector<16x1xf32>
    %153 = vector.broadcast %152 : vector<16x1xf32> to vector<16x128xf32>
    %154 = arith.subf %148, %153 : vector<16x128xf32>
    %155 = arith.mulf %154, %154 : vector<16x128xf32>
    %cst_82 = arith.constant dense<0.000000e+00> : vector<16xf32>
    %156 = vector.multi_reduction <add>, %155, %cst_82 [1] : vector<16x128xf32> to vector<16xf32>
    %157 = vector.shape_cast %156 : vector<16xf32> to vector<16x1xf32>
    %cst_83 = arith.constant 1.280000e+02 : f32
    %158 = vector.broadcast %cst_83 : f32 to vector<16x1xf32>
    %159 = arith.divf %157, %158 : vector<16x1xf32>
    %160 = vector.broadcast %152 : vector<16x1xf32> to vector<16x128xf32>
    %161 = arith.subf %148, %160 : vector<16x128xf32>
    %cst_84 = arith.constant 9.99999974E-6 : f32
    %162 = vector.broadcast %cst_84 : f32 to vector<16x1xf32>
    %163 = arith.addf %159, %162 : vector<16x1xf32>
    %164 = math.rsqrt %163 : vector<16x1xf32>
    %165 = vector.broadcast %164 : vector<16x1xf32> to vector<16x128xf32>
    %166 = arith.mulf %161, %165 : vector<16x128xf32>
    %167 = vector.broadcast %110 : vector<1x128xf32> to vector<16x128xf32>
    %168 = arith.mulf %166, %167 : vector<16x128xf32>
    %169 = vector.broadcast %111 : vector<1x128xf32> to vector<16x128xf32>
    %170 = arith.addf %168, %169 : vector<16x128xf32>
    %cst_85 = arith.constant dense<0.000000e+00> : vector<16x128xf32>
    %171 = tpu.matmul %170, %112, %cst_85 {dimension_numbers = #tpu.dot_dimension_numbers<[1], [0], [0], [1], [0, 0, 1, 1], [], []>} : vector<16x128xf32>, vector<128x128xf32>, vector<16x128xf32> -> vector<16x128xf32>
    %cst_86 = arith.constant dense<0.000000e+00> : vector<16x128xf32>
    %172 = tpu.matmul %1, %171, %cst_86 {dimension_numbers = #tpu.dot_dimension_numbers<[1], [0], [0], [1], [0, 0, 1, 1], [], []>} : vector<16x16xf32>, vector<16x128xf32>, vector<16x128xf32> -> vector<16x128xf32>
    %173 = vector.broadcast %113 : vector<1x128xf32> to vector<16x128xf32>
    %174 = arith.addf %172, %173 : vector<16x128xf32>
    %175 = vector.extract_strided_slice %23 {offsets = [0, 384], sizes = [1, 128], strides = [1, 1]} : vector<1x1280xf32> to vector<1x128xf32>
    %176 = vector.broadcast %175 : vector<1x128xf32> to vector<16x128xf32>
    %177 = arith.addf %174, %176 : vector<16x128xf32>
    %178 = arith.negf %177 : vector<16x128xf32>
    %179 = math.exp %178 : vector<16x128xf32>
    %cst_87 = arith.constant 1.000000e+00 : f32
    %180 = vector.broadcast %cst_87 : f32 to vector<16x128xf32>
    %181 = arith.addf %180, %179 : vector<16x128xf32>
    %182 = arith.divf %180, %181 : vector<16x128xf32>
    %183 = arith.mulf %177, %182 : vector<16x128xf32>
    %184 = arith.addf %183, %105 : vector<16x128xf32>
    %c0_88 = arith.constant 0 : index
    %c0_89 = arith.constant 0 : index
    %185 = vector.load %arg27[%c0_88, %c0_89] : memref<1x128xf32, #tpu.memory_space<vmem>>, vector<1x128xf32>
    %c0_90 = arith.constant 0 : index
    %c0_91 = arith.constant 0 : index
    %186 = vector.load %arg28[%c0_90, %c0_91] : memref<1x128xf32, #tpu.memory_space<vmem>>, vector<1x128xf32>
    %c0_92 = arith.constant 0 : index
    %c0_93 = arith.constant 0 : index
    %187 = vector.load %arg29[%c0_92, %c0_93] : memref<128x128xf32, #tpu.memory_space<vmem>>, vector<128x128xf32>
    %c0_94 = arith.constant 0 : index
    %c0_95 = arith.constant 0 : index
    %188 = vector.load %arg30[%c0_94, %c0_95] : memref<1x128xf32, #tpu.memory_space<vmem>>, vector<1x128xf32>
    %c0_96 = arith.constant 0 : index
    %c0_97 = arith.constant 0 : index
    %189 = vector.load %arg31[%c0_96, %c0_97] : memref<1x128xf32, #tpu.memory_space<vmem>>, vector<1x128xf32>
    %c0_98 = arith.constant 0 : index
    %c0_99 = arith.constant 0 : index
    %190 = vector.load %arg32[%c0_98, %c0_99] : memref<1x128xf32, #tpu.memory_space<vmem>>, vector<1x128xf32>
    %c0_100 = arith.constant 0 : index
    %c0_101 = arith.constant 0 : index
    %191 = vector.load %arg33[%c0_100, %c0_101] : memref<128x128xf32, #tpu.memory_space<vmem>>, vector<128x128xf32>
    %c0_102 = arith.constant 0 : index
    %c0_103 = arith.constant 0 : index
    %192 = vector.load %arg34[%c0_102, %c0_103] : memref<1x128xf32, #tpu.memory_space<vmem>>, vector<1x128xf32>
    %cst_104 = arith.constant dense<0.000000e+00> : vector<16xf32>
    %193 = vector.multi_reduction <add>, %184, %cst_104 [1] : vector<16x128xf32> to vector<16xf32>
    %194 = vector.shape_cast %193 : vector<16xf32> to vector<16x1xf32>
    %cst_105 = arith.constant 1.280000e+02 : f32
    %195 = vector.broadcast %cst_105 : f32 to vector<16x1xf32>
    %196 = arith.divf %194, %195 : vector<16x1xf32>
    %197 = vector.broadcast %196 : vector<16x1xf32> to vector<16x128xf32>
    %198 = arith.subf %184, %197 : vector<16x128xf32>
    %199 = arith.mulf %198, %198 : vector<16x128xf32>
    %cst_106 = arith.constant dense<0.000000e+00> : vector<16xf32>
    %200 = vector.multi_reduction <add>, %199, %cst_106 [1] : vector<16x128xf32> to vector<16xf32>
    %201 = vector.shape_cast %200 : vector<16xf32> to vector<16x1xf32>
    %cst_107 = arith.constant 1.280000e+02 : f32
    %202 = vector.broadcast %cst_107 : f32 to vector<16x1xf32>
    %203 = arith.divf %201, %202 : vector<16x1xf32>
    %204 = vector.broadcast %196 : vector<16x1xf32> to vector<16x128xf32>
    %205 = arith.subf %184, %204 : vector<16x128xf32>
    %cst_108 = arith.constant 9.99999974E-6 : f32
    %206 = vector.broadcast %cst_108 : f32 to vector<16x1xf32>
    %207 = arith.addf %203, %206 : vector<16x1xf32>
    %208 = math.rsqrt %207 : vector<16x1xf32>
    %209 = vector.broadcast %208 : vector<16x1xf32> to vector<16x128xf32>
    %210 = arith.mulf %205, %209 : vector<16x128xf32>
    %211 = vector.broadcast %185 : vector<1x128xf32> to vector<16x128xf32>
    %212 = arith.mulf %210, %211 : vector<16x128xf32>
    %213 = vector.broadcast %186 : vector<1x128xf32> to vector<16x128xf32>
    %214 = arith.addf %212, %213 : vector<16x128xf32>
    %cst_109 = arith.constant dense<0.000000e+00> : vector<16x128xf32>
    %215 = tpu.matmul %214, %187, %cst_109 {dimension_numbers = #tpu.dot_dimension_numbers<[1], [0], [0], [1], [0, 0, 1, 1], [], []>} : vector<16x128xf32>, vector<128x128xf32>, vector<16x128xf32> -> vector<16x128xf32>
    %cst_110 = arith.constant dense<0.000000e+00> : vector<16x128xf32>
    %216 = tpu.matmul %1, %215, %cst_110 {dimension_numbers = #tpu.dot_dimension_numbers<[1], [0], [0], [1], [0, 0, 1, 1], [], []>} : vector<16x16xf32>, vector<16x128xf32>, vector<16x128xf32> -> vector<16x128xf32>
    %217 = vector.broadcast %188 : vector<1x128xf32> to vector<16x128xf32>
    %218 = arith.addf %216, %217 : vector<16x128xf32>
    %219 = vector.extract_strided_slice %23 {offsets = [0, 512], sizes = [1, 128], strides = [1, 1]} : vector<1x1280xf32> to vector<1x128xf32>
    %220 = vector.broadcast %219 : vector<1x128xf32> to vector<16x128xf32>
    %221 = arith.addf %218, %220 : vector<16x128xf32>
    %222 = arith.negf %221 : vector<16x128xf32>
    %223 = math.exp %222 : vector<16x128xf32>
    %cst_111 = arith.constant 1.000000e+00 : f32
    %224 = vector.broadcast %cst_111 : f32 to vector<16x128xf32>
    %225 = arith.addf %224, %223 : vector<16x128xf32>
    %226 = arith.divf %224, %225 : vector<16x128xf32>
    %227 = arith.mulf %221, %226 : vector<16x128xf32>
    %cst_112 = arith.constant dense<0.000000e+00> : vector<16xf32>
    %228 = vector.multi_reduction <add>, %227, %cst_112 [1] : vector<16x128xf32> to vector<16xf32>
    %229 = vector.shape_cast %228 : vector<16xf32> to vector<16x1xf32>
    %cst_113 = arith.constant 1.280000e+02 : f32
    %230 = vector.broadcast %cst_113 : f32 to vector<16x1xf32>
    %231 = arith.divf %229, %230 : vector<16x1xf32>
    %232 = vector.broadcast %231 : vector<16x1xf32> to vector<16x128xf32>
    %233 = arith.subf %227, %232 : vector<16x128xf32>
    %234 = arith.mulf %233, %233 : vector<16x128xf32>
    %cst_114 = arith.constant dense<0.000000e+00> : vector<16xf32>
    %235 = vector.multi_reduction <add>, %234, %cst_114 [1] : vector<16x128xf32> to vector<16xf32>
    %236 = vector.shape_cast %235 : vector<16xf32> to vector<16x1xf32>
    %cst_115 = arith.constant 1.280000e+02 : f32
    %237 = vector.broadcast %cst_115 : f32 to vector<16x1xf32>
    %238 = arith.divf %236, %237 : vector<16x1xf32>
    %239 = vector.broadcast %231 : vector<16x1xf32> to vector<16x128xf32>
    %240 = arith.subf %227, %239 : vector<16x128xf32>
    %cst_116 = arith.constant 9.99999974E-6 : f32
    %241 = vector.broadcast %cst_116 : f32 to vector<16x1xf32>
    %242 = arith.addf %238, %241 : vector<16x1xf32>
    %243 = math.rsqrt %242 : vector<16x1xf32>
    %244 = vector.broadcast %243 : vector<16x1xf32> to vector<16x128xf32>
    %245 = arith.mulf %240, %244 : vector<16x128xf32>
    %246 = vector.broadcast %189 : vector<1x128xf32> to vector<16x128xf32>
    %247 = arith.mulf %245, %246 : vector<16x128xf32>
    %248 = vector.broadcast %190 : vector<1x128xf32> to vector<16x128xf32>
    %249 = arith.addf %247, %248 : vector<16x128xf32>
    %cst_117 = arith.constant dense<0.000000e+00> : vector<16x128xf32>
    %250 = tpu.matmul %249, %191, %cst_117 {dimension_numbers = #tpu.dot_dimension_numbers<[1], [0], [0], [1], [0, 0, 1, 1], [], []>} : vector<16x128xf32>, vector<128x128xf32>, vector<16x128xf32> -> vector<16x128xf32>
    %cst_118 = arith.constant dense<0.000000e+00> : vector<16x128xf32>
    %251 = tpu.matmul %1, %250, %cst_118 {dimension_numbers = #tpu.dot_dimension_numbers<[1], [0], [0], [1], [0, 0, 1, 1], [], []>} : vector<16x16xf32>, vector<16x128xf32>, vector<16x128xf32> -> vector<16x128xf32>
    %252 = vector.broadcast %192 : vector<1x128xf32> to vector<16x128xf32>
    %253 = arith.addf %251, %252 : vector<16x128xf32>
    %254 = vector.extract_strided_slice %23 {offsets = [0, 640], sizes = [1, 128], strides = [1, 1]} : vector<1x1280xf32> to vector<1x128xf32>
    %255 = vector.broadcast %254 : vector<1x128xf32> to vector<16x128xf32>
    %256 = arith.addf %253, %255 : vector<16x128xf32>
    %257 = arith.negf %256 : vector<16x128xf32>
    %258 = math.exp %257 : vector<16x128xf32>
    %cst_119 = arith.constant 1.000000e+00 : f32
    %259 = vector.broadcast %cst_119 : f32 to vector<16x128xf32>
    %260 = arith.addf %259, %258 : vector<16x128xf32>
    %261 = arith.divf %259, %260 : vector<16x128xf32>
    %262 = arith.mulf %256, %261 : vector<16x128xf32>
    %263 = arith.addf %262, %184 : vector<16x128xf32>
    %c0_120 = arith.constant 0 : index
    %c0_121 = arith.constant 0 : index
    %264 = vector.load %arg35[%c0_120, %c0_121] : memref<1x128xf32, #tpu.memory_space<vmem>>, vector<1x128xf32>
    %c0_122 = arith.constant 0 : index
    %c0_123 = arith.constant 0 : index
    %265 = vector.load %arg36[%c0_122, %c0_123] : memref<1x128xf32, #tpu.memory_space<vmem>>, vector<1x128xf32>
    %c0_124 = arith.constant 0 : index
    %c0_125 = arith.constant 0 : index
    %266 = vector.load %arg37[%c0_124, %c0_125] : memref<1x128xf32, #tpu.memory_space<vmem>>, vector<1x128xf32>
    %c0_126 = arith.constant 0 : index
    %c0_127 = arith.constant 0 : index
    %267 = vector.load %arg38[%c0_126, %c0_127] : memref<1x128xf32, #tpu.memory_space<vmem>>, vector<1x128xf32>
    %c0_128 = arith.constant 0 : index
    %c0_129 = arith.constant 0 : index
    %268 = vector.load %arg39[%c0_128, %c0_129] : memref<128x128xf32, #tpu.memory_space<vmem>>, vector<128x128xf32>
    %c0_130 = arith.constant 0 : index
    %c0_131 = arith.constant 0 : index
    %269 = vector.load %arg40[%c0_130, %c0_131] : memref<128x128xf32, #tpu.memory_space<vmem>>, vector<128x128xf32>
    %c0_132 = arith.constant 0 : index
    %c0_133 = arith.constant 0 : index
    %270 = vector.load %arg41[%c0_132, %c0_133] : memref<1x128xf32, #tpu.memory_space<vmem>>, vector<1x128xf32>
    %c0_134 = arith.constant 0 : index
    %c0_135 = arith.constant 0 : index
    %271 = vector.load %arg42[%c0_134, %c0_135] : memref<1x128xf32, #tpu.memory_space<vmem>>, vector<1x128xf32>
    %c0_136 = arith.constant 0 : index
    %c0_137 = arith.constant 0 : index
    %272 = vector.load %arg43[%c0_136, %c0_137] : memref<1x128xf32, #tpu.memory_space<vmem>>, vector<1x128xf32>
    %c0_138 = arith.constant 0 : index
    %c0_139 = arith.constant 0 : index
    %273 = vector.load %arg44[%c0_138, %c0_139] : memref<128x128xf32, #tpu.memory_space<vmem>>, vector<128x128xf32>
    %c0_140 = arith.constant 0 : index
    %c0_141 = arith.constant 0 : index
    %274 = vector.load %arg45[%c0_140, %c0_141] : memref<1x128xf32, #tpu.memory_space<vmem>>, vector<1x128xf32>
    %c0_142 = arith.constant 0 : index
    %c0_143 = arith.constant 0 : index
    %275 = vector.load %arg46[%c0_142, %c0_143] : memref<128x128xf32, #tpu.memory_space<vmem>>, vector<128x128xf32>
    %c0_144 = arith.constant 0 : index
    %c0_145 = arith.constant 0 : index
    %276 = vector.load %arg47[%c0_144, %c0_145] : memref<128x128xf32, #tpu.memory_space<vmem>>, vector<128x128xf32>
    %c0_146 = arith.constant 0 : index
    %c0_147 = arith.constant 0 : index
    %277 = vector.load %arg48[%c0_146, %c0_147] : memref<1x128xf32, #tpu.memory_space<vmem>>, vector<1x128xf32>
    %cst_148 = arith.constant dense<0.000000e+00> : vector<16xf32>
    %278 = vector.multi_reduction <add>, %263, %cst_148 [1] : vector<16x128xf32> to vector<16xf32>
    %279 = vector.shape_cast %278 : vector<16xf32> to vector<16x1xf32>
    %cst_149 = arith.constant dense<0.000000e+00> : vector<16xf32>
    %280 = vector.multi_reduction <add>, %184, %cst_149 [1] : vector<16x128xf32> to vector<16xf32>
    %281 = vector.shape_cast %280 : vector<16xf32> to vector<16x1xf32>
    %282 = arith.addf %279, %281 : vector<16x1xf32>
    %cst_150 = arith.constant 2.560000e+02 : f32
    %283 = vector.broadcast %cst_150 : f32 to vector<16x1xf32>
    %284 = arith.divf %282, %283 : vector<16x1xf32>
    %285 = vector.broadcast %284 : vector<16x1xf32> to vector<16x128xf32>
    %286 = arith.subf %263, %285 : vector<16x128xf32>
    %287 = arith.mulf %286, %286 : vector<16x128xf32>
    %cst_151 = arith.constant dense<0.000000e+00> : vector<16xf32>
    %288 = vector.multi_reduction <add>, %287, %cst_151 [1] : vector<16x128xf32> to vector<16xf32>
    %289 = vector.shape_cast %288 : vector<16xf32> to vector<16x1xf32>
    %290 = vector.broadcast %284 : vector<16x1xf32> to vector<16x128xf32>
    %291 = arith.subf %184, %290 : vector<16x128xf32>
    %292 = arith.mulf %291, %291 : vector<16x128xf32>
    %cst_152 = arith.constant dense<0.000000e+00> : vector<16xf32>
    %293 = vector.multi_reduction <add>, %292, %cst_152 [1] : vector<16x128xf32> to vector<16xf32>
    %294 = vector.shape_cast %293 : vector<16xf32> to vector<16x1xf32>
    %295 = arith.addf %289, %294 : vector<16x1xf32>
    %cst_153 = arith.constant 2.560000e+02 : f32
    %296 = vector.broadcast %cst_153 : f32 to vector<16x1xf32>
    %297 = arith.divf %295, %296 : vector<16x1xf32>
    %cst_154 = arith.constant 9.99999974E-6 : f32
    %298 = vector.broadcast %cst_154 : f32 to vector<16x1xf32>
    %299 = arith.addf %297, %298 : vector<16x1xf32>
    %300 = math.rsqrt %299 : vector<16x1xf32>
    %301 = vector.broadcast %284 : vector<16x1xf32> to vector<16x128xf32>
    %302 = arith.subf %263, %301 : vector<16x128xf32>
    %303 = vector.broadcast %300 : vector<16x1xf32> to vector<16x128xf32>
    %304 = arith.mulf %302, %303 : vector<16x128xf32>
    %305 = vector.broadcast %264 : vector<1x128xf32> to vector<16x128xf32>
    %306 = arith.mulf %304, %305 : vector<16x128xf32>
    %307 = vector.broadcast %266 : vector<1x128xf32> to vector<16x128xf32>
    %308 = arith.addf %306, %307 : vector<16x128xf32>
    %309 = vector.broadcast %284 : vector<16x1xf32> to vector<16x128xf32>
    %310 = arith.subf %184, %309 : vector<16x128xf32>
    %311 = vector.broadcast %300 : vector<16x1xf32> to vector<16x128xf32>
    %312 = arith.mulf %310, %311 : vector<16x128xf32>
    %313 = vector.broadcast %265 : vector<1x128xf32> to vector<16x128xf32>
    %314 = arith.mulf %312, %313 : vector<16x128xf32>
    %315 = vector.broadcast %267 : vector<1x128xf32> to vector<16x128xf32>
    %316 = arith.addf %314, %315 : vector<16x128xf32>
    %cst_155 = arith.constant dense<0.000000e+00> : vector<16x128xf32>
    %317 = tpu.matmul %308, %268, %cst_155 {dimension_numbers = #tpu.dot_dimension_numbers<[1], [0], [0], [1], [0, 0, 1, 1], [], []>} : vector<16x128xf32>, vector<128x128xf32>, vector<16x128xf32> -> vector<16x128xf32>
    %cst_156 = arith.constant dense<0.000000e+00> : vector<16x128xf32>
    %318 = tpu.matmul %316, %269, %cst_156 {dimension_numbers = #tpu.dot_dimension_numbers<[1], [0], [0], [1], [0, 0, 1, 1], [], []>} : vector<16x128xf32>, vector<128x128xf32>, vector<16x128xf32> -> vector<16x128xf32>
    %319 = arith.addf %317, %318 : vector<16x128xf32>
    %cst_157 = arith.constant dense<0.000000e+00> : vector<16x128xf32>
    %320 = tpu.matmul %1, %319, %cst_157 {dimension_numbers = #tpu.dot_dimension_numbers<[1], [0], [0], [1], [0, 0, 1, 1], [], []>} : vector<16x16xf32>, vector<16x128xf32>, vector<16x128xf32> -> vector<16x128xf32>
    %321 = vector.broadcast %270 : vector<1x128xf32> to vector<16x128xf32>
    %322 = arith.addf %320, %321 : vector<16x128xf32>
    %323 = vector.extract_strided_slice %23 {offsets = [0, 768], sizes = [1, 128], strides = [1, 1]} : vector<1x1280xf32> to vector<1x128xf32>
    %324 = vector.broadcast %323 : vector<1x128xf32> to vector<16x128xf32>
    %325 = arith.addf %322, %324 : vector<16x128xf32>
    %326 = arith.negf %325 : vector<16x128xf32>
    %327 = math.exp %326 : vector<16x128xf32>
    %cst_158 = arith.constant 1.000000e+00 : f32
    %328 = vector.broadcast %cst_158 : f32 to vector<16x128xf32>
    %329 = arith.addf %328, %327 : vector<16x128xf32>
    %330 = arith.divf %328, %329 : vector<16x128xf32>
    %331 = arith.mulf %325, %330 : vector<16x128xf32>
    %cst_159 = arith.constant dense<0.000000e+00> : vector<16xf32>
    %332 = vector.multi_reduction <add>, %331, %cst_159 [1] : vector<16x128xf32> to vector<16xf32>
    %333 = vector.shape_cast %332 : vector<16xf32> to vector<16x1xf32>
    %cst_160 = arith.constant 1.280000e+02 : f32
    %334 = vector.broadcast %cst_160 : f32 to vector<16x1xf32>
    %335 = arith.divf %333, %334 : vector<16x1xf32>
    %336 = vector.broadcast %335 : vector<16x1xf32> to vector<16x128xf32>
    %337 = arith.subf %331, %336 : vector<16x128xf32>
    %338 = arith.mulf %337, %337 : vector<16x128xf32>
    %cst_161 = arith.constant dense<0.000000e+00> : vector<16xf32>
    %339 = vector.multi_reduction <add>, %338, %cst_161 [1] : vector<16x128xf32> to vector<16xf32>
    %340 = vector.shape_cast %339 : vector<16xf32> to vector<16x1xf32>
    %cst_162 = arith.constant 1.280000e+02 : f32
    %341 = vector.broadcast %cst_162 : f32 to vector<16x1xf32>
    %342 = arith.divf %340, %341 : vector<16x1xf32>
    %343 = vector.broadcast %335 : vector<16x1xf32> to vector<16x128xf32>
    %344 = arith.subf %331, %343 : vector<16x128xf32>
    %cst_163 = arith.constant 9.99999974E-6 : f32
    %345 = vector.broadcast %cst_163 : f32 to vector<16x1xf32>
    %346 = arith.addf %342, %345 : vector<16x1xf32>
    %347 = math.rsqrt %346 : vector<16x1xf32>
    %348 = vector.broadcast %347 : vector<16x1xf32> to vector<16x128xf32>
    %349 = arith.mulf %344, %348 : vector<16x128xf32>
    %350 = vector.broadcast %271 : vector<1x128xf32> to vector<16x128xf32>
    %351 = arith.mulf %349, %350 : vector<16x128xf32>
    %352 = vector.broadcast %272 : vector<1x128xf32> to vector<16x128xf32>
    %353 = arith.addf %351, %352 : vector<16x128xf32>
    %cst_164 = arith.constant dense<0.000000e+00> : vector<16x128xf32>
    %354 = tpu.matmul %353, %273, %cst_164 {dimension_numbers = #tpu.dot_dimension_numbers<[1], [0], [0], [1], [0, 0, 1, 1], [], []>} : vector<16x128xf32>, vector<128x128xf32>, vector<16x128xf32> -> vector<16x128xf32>
    %cst_165 = arith.constant dense<0.000000e+00> : vector<16x128xf32>
    %355 = tpu.matmul %1, %354, %cst_165 {dimension_numbers = #tpu.dot_dimension_numbers<[1], [0], [0], [1], [0, 0, 1, 1], [], []>} : vector<16x16xf32>, vector<16x128xf32>, vector<16x128xf32> -> vector<16x128xf32>
    %356 = vector.broadcast %274 : vector<1x128xf32> to vector<16x128xf32>
    %357 = arith.addf %355, %356 : vector<16x128xf32>
    %358 = vector.extract_strided_slice %23 {offsets = [0, 896], sizes = [1, 128], strides = [1, 1]} : vector<1x1280xf32> to vector<1x128xf32>
    %359 = vector.broadcast %358 : vector<1x128xf32> to vector<16x128xf32>
    %360 = arith.addf %357, %359 : vector<16x128xf32>
    %361 = arith.negf %360 : vector<16x128xf32>
    %362 = math.exp %361 : vector<16x128xf32>
    %cst_166 = arith.constant 1.000000e+00 : f32
    %363 = vector.broadcast %cst_166 : f32 to vector<16x128xf32>
    %364 = arith.addf %363, %362 : vector<16x128xf32>
    %365 = arith.divf %363, %364 : vector<16x128xf32>
    %366 = arith.mulf %360, %365 : vector<16x128xf32>
    %cst_167 = arith.constant dense<0.000000e+00> : vector<16x128xf32>
    %367 = tpu.matmul %263, %275, %cst_167 {dimension_numbers = #tpu.dot_dimension_numbers<[1], [0], [0], [1], [0, 0, 1, 1], [], []>} : vector<16x128xf32>, vector<128x128xf32>, vector<16x128xf32> -> vector<16x128xf32>
    %cst_168 = arith.constant dense<0.000000e+00> : vector<16x128xf32>
    %368 = tpu.matmul %184, %276, %cst_168 {dimension_numbers = #tpu.dot_dimension_numbers<[1], [0], [0], [1], [0, 0, 1, 1], [], []>} : vector<16x128xf32>, vector<128x128xf32>, vector<16x128xf32> -> vector<16x128xf32>
    %369 = arith.addf %367, %368 : vector<16x128xf32>
    %370 = vector.broadcast %277 : vector<1x128xf32> to vector<16x128xf32>
    %371 = arith.addf %369, %370 : vector<16x128xf32>
    %372 = arith.addf %366, %371 : vector<16x128xf32>
    %c0_169 = arith.constant 0 : index
    %c0_170 = arith.constant 0 : index
    %373 = vector.load %arg49[%c0_169, %c0_170] : memref<1x128xf32, #tpu.memory_space<vmem>>, vector<1x128xf32>
    %c0_171 = arith.constant 0 : index
    %c0_172 = arith.constant 0 : index
    %374 = vector.load %arg50[%c0_171, %c0_172] : memref<1x128xf32, #tpu.memory_space<vmem>>, vector<1x128xf32>
    %c0_173 = arith.constant 0 : index
    %c0_174 = arith.constant 0 : index
    %375 = vector.load %arg51[%c0_173, %c0_174] : memref<1x128xf32, #tpu.memory_space<vmem>>, vector<1x128xf32>
    %c0_175 = arith.constant 0 : index
    %c0_176 = arith.constant 0 : index
    %376 = vector.load %arg52[%c0_175, %c0_176] : memref<1x128xf32, #tpu.memory_space<vmem>>, vector<1x128xf32>
    %c0_177 = arith.constant 0 : index
    %c0_178 = arith.constant 0 : index
    %377 = vector.load %arg53[%c0_177, %c0_178] : memref<128x128xf32, #tpu.memory_space<vmem>>, vector<128x128xf32>
    %c0_179 = arith.constant 0 : index
    %c0_180 = arith.constant 0 : index
    %378 = vector.load %arg54[%c0_179, %c0_180] : memref<128x128xf32, #tpu.memory_space<vmem>>, vector<128x128xf32>
    %c0_181 = arith.constant 0 : index
    %c0_182 = arith.constant 0 : index
    %379 = vector.load %arg55[%c0_181, %c0_182] : memref<1x128xf32, #tpu.memory_space<vmem>>, vector<1x128xf32>
    %c0_183 = arith.constant 0 : index
    %c0_184 = arith.constant 0 : index
    %380 = vector.load %arg56[%c0_183, %c0_184] : memref<1x128xf32, #tpu.memory_space<vmem>>, vector<1x128xf32>
    %c0_185 = arith.constant 0 : index
    %c0_186 = arith.constant 0 : index
    %381 = vector.load %arg57[%c0_185, %c0_186] : memref<1x128xf32, #tpu.memory_space<vmem>>, vector<1x128xf32>
    %c0_187 = arith.constant 0 : index
    %c0_188 = arith.constant 0 : index
    %382 = vector.load %arg58[%c0_187, %c0_188] : memref<128x128xf32, #tpu.memory_space<vmem>>, vector<128x128xf32>
    %c0_189 = arith.constant 0 : index
    %c0_190 = arith.constant 0 : index
    %383 = vector.load %arg59[%c0_189, %c0_190] : memref<1x128xf32, #tpu.memory_space<vmem>>, vector<1x128xf32>
    %c0_191 = arith.constant 0 : index
    %c0_192 = arith.constant 0 : index
    %384 = vector.load %arg60[%c0_191, %c0_192] : memref<128x128xf32, #tpu.memory_space<vmem>>, vector<128x128xf32>
    %c0_193 = arith.constant 0 : index
    %c0_194 = arith.constant 0 : index
    %385 = vector.load %arg61[%c0_193, %c0_194] : memref<128x128xf32, #tpu.memory_space<vmem>>, vector<128x128xf32>
    %c0_195 = arith.constant 0 : index
    %c0_196 = arith.constant 0 : index
    %386 = vector.load %arg62[%c0_195, %c0_196] : memref<1x128xf32, #tpu.memory_space<vmem>>, vector<1x128xf32>
    %cst_197 = arith.constant dense<0.000000e+00> : vector<16xf32>
    %387 = vector.multi_reduction <add>, %372, %cst_197 [1] : vector<16x128xf32> to vector<16xf32>
    %388 = vector.shape_cast %387 : vector<16xf32> to vector<16x1xf32>
    %cst_198 = arith.constant dense<0.000000e+00> : vector<16xf32>
    %389 = vector.multi_reduction <add>, %105, %cst_198 [1] : vector<16x128xf32> to vector<16xf32>
    %390 = vector.shape_cast %389 : vector<16xf32> to vector<16x1xf32>
    %391 = arith.addf %388, %390 : vector<16x1xf32>
    %cst_199 = arith.constant 2.560000e+02 : f32
    %392 = vector.broadcast %cst_199 : f32 to vector<16x1xf32>
    %393 = arith.divf %391, %392 : vector<16x1xf32>
    %394 = vector.broadcast %393 : vector<16x1xf32> to vector<16x128xf32>
    %395 = arith.subf %372, %394 : vector<16x128xf32>
    %396 = arith.mulf %395, %395 : vector<16x128xf32>
    %cst_200 = arith.constant dense<0.000000e+00> : vector<16xf32>
    %397 = vector.multi_reduction <add>, %396, %cst_200 [1] : vector<16x128xf32> to vector<16xf32>
    %398 = vector.shape_cast %397 : vector<16xf32> to vector<16x1xf32>
    %399 = vector.broadcast %393 : vector<16x1xf32> to vector<16x128xf32>
    %400 = arith.subf %105, %399 : vector<16x128xf32>
    %401 = arith.mulf %400, %400 : vector<16x128xf32>
    %cst_201 = arith.constant dense<0.000000e+00> : vector<16xf32>
    %402 = vector.multi_reduction <add>, %401, %cst_201 [1] : vector<16x128xf32> to vector<16xf32>
    %403 = vector.shape_cast %402 : vector<16xf32> to vector<16x1xf32>
    %404 = arith.addf %398, %403 : vector<16x1xf32>
    %cst_202 = arith.constant 2.560000e+02 : f32
    %405 = vector.broadcast %cst_202 : f32 to vector<16x1xf32>
    %406 = arith.divf %404, %405 : vector<16x1xf32>
    %cst_203 = arith.constant 9.99999974E-6 : f32
    %407 = vector.broadcast %cst_203 : f32 to vector<16x1xf32>
    %408 = arith.addf %406, %407 : vector<16x1xf32>
    %409 = math.rsqrt %408 : vector<16x1xf32>
    %410 = vector.broadcast %393 : vector<16x1xf32> to vector<16x128xf32>
    %411 = arith.subf %372, %410 : vector<16x128xf32>
    %412 = vector.broadcast %409 : vector<16x1xf32> to vector<16x128xf32>
    %413 = arith.mulf %411, %412 : vector<16x128xf32>
    %414 = vector.broadcast %373 : vector<1x128xf32> to vector<16x128xf32>
    %415 = arith.mulf %413, %414 : vector<16x128xf32>
    %416 = vector.broadcast %375 : vector<1x128xf32> to vector<16x128xf32>
    %417 = arith.addf %415, %416 : vector<16x128xf32>
    %418 = vector.broadcast %393 : vector<16x1xf32> to vector<16x128xf32>
    %419 = arith.subf %105, %418 : vector<16x128xf32>
    %420 = vector.broadcast %409 : vector<16x1xf32> to vector<16x128xf32>
    %421 = arith.mulf %419, %420 : vector<16x128xf32>
    %422 = vector.broadcast %374 : vector<1x128xf32> to vector<16x128xf32>
    %423 = arith.mulf %421, %422 : vector<16x128xf32>
    %424 = vector.broadcast %376 : vector<1x128xf32> to vector<16x128xf32>
    %425 = arith.addf %423, %424 : vector<16x128xf32>
    %cst_204 = arith.constant dense<0.000000e+00> : vector<16x128xf32>
    %426 = tpu.matmul %417, %377, %cst_204 {dimension_numbers = #tpu.dot_dimension_numbers<[1], [0], [0], [1], [0, 0, 1, 1], [], []>} : vector<16x128xf32>, vector<128x128xf32>, vector<16x128xf32> -> vector<16x128xf32>
    %cst_205 = arith.constant dense<0.000000e+00> : vector<16x128xf32>
    %427 = tpu.matmul %425, %378, %cst_205 {dimension_numbers = #tpu.dot_dimension_numbers<[1], [0], [0], [1], [0, 0, 1, 1], [], []>} : vector<16x128xf32>, vector<128x128xf32>, vector<16x128xf32> -> vector<16x128xf32>
    %428 = arith.addf %426, %427 : vector<16x128xf32>
    %cst_206 = arith.constant dense<0.000000e+00> : vector<16x128xf32>
    %429 = tpu.matmul %1, %428, %cst_206 {dimension_numbers = #tpu.dot_dimension_numbers<[1], [0], [0], [1], [0, 0, 1, 1], [], []>} : vector<16x16xf32>, vector<16x128xf32>, vector<16x128xf32> -> vector<16x128xf32>
    %430 = vector.broadcast %379 : vector<1x128xf32> to vector<16x128xf32>
    %431 = arith.addf %429, %430 : vector<16x128xf32>
    %432 = vector.extract_strided_slice %23 {offsets = [0, 1024], sizes = [1, 128], strides = [1, 1]} : vector<1x1280xf32> to vector<1x128xf32>
    %433 = vector.broadcast %432 : vector<1x128xf32> to vector<16x128xf32>
    %434 = arith.addf %431, %433 : vector<16x128xf32>
    %435 = arith.negf %434 : vector<16x128xf32>
    %436 = math.exp %435 : vector<16x128xf32>
    %cst_207 = arith.constant 1.000000e+00 : f32
    %437 = vector.broadcast %cst_207 : f32 to vector<16x128xf32>
    %438 = arith.addf %437, %436 : vector<16x128xf32>
    %439 = arith.divf %437, %438 : vector<16x128xf32>
    %440 = arith.mulf %434, %439 : vector<16x128xf32>
    %cst_208 = arith.constant dense<0.000000e+00> : vector<16xf32>
    %441 = vector.multi_reduction <add>, %440, %cst_208 [1] : vector<16x128xf32> to vector<16xf32>
    %442 = vector.shape_cast %441 : vector<16xf32> to vector<16x1xf32>
    %cst_209 = arith.constant 1.280000e+02 : f32
    %443 = vector.broadcast %cst_209 : f32 to vector<16x1xf32>
    %444 = arith.divf %442, %443 : vector<16x1xf32>
    %445 = vector.broadcast %444 : vector<16x1xf32> to vector<16x128xf32>
    %446 = arith.subf %440, %445 : vector<16x128xf32>
    %447 = arith.mulf %446, %446 : vector<16x128xf32>
    %cst_210 = arith.constant dense<0.000000e+00> : vector<16xf32>
    %448 = vector.multi_reduction <add>, %447, %cst_210 [1] : vector<16x128xf32> to vector<16xf32>
    %449 = vector.shape_cast %448 : vector<16xf32> to vector<16x1xf32>
    %cst_211 = arith.constant 1.280000e+02 : f32
    %450 = vector.broadcast %cst_211 : f32 to vector<16x1xf32>
    %451 = arith.divf %449, %450 : vector<16x1xf32>
    %452 = vector.broadcast %444 : vector<16x1xf32> to vector<16x128xf32>
    %453 = arith.subf %440, %452 : vector<16x128xf32>
    %cst_212 = arith.constant 9.99999974E-6 : f32
    %454 = vector.broadcast %cst_212 : f32 to vector<16x1xf32>
    %455 = arith.addf %451, %454 : vector<16x1xf32>
    %456 = math.rsqrt %455 : vector<16x1xf32>
    %457 = vector.broadcast %456 : vector<16x1xf32> to vector<16x128xf32>
    %458 = arith.mulf %453, %457 : vector<16x128xf32>
    %459 = vector.broadcast %380 : vector<1x128xf32> to vector<16x128xf32>
    %460 = arith.mulf %458, %459 : vector<16x128xf32>
    %461 = vector.broadcast %381 : vector<1x128xf32> to vector<16x128xf32>
    %462 = arith.addf %460, %461 : vector<16x128xf32>
    %cst_213 = arith.constant dense<0.000000e+00> : vector<16x128xf32>
    %463 = tpu.matmul %462, %382, %cst_213 {dimension_numbers = #tpu.dot_dimension_numbers<[1], [0], [0], [1], [0, 0, 1, 1], [], []>} : vector<16x128xf32>, vector<128x128xf32>, vector<16x128xf32> -> vector<16x128xf32>
    %cst_214 = arith.constant dense<0.000000e+00> : vector<16x128xf32>
    %464 = tpu.matmul %1, %463, %cst_214 {dimension_numbers = #tpu.dot_dimension_numbers<[1], [0], [0], [1], [0, 0, 1, 1], [], []>} : vector<16x16xf32>, vector<16x128xf32>, vector<16x128xf32> -> vector<16x128xf32>
    %465 = vector.broadcast %383 : vector<1x128xf32> to vector<16x128xf32>
    %466 = arith.addf %464, %465 : vector<16x128xf32>
    %467 = vector.extract_strided_slice %23 {offsets = [0, 1152], sizes = [1, 128], strides = [1, 1]} : vector<1x1280xf32> to vector<1x128xf32>
    %468 = vector.broadcast %467 : vector<1x128xf32> to vector<16x128xf32>
    %469 = arith.addf %466, %468 : vector<16x128xf32>
    %470 = arith.negf %469 : vector<16x128xf32>
    %471 = math.exp %470 : vector<16x128xf32>
    %cst_215 = arith.constant 1.000000e+00 : f32
    %472 = vector.broadcast %cst_215 : f32 to vector<16x128xf32>
    %473 = arith.addf %472, %471 : vector<16x128xf32>
    %474 = arith.divf %472, %473 : vector<16x128xf32>
    %475 = arith.mulf %469, %474 : vector<16x128xf32>
    %cst_216 = arith.constant dense<0.000000e+00> : vector<16x128xf32>
    %476 = tpu.matmul %372, %384, %cst_216 {dimension_numbers = #tpu.dot_dimension_numbers<[1], [0], [0], [1], [0, 0, 1, 1], [], []>} : vector<16x128xf32>, vector<128x128xf32>, vector<16x128xf32> -> vector<16x128xf32>
    %cst_217 = arith.constant dense<0.000000e+00> : vector<16x128xf32>
    %477 = tpu.matmul %105, %385, %cst_217 {dimension_numbers = #tpu.dot_dimension_numbers<[1], [0], [0], [1], [0, 0, 1, 1], [], []>} : vector<16x128xf32>, vector<128x128xf32>, vector<16x128xf32> -> vector<16x128xf32>
    %478 = arith.addf %476, %477 : vector<16x128xf32>
    %479 = vector.broadcast %386 : vector<1x128xf32> to vector<16x128xf32>
    %480 = arith.addf %478, %479 : vector<16x128xf32>
    %481 = arith.addf %475, %480 : vector<16x128xf32>
    %c0_218 = arith.constant 0 : index
    %c0_219 = arith.constant 0 : index
    %482 = vector.load %arg63[%c0_218, %c0_219] : memref<128x8xf32, #tpu.memory_space<vmem>>, vector<128x8xf32>
    %c0_220 = arith.constant 0 : index
    %c0_221 = arith.constant 0 : index
    %483 = vector.load %arg64[%c0_220, %c0_221] : memref<1x8xf32, #tpu.memory_space<vmem>>, vector<1x8xf32>
    %cst_222 = arith.constant dense<0.000000e+00> : vector<16x8xf32>
    %484 = tpu.matmul %481, %482, %cst_222 {dimension_numbers = #tpu.dot_dimension_numbers<[1], [0], [0], [1], [0, 0, 1, 1], [], []>} : vector<16x128xf32>, vector<128x8xf32>, vector<16x8xf32> -> vector<16x8xf32>
    %485 = vector.broadcast %483 : vector<1x8xf32> to vector<16x8xf32>
    %486 = arith.addf %484, %485 : vector<16x8xf32>
    %c0_223 = arith.constant 0 : index
    %c0_224 = arith.constant 0 : index
    %487 = vector.load %arg65[%c0_223, %c0_224] : memref<16x8xf32, #tpu.memory_space<vmem>>, vector<16x8xf32>
    tpu.vector_store %arg65[%c0_223, %c0_224], %486 {strides = array<i32>} : memref<16x8xf32, #tpu.memory_space<vmem>>, vector<16x8xf32>,
    return
  }
}

</mosaic_0001>

<bundles_post_ra>
// kernel: graph_unet_forward.1
= control target key start
LH: loop header
LB: loop body
LE: loop exit
PB: predicated region body
PF: predicated region fallthrough
CT: control target
= control target key end

     0   :  { %s6036_s6 = smov 1   ;;  %s6037_s10 = smov 2   ;;  %s7228_s0 = inlined_call_operand.smem [shape: u32[66], index: -1, kind: input, shape index: {}] }
   0x1   :  { %s6126_s5 = sld [smem:[%s7228_s0]]   ;;  %s6038_s14 = smov 3  }
   0x2   :  { %s6131_s9 = sld [smem:[%s7228_s0 + %s6036_s6]]   ;;  %s6039_s18 = smov 4  }
   0x3   :  { %s6136_s13 = sld [smem:[%s7228_s0 + %s6037_s10]]   ;;  %s6040_s22 = smov 5  }
   0x4   :  { %s6141_s17 = sld [smem:[%s7228_s0 + %s6038_s14]]   ;;  %s6041_s26 = smov 6  }
   0x5   :  { %s6146_s21 = sld [smem:[%s7228_s0 + %s6039_s18]]   ;;  %s6042_s30 = smov 7  }
   0x6   :  { %s6151_s25 = sld [smem:[%s7228_s0 + %s6040_s22]]   ;;  %s6043_s4 = smov 8  }
   0x7   :  { %7249 = sst [smem:[#allocation34_spill]] %s6126_s5  ;;  %s6044_s10 = smov 9  }
   0x8   :  { %7250 = sst [smem:[#allocation35_spill]] %s6131_s9  ;;  %s6045_s15 = smov 10  }
   0x9   :  { %7251 = sst [smem:[#allocation36_spill]] %s6136_s13  ;;  %s6046_s20 = smov 11  }
   0xa   :  { %7252 = sst [smem:[#allocation37_spill]] %s6141_s17  ;;  %s6048_s1 = smov 13  }
   0xb   :  { %7253 = sst [smem:[#allocation38_spill]] %s6146_s21  ;;  %s6049_s7 = smov 14  }
   0xc   :  { %s6156_s29 = sld [smem:[%s7228_s0 + %s6041_s26]]   ;;  %s6047_s26 = smov 12  }
   0xd   :  { %s6161_s3 = sld [smem:[%s7228_s0 + %s6042_s30]]   ;;  %s6051_s22 = smov 16  }
   0xe   :  { %s6166_s8 = sld [smem:[%s7228_s0 + %s6043_s4]]   ;;  %s6052_s28 = smov 17  }
   0xf   :  { %s6171_s14 = sld [smem:[%s7228_s0 + %s6044_s10]]  }
  0x10   :  { %s6176_s19 = sld [smem:[%s7228_s0 + %s6045_s15]]   ;;  %s6050_s15 = smov 15  }
  0x11   :  { %s6181_s24 = sld [smem:[%s7228_s0 + %s6046_s20]]  }
  0x12   :  { %7254 = sst [smem:[#allocation39_spill]] %s6156_s29 }
  0x13   :  { %7255 = sst [smem:[#allocation40_spill]] %s6161_s3 }
  0x14   :  { %7256 = sst [smem:[#allocation41_spill]] %s6166_s8 }
  0x15   :  { %7257 = sst [smem:[#allocation42_spill]] %s6171_s14 }
  0x16   :  { %7258 = sst [smem:[#allocation43_spill]] %s6176_s19 }
  0x17   :  { %7259 = sst [smem:[#allocation44_spill]] %s6181_s24 }
  0x18   :  { %s6186_s30 = sld [smem:[%s7228_s0 + %s6047_s26]]  }
  0x19   :  { %s6191_s6 = sld [smem:[%s7228_s0 + %s6048_s1]]  }
  0x1a   :  { %s6196_s12 = sld [smem:[%s7228_s0 + %s6049_s7]]   ;;  %s6053_s7 = smov 18  }
  0x1b   :  { %s6201_s20 = sld [smem:[%s7228_s0 + %s6050_s15]]   ;;  %s6054_s15 = smov 19  }
  0x1c   :  { %s6206_s27 = sld [smem:[%s7228_s0 + %s6051_s22]]   ;;  %s6055_s22 = smov 20  }
  0x1d   :  { %s6211_s4 = sld [smem:[%s7228_s0 + %s6052_s28]]   ;;  %s6056_s28 = smov 21  }
  0x1e   :  { %7260 = sst [smem:[#allocation45_spill]] %s6186_s30 }
  0x1f   :  { %7261 = sst [smem:[#allocation46_spill]] %s6191_s6 }
  0x20   :  { %7262 = sst [smem:[#allocation47_spill]] %s6196_s12 }
  0x21   :  { %7263 = sst [smem:[#allocation48_spill]] %s6201_s20 }
  0x22   :  { %7264 = sst [smem:[#allocation49_spill]] %s6206_s27 }
  0x23   :  { %7265 = sst [smem:[#allocation50_spill]] %s6211_s4 }
  0x24   :  { %s6216_s12 = sld [smem:[%s7228_s0 + %s6053_s7]]   ;;  %s6057_s7 = smov 22  }
  0x25   :  { %s6221_s20 = sld [smem:[%s7228_s0 + %s6054_s15]]   ;;  %s6058_s15 = smov 23  }
  0x26   :  { %s6226_s27 = sld [smem:[%s7228_s0 + %s6055_s22]]   ;;  %s6059_s22 = smov 24  }
  0x27   :  { %s6231_s4 = sld [smem:[%s7228_s0 + %s6056_s28]]   ;;  %s6060_s28 = smov 25  }
  0x2a   :  { %7266 = sst [smem:[#allocation51_spill]] %s6216_s12 }
  0x2b   :  { %7267 = sst [smem:[#allocation52_spill]] %s6221_s20 }
  0x2c   :  { %7268 = sst [smem:[#allocation53_spill]] %s6226_s27 }
  0x2d   :  { %7269 = sst [smem:[#allocation54_spill]] %s6231_s4 }
  0x2e   :  { %s6236_s12 = sld [smem:[%s7228_s0 + %s6057_s7]]   ;;  %s6061_s7 = smov 26  }
  0x2f   :  { %s6241_s20 = sld [smem:[%s7228_s0 + %s6058_s15]]   ;;  %s6062_s15 = smov 27  }
  0x30   :  { %s6246_s27 = sld [smem:[%s7228_s0 + %s6059_s22]]   ;;  %s6063_s22 = smov 28  }
  0x31   :  { %s6251_s4 = sld [smem:[%s7228_s0 + %s6060_s28]]   ;;  %s6064_s28 = smov 29  }
  0x34   :  { %7270 = sst [smem:[#allocation55_spill]] %s6236_s12 }
  0x35   :  { %7271 = sst [smem:[#allocation56_spill]] %s6241_s20 }
  0x36   :  { %7272 = sst [smem:[#allocation57_spill]] %s6246_s27 }
  0x37   :  { %7273 = sst [smem:[#allocation58_spill]] %s6251_s4 }
  0x38   :  { %s6256_s12 = sld [smem:[%s7228_s0 + %s6061_s7]]   ;;  %s6065_s7 = smov 30  }
  0x39   :  { %s6261_s20 = sld [smem:[%s7228_s0 + %s6062_s15]]   ;;  %s6066_s15 = smov 31  }
  0x3a   :  { %s6266_s27 = sld [smem:[%s7228_s0 + %s6063_s22]]   ;;  %s6067_s22 = smov 32  }
  0x3b   :  { %s6271_s4 = sld [smem:[%s7228_s0 + %s6064_s28]]   ;;  %s6068_s28 = smov 33  }
  0x3e   :  { %7274 = sst [smem:[#allocation59_spill]] %s6256_s12 }
  0x3f   :  { %7275 = sst [smem:[#allocation60_spill]] %s6261_s20 }
  0x40   :  { %7276 = sst [smem:[#allocation61_spill]] %s6266_s27 }
  0x41   :  { %7277 = sst [smem:[#allocation62_spill]] %s6271_s4 }
  0x42   :  { %s6276_s12 = sld [smem:[%s7228_s0 + %s6065_s7]]   ;;  %s6069_s7 = smov 34  }
  0x43   :  { %s6281_s20 = sld [smem:[%s7228_s0 + %s6066_s15]]   ;;  %s6070_s15 = smov 35  }
  0x44   :  { %s6286_s27 = sld [smem:[%s7228_s0 + %s6067_s22]]   ;;  %s6071_s22 = smov 36  }
  0x45   :  { %s6291_s4 = sld [smem:[%s7228_s0 + %s6068_s28]]   ;;  %s6072_s28 = smov 37  }
  0x46   :  { %s6296_s13 = sld [smem:[%s7228_s0 + %s6069_s7]]   ;;  %s6073_s7 = smov 38  }
  0x47   :  { %s6301_s30 = sld [smem:[%s7228_s0 + %s6070_s15]]   ;;  %s6074_s15 = smov 39  }
  0x48   :  { %s6306_s24 = sld [smem:[%s7228_s0 + %s6071_s22]]   ;;  %s6075_s22 = smov 40  }
  0x49   :  { %s6316_s6 = sld [smem:[%s7228_s0 + %s6073_s7]]   ;;  %s6077_s7 = smov 42  }
  0x4b   :  { %7278 = sst [smem:[#allocation63_spill]] %s6291_s4 }
  0x4c   :  { %s6311_s4 = sld [smem:[%s7228_s0 + %s6072_s28]]   ;;  %s6076_s28 = smov 41  }
  0x4d   :  { %7279 = sst [smem:[#allocation64_spill]] %s6301_s30 }
  0x4e   :  { %7280 = sst [smem:[#allocation65_spill]] %s6306_s24 }
  0x4f   :  { %7282 = sst [smem:[#allocation67_spill]] %s6316_s6 }
  0x50   :  { %s6321_s30 = sld [smem:[%s7228_s0 + %s6074_s15]]   ;;  %s6078_s15 = smov 43  }
  0x51   :  { %s6326_s24 = sld [smem:[%s7228_s0 + %s6075_s22]]   ;;  %s6079_s22 = smov 44  }
  0x52   :  { %7281 = sst [smem:[#allocation66_spill]] %s6311_s4 }
  0x53   :  { %s6331_s4 = sld [smem:[%s7228_s0 + %s6076_s28]]   ;;  %s6080_s28 = smov 45  }
  0x54   :  { %s6336_s6 = sld [smem:[%s7228_s0 + %s6077_s7]]   ;;  %s6081_s7 = smov 46  }
  0x55   :  { %s6351_s19 = sld [smem:[%s7228_s0 + %s6080_s28]]   ;;  %s6084_s28 = smov 49  }
  0x56   :  { %7283 = sst [smem:[#allocation68_spill]] %s6321_s30 }
  0x57   :  { %7284 = sst [smem:[#allocation69_spill]] %s6326_s24 }
  0x58   :  { %s6341_s30 = sld [smem:[%s7228_s0 + %s6078_s15]]   ;;  %s6082_s15 = smov 47  }
  0x59   :  { %s6346_s24 = sld [smem:[%s7228_s0 + %s6079_s22]]   ;;  %s6083_s22 = smov 48  }
  0x5a   :  { %s6356_s8 = sld [smem:[%s7228_s0 + %s6081_s7]]   ;;  %s6085_s7 = smov 50  }
  0x5b   :  { %s6361_s9 = sld [smem:[%s7228_s0 + %s6082_s15]]   ;;  %s6086_s15 = smov 51  }
  0x5c   :  { %s6371_s14 = sld [smem:[%s7228_s0 + %s6084_s28]]   ;;  %s6088_s28 = smov 53  }
  0x5f   :  { %7285 = sst [smem:[#allocation70_spill]] %s6346_s24 }
  0x60   :  { %7286 = sst [smem:[#allocation71_spill]] %s6356_s8 }
  0x61   :  { %7287 = sst [smem:[#allocation72_spill]] %s6361_s9 }
  0x62   :  { %s6366_s24 = sld [smem:[%s7228_s0 + %s6083_s22]]   ;;  %s6087_s22 = smov 52  }
  0x63   :  { %7288 = sst [smem:[#allocation73_spill]] %s6371_s14 }
  0x64   :  { %s6376_s8 = sld [smem:[%s7228_s0 + %s6085_s7]]   ;;  %s6089_s7 = smov 54  }
  0x65   :  { %s6381_s9 = sld [smem:[%s7228_s0 + %s6086_s15]]   ;;  %s6090_s15 = smov 55  }
  0x66   :  { %s6386_s29 = sld [smem:[%s7228_s0 + %s6087_s22]]   ;;  %s6091_s22 = smov 56  }
  0x67   :  { %s6391_s14 = sld [smem:[%s7228_s0 + %s6088_s28]]   ;;  %s6092_s28 = smov 57  }
  0x6a   :  { %7289 = sst [smem:[#allocation74_spill]] %s6376_s8 }
  0x6b   :  { %7290 = sst [smem:[#allocation75_spill]] %s6381_s9 }
  0x6c   :  { %7291 = sst [smem:[#allocation76_spill]] %s6386_s29 }
  0x6d   :  { %7292 = sst [smem:[#allocation77_spill]] %s6391_s14 }
  0x6e   :  { %s6396_s8 = sld [smem:[%s7228_s0 + %s6089_s7]]   ;;  %s6093_s7 = smov 58  }
  0x6f   :  { %s6401_s9 = sld [smem:[%s7228_s0 + %s6090_s15]]   ;;  %s6094_s15 = smov 59  }
  0x70   :  { %s6406_s29 = sld [smem:[%s7228_s0 + %s6091_s22]]   ;;  %s6095_s22 = smov 60  }
  0x71   :  { %s6411_s14 = sld [smem:[%s7228_s0 + %s6092_s28]]   ;;  %s6096_s28 = smov 61  }
  0x72   :  { %s6421_s3 = sld [smem:[%s7228_s0 + %s6094_s15]]   ;;  %s6098_s15 = smov 63  }
  0x73   :  { %s6426_s21 = sld [smem:[%s7228_s0 + %s6095_s22]]   ;;  %s6099_s22 = smov 64  }
  0x74   :  { %7293 = sst [smem:[#allocation78_spill]] %s6396_s8 }
  0x75   :  { %s6416_s8 = sld [smem:[%s7228_s0 + %s6093_s7]]   ;;  %s6097_s7 = smov 62  }
  0x76   :  { %s6431_s17 = sld [smem:[%s7228_s0 + %s6096_s28]]   ;;  %s6100_s28 = smov 65  }
  0x77   :  { %s6441_s5 = sld [smem:[%s7228_s0 + %s6098_s15]]  }
  0x79   :  { %7295 = sst [smem:[#allocation80_spill]] %s6426_s21 }
  0x7a   :  { %s6446_s21 = sld [smem:[%s7228_s0 + %s6099_s22]]  }
  0x7b   :  { %7294 = sst [smem:[#allocation79_spill]] %s6416_s8 }
  0x7c   :  { %7296 = sst [smem:[#allocation81_spill]] %s6431_s17 }
  0x7d   :  { %s6436_s8 = sld [smem:[%s7228_s0 + %s6097_s7]]  }
  0x7e   :  { %s6451_s17 = sld [smem:[%s7228_s0 + %s6100_s28]]  }
  0x7f   :  { %137 = vsyncpa [#allocation4], 0 }
  0x80   :  { %138 = vsyncpa [#allocation6], 0 }
  0x81   :  { %139 = vsyncpa [#allocation9], 0 }
  0x82   :  { %140 = vsyncpa [#allocation12], 0 }
  0x83   :  { %141 = vsyncpa [#allocation15], 0 }
  0x84   :  { %142 = vsyncpa [#allocation18], 0 }
  0x85   :  { %143 = vsyncpa [#allocation21], 0 }
  0x86   :  { %144 = vsyncpa [#allocation24], 0  ;;  %s6101_s7 = smov [#allocation5]   ;;  %s6102_s11 = smov [#allocation8]  }
  0x87   :  { %s221_s10 = sshll.u32 %s6101_s7, 4  ;;  %s243_s15 = sshll.u32 %s6102_s11, 4  ;;  %s222_s10 = int_to_ptr.vmem [resolvable:$true] %s221_s10  ;;  %s244_s15 = int_to_ptr.vmem [resolvable:$true] %s243_s15 }
  0x88   :  { %s5728_s16 = scalar_lea.vmem %s222_s10, 16  ;;  %s5732_s18 = scalar_lea.vmem %s222_s10, 32 }
  0x89   :  { %p5729_p0 = scmp.ne.s32.totalorder %s222_s10, %s5728_s16  ;;  %p5733_p1 = scmp.lt.s32.totalorder %s222_s10, %s222_s10 }
  0x8a   :  { %p5734_p2 = scmp.lt.s32.totalorder %s5732_s18, %s5728_s16 }
  0x8c   :  { %p5735_p3 = por %p5734_p2, %p5733_p1 }
  0x8e   :  { %p5736_p4 = pnand %p5735_p3, %p5729_p0 }
  0x90   :  { %5739 = shalt.err (!%p5736_p4)
}
  0x91   :  { %224 = dma.hbm_to_vmem [thread:$0]  %s6281_s20, 16, %s222_s10, [#allocation6]  }
  0x92   :  { %s5748_s0 = scalar_lea.vmem %s244_s15, 16  ;;  %s5752_s22 = scalar_lea.vmem %s244_s15, 32 }
  0x93   :  { %p5749_p5 = scmp.ne.s32.totalorder %s244_s15, %s5748_s0  ;;  %p5753_p6 = scmp.lt.s32.totalorder %s244_s15, %s244_s15 }
  0x94   :  { %p5754_p7 = scmp.lt.s32.totalorder %s5752_s22, %s5748_s0 }
  0x96   :  { %p5755_p8 = por %p5754_p7, %p5753_p6 }
  0x98   :  { %p5756_p9 = pnand %p5755_p8, %p5749_p5 }
  0x9a   :  { %5759 = shalt.err (!%p5756_p9)
}
  0x9b   :  { %246 = dma.hbm_to_vmem [thread:$0]  %s6296_s13, 16, %s244_s15, [#allocation9]  }
  0x9c   :  { %s6103_s23 = smov [#allocation11]   ;;  %s6104_s28 = smov [#allocation14]  }
  0x9d   :  { %s275_s26 = sshll.u32 %s6103_s23, 4  ;;  %s297_s1 = sshll.u32 %s6104_s28, 4  ;;  %s276_s26 = int_to_ptr.vmem [resolvable:$true] %s275_s26  ;;  %s298_s1 = int_to_ptr.vmem [resolvable:$true] %s297_s1 }
  0x9e   :  { %s5768_s2 = scalar_lea.vmem %s276_s26, 16  ;;  %s5772_s7 = scalar_lea.vmem %s276_s26, 32 }
  0x9f   :  { %p5769_p10 = scmp.ne.s32.totalorder %s276_s26, %s5768_s2  ;;  %p5773_p11 = scmp.lt.s32.totalorder %s276_s26, %s276_s26 }
  0xa0   :  { %p5774_p12 = scmp.lt.s32.totalorder %s5772_s7, %s5768_s2 }
  0xa2   :  { %p5775_p13 = por %p5774_p12, %p5773_p11 }
  0xa4   :  { %p5776_p0 = pnand %p5775_p13, %p5769_p10 }
  0xa6   :  { %5779 = shalt.err (!%p5776_p0)
}
  0xa7   :  { %278 = dma.hbm_to_vmem [thread:$0]  %s6336_s6, 16, %s276_s26, [#allocation12]  }
  0xa8   :  { %s5788_s20 = scalar_lea.vmem %s298_s1, 16  ;;  %s5792_s10 = scalar_lea.vmem %s298_s1, 32 }
  0xa9   :  { %p5789_p1 = scmp.ne.s32.totalorder %s298_s1, %s5788_s20  ;;  %p5793_p2 = scmp.lt.s32.totalorder %s298_s1, %s298_s1 }
  0xaa   :  { %p5794_p3 = scmp.lt.s32.totalorder %s5792_s10, %s5788_s20 }
  0xac   :  { %p5795_p4 = por %p5794_p3, %p5793_p2 }
  0xae   :  { %p5796_p5 = pnand %p5795_p4, %p5789_p1 }
  0xb0   :  { %5799 = shalt.err (!%p5796_p5)
}
  0xb1   :  { %300 = dma.hbm_to_vmem [thread:$0]  %s6351_s19, 16, %s298_s1, [#allocation15]  }
  0xb2   :  { %s6105_s13 = smov [#allocation17]   ;;  %s6106_s15 = smov [#allocation20]  }
  0xb3   :  { %s333_s11 = sshll.u32 %s6105_s13, 4  ;;  %s353_s16 = sshll.u32 %s6106_s15, 4  ;;  %s334_s11 = int_to_ptr.vmem [resolvable:$true] %s333_s11  ;;  %s354_s16 = int_to_ptr.vmem [resolvable:$true] %s353_s16 }
  0xb4   :  { %s5808_s18 = scalar_lea.vmem %s334_s11, 16  ;;  %s5812_s0 = scalar_lea.vmem %s334_s11, 32 }
  0xb5   :  { %p5809_p6 = scmp.ne.s32.totalorder %s334_s11, %s5808_s18  ;;  %p5813_p7 = scmp.lt.s32.totalorder %s334_s11, %s334_s11 }
  0xb6   :  { %p5814_p8 = scmp.lt.s32.totalorder %s5812_s0, %s5808_s18 }
  0xb8   :  { %p5815_p9 = por %p5814_p8, %p5813_p7 }
  0xba   :  { %p5816_p10 = pnand %p5815_p9, %p5809_p6 }
  0xbc   :  { %5819 = shalt.err (!%p5816_p10)
}
  0xbd   :  { %336 = dma.hbm_to_vmem [thread:$0]  %s6401_s9, 16, %s334_s11, [#allocation18]  }
  0xbe   :  { %s5828_s6 = scalar_lea.vmem %s354_s16, 16  ;;  %s5832_s22 = scalar_lea.vmem %s354_s16, 32 }
  0xbf   :  { %p5829_p11 = scmp.ne.s32.totalorder %s354_s16, %s5828_s6  ;;  %p5833_p12 = scmp.lt.s32.totalorder %s354_s16, %s354_s16 }
  0xc0   :  { %p5834_p13 = scmp.lt.s32.totalorder %s5832_s22, %s5828_s6 }
  0xc2   :  { %p5835_p0 = por %p5834_p13, %p5833_p12 }
  0xc4   :  { %p5836_p1 = pnand %p5835_p0, %p5829_p11 }
  0xc6   :  { %5839 = shalt.err (!%p5836_p1)
}
  0xc7   :  { %356 = dma.hbm_to_vmem [thread:$0]  %s6411_s14, 16, %s354_s16, [#allocation21]  }
  0xc8   :  { %s6107_s19 = smov [#allocation23]   ;;  %s6108_s26 = smov [#allocation3]  }
  0xc9   :  { %s379_s23 = sshll.u32 %s6107_s19, 4  ;;  %s211_s28 = sshll.u32 %s6108_s26, 4  ;;  %s380_s23 = int_to_ptr.vmem [resolvable:$true] %s379_s23  ;;  %s212_s28 = int_to_ptr.vmem [resolvable:$true] %s211_s28 }
  0xca   :  { %s5848_s1 = scalar_lea.vmem %s380_s23, 16  ;;  %s5852_s2 = scalar_lea.vmem %s380_s23, 32 }
  0xcb   :  { %p5849_p2 = scmp.ne.s32.totalorder %s380_s23, %s5848_s1  ;;  %p5853_p3 = scmp.lt.s32.totalorder %s380_s23, %s380_s23 }
  0xcc   :  { %p5854_p4 = scmp.lt.s32.totalorder %s5852_s2, %s5848_s1 }
  0xce   :  { %p5855_p5 = por %p5854_p4, %p5853_p3 }
  0xd0   :  { %p5856_p6 = pnand %p5855_p5, %p5849_p2 }
  0xd2   :  { %5859 = shalt.err (!%p5856_p6)
}
  0xd3   :  { %382 = dma.hbm_to_vmem [thread:$0]  %s6436_s8, 16, %s380_s23, [#allocation24]  }
  0xd4   :  { %s5868_s9 = scalar_lea.vmem %s212_s28, 16  ;;  %s5872_s7 = scalar_lea.vmem %s212_s28, 32 }
  0xd5   :  { %p5869_p7 = scmp.ne.s32.totalorder %s212_s28, %s5868_s9  ;;  %p5873_p8 = scmp.lt.s32.totalorder %s212_s28, %s212_s28 }
  0xd6   :  { %p5874_p9 = scmp.lt.s32.totalorder %s5872_s7, %s5868_s9 }
  0xd8   :  { %p5875_p10 = por %p5874_p9, %p5873_p8 }
  0xda   :  { %p5876_p11 = pnand %p5875_p10, %p5869_p7 }
  0xdc   :  { %5879 = shalt.err (!%p5876_p11)
}
  0xdd   :  { %214 = dma.hbm_to_vmem [thread:$0]  %s6276_s12, 16, %s212_s28, [#allocation4]  }
  0xde   :  { %s6109_s14 = smov [#allocation7]   ;;  %s6110_s10 = smov [#allocation10]  }
  0xdf   :  { %s231_s20 = sshll.u32 %s6109_s14, 4  ;;  %s265_s13 = sshll.u32 %s6110_s10, 4  ;;  %s232_s20 = int_to_ptr.vmem [resolvable:$true] %s231_s20  ;;  %s266_s13 = int_to_ptr.vmem [resolvable:$true] %s265_s13 }
  0xe0   :  { %s5888_s11 = scalar_lea.vmem %s232_s20, 16  ;;  %s5892_s15 = scalar_lea.vmem %s232_s20, 32 }
  0xe1   :  { %p5889_p12 = scmp.ne.s32.totalorder %s232_s20, %s5888_s11  ;;  %p5893_p13 = scmp.lt.s32.totalorder %s232_s20, %s232_s20 }
  0xe2   :  { %p5894_p0 = scmp.lt.s32.totalorder %s5892_s15, %s5888_s11 }
  0xe4   :  { %p5895_p1 = por %p5894_p0, %p5893_p13 }
  0xe6   :  { %p5896_p2 = pnand %p5895_p1, %p5889_p12 }
  0xe8   :  { %5899 = shalt.err (!%p5896_p2)
}
  0xe9   :  { %234 = dma.hbm_to_vmem [thread:$0]  %s6286_s27, 16, %s232_s20, [#allocation6]  }
  0xea   :  { %s5908_s8 = scalar_lea.vmem %s266_s13, 16  ;;  %s5912_s16 = scalar_lea.vmem %s266_s13, 32 }
  0xeb   :  { %p5909_p3 = scmp.ne.s32.totalorder %s266_s13, %s5908_s8  ;;  %p5913_p4 = scmp.lt.s32.totalorder %s266_s13, %s266_s13 }
  0xec   :  { %p5914_p5 = scmp.lt.s32.totalorder %s5912_s16, %s5908_s8 }
  0xee   :  { %p5915_p6 = por %p5914_p5, %p5913_p4 }
  0xf0   :  { %p5916_p7 = pnand %p5915_p6, %p5909_p3 }
  0xf2   :  { %5919 = shalt.err (!%p5916_p7)
}
  0xf3   :  { %268 = dma.hbm_to_vmem [thread:$0]  %s6331_s4, 16, %s266_s13, [#allocation9]  }
  0xf4   :  { %s6111_s12 = smov [#allocation13]   ;;  %s6112_s0 = smov [#allocation16]  }
  0xf5   :  { %s285_s18 = sshll.u32 %s6111_s12, 4  ;;  %s311_s6 = sshll.u32 %s6112_s0, 4  ;;  %s286_s18 = int_to_ptr.vmem [resolvable:$true] %s285_s18  ;;  %s312_s6 = int_to_ptr.vmem [resolvable:$true] %s311_s6 }
  0xf6   :  { %s5928_s22 = scalar_lea.vmem %s286_s18, 16  ;;  %s5932_s19 = scalar_lea.vmem %s286_s18, 32 }
  0xf7   :  { %p5929_p8 = scmp.ne.s32.totalorder %s286_s18, %s5928_s22  ;;  %p5933_p9 = scmp.lt.s32.totalorder %s286_s18, %s286_s18 }
  0xf8   :  { %p5934_p10 = scmp.lt.s32.totalorder %s5932_s19, %s5928_s22 }
  0xfa   :  { %p5935_p11 = por %p5934_p10, %p5933_p9 }
  0xfc   :  { %p5936_p12 = pnand %p5935_p11, %p5929_p8 }
  0xfe   :  { %5939 = shalt.err (!%p5936_p12)
}
  0xff   :  { %288 = dma.hbm_to_vmem [thread:$0]  %s6341_s30, 16, %s286_s18, [#allocation12]  }
 0x100   :  { %s5948_s27 = scalar_lea.vmem %s312_s6, 16  ;;  %s5952_s23 = scalar_lea.vmem %s312_s6, 32 }
 0x101   :  { %p5949_p13 = scmp.ne.s32.totalorder %s312_s6, %s5948_s27  ;;  %p5953_p0 = scmp.lt.s32.totalorder %s312_s6, %s312_s6 }
 0x102   :  { %p5954_p1 = scmp.lt.s32.totalorder %s5952_s23, %s5948_s27 }
 0x104   :  { %p5955_p2 = por %p5954_p1, %p5953_p0 }
 0x106   :  { %p5956_p3 = pnand %p5955_p2, %p5949_p13 }
 0x108   :  { %5959 = shalt.err (!%p5956_p3)
}
 0x109   :  { %314 = dma.hbm_to_vmem [thread:$0]  %s6366_s24, 16, %s312_s6, [#allocation15]  }
 0x10a   :  { %s6113_s4 = smov [#allocation19]   ;;  %s6114_s28 = smov [#allocation22]  }
 0x10b   :  { %s343_s26 = sshll.u32 %s6113_s4, 4  ;;  %s365_s1 = sshll.u32 %s6114_s28, 4  ;;  %s344_s26 = int_to_ptr.vmem [resolvable:$true] %s343_s26  ;;  %s366_s1 = int_to_ptr.vmem [resolvable:$true] %s365_s1 }
 0x10c   :  { %s5968_s2 = scalar_lea.vmem %s344_s26, 16  ;;  %s5972_s9 = scalar_lea.vmem %s344_s26, 32 }
 0x10d   :  { %p5969_p4 = scmp.ne.s32.totalorder %s344_s26, %s5968_s2  ;;  %p5973_p5 = scmp.lt.s32.totalorder %s344_s26, %s344_s26 }
 0x10e   :  { %p5974_p6 = scmp.lt.s32.totalorder %s5972_s9, %s5968_s2 }
 0x110   :  { %p5975_p7 = por %p5974_p6, %p5973_p5 }
 0x112   :  { %p5976_p8 = pnand %p5975_p7, %p5969_p4 }
 0x114   :  { %5979 = shalt.err (!%p5976_p8)
}
 0x115   :  { %346 = dma.hbm_to_vmem [thread:$0]  %s6406_s29, 16, %s344_s26, [#allocation18]  }
 0x116   :  { %s5988_s30 = scalar_lea.vmem %s366_s1, 16  ;;  %s5992_s7 = scalar_lea.vmem %s366_s1, 32 }
 0x117   :  { %p5989_p9 = scmp.ne.s32.totalorder %s366_s1, %s5988_s30  ;;  %p5993_p10 = scmp.lt.s32.totalorder %s366_s1, %s366_s1 }
 0x118   :  { %p5994_p11 = scmp.lt.s32.totalorder %s5992_s7, %s5988_s30 }
 0x11a   :  { %p5995_p12 = por %p5994_p11, %p5993_p10 }
 0x11c   :  { %p5996_p13 = pnand %p5995_p12, %p5989_p9 }
 0x11e   :  { %5999 = shalt.err (!%p5996_p13)
}
 0x11f   :  { %368 = dma.hbm_to_vmem [thread:$0]  %s6421_s3, 16, %s366_s1, [#allocation21]  }
 0x120   :  { %s6115_s24 = smov [#allocation25]  }
 0x121   :  { %s391_s14 = sshll.u32 %s6115_s24, 4  ;;  %s392_s14 = int_to_ptr.vmem [resolvable:$true] %s391_s14 }
 0x122   :  { %s6008_s20 = scalar_lea.vmem %s392_s14, 16  ;;  %s6012_s10 = scalar_lea.vmem %s392_s14, 32 }
 0x123   :  { %p6009_p0 = scmp.ne.s32.totalorder %s392_s14, %s6008_s20  ;;  %p6013_p1 = scmp.lt.s32.totalorder %s392_s14, %s392_s14 }
 0x124   :  { %p6014_p2 = scmp.lt.s32.totalorder %s6012_s10, %s6008_s20 }
 0x126   :  { %p6015_p3 = por %p6014_p2, %p6013_p1 }
 0x128   :  { %p6016_p4 = pnand %p6015_p3, %p6009_p0 }
 0x12a   :  { %6019 = shalt.err (!%p6016_p4)
}
 0x12b   :  { %394 = dma.hbm_to_vmem [thread:$0]  %s6446_s21, 16, %s392_s14, [#allocation24]  }
 0x12c   :  { %6020 = dma.done.wait [#allocation4], 16  }
 0x12d   :  { %6021 = vsyncadd [#allocation4], 4294967280 }
 0x12e   :  { %6022 = dma.done.wait [#allocation6], 32  }
 0x12f   :  { %6023 = vsyncadd [#allocation6], 4294967264 }
 0x130   :  { %6024 = dma.done.wait [#allocation9], 32  }
 0x131   :  { %6025 = vsyncadd [#allocation9], 4294967264 }
 0x132   :  { %6026 = dma.done.wait [#allocation12], 32  }
 0x133   :  { %6027 = vsyncadd [#allocation12], 4294967264 }
 0x134   :  { %6028 = dma.done.wait [#allocation15], 32  }
 0x135   :  { %6029 = vsyncadd [#allocation15], 4294967264 }
 0x136   :  { %6030 = dma.done.wait [#allocation18], 32  }
 0x137   :  { %6031 = vsyncadd [#allocation18], 4294967264 }
 0x138   :  { %6032 = dma.done.wait [#allocation21], 32  }
 0x139   :  { %6033 = vsyncadd [#allocation21], 4294967264 }
 0x13a   :  { %6034 = dma.done.wait [#allocation24], 32  }
 0x13b   :  { %6035 = vsyncadd [#allocation24], 4294967264  ;;  %s7297_s21 = sld [smem:[#allocation34_spill]]  ;;  %v6116_v0 = vmov 0.0   ;;  %vm6117_vm0 = vmmov 0   ;;  %v461_v1 = vld [vmem:[%s6151_s25 + $0x78] sm:$0xff] }
 0x13c   :  { %s7298_s29 = sld [smem:[#allocation37_spill]]  ;;  %4804 = vmatprep.subr.mxu0 %v6116_v0  ;;  %4836 = vmatprep.mubr.msk.f32.mxu0 %vm6117_vm0, %v6116_v0  ;;  %v460_v2 = vld [vmem:[%s6151_s25 + $0x70] sm:$0xff]  ;;  %v459_v3 = vld [vmem:[%s6151_s25 + $0x68] sm:$0xff]  ;;  %v458_v5 = vld [vmem:[%s6151_s25 + $0x60] sm:$0xff]  ;;  %vm1121_vm1 = vcmask 64512   ;;  %vm1361_vm2 = vcmask 130048  }
 0x13d   :  { %s7299_s3 = sld [smem:[#allocation38_spill]]  ;;  %824 = vmatprep.mubr.f32.mxu1 %v6116_v0  ;;  %4805 = vmatpush3.msra.mxu0 %v461_v1  ;;  %v457_v8 = vld [vmem:[%s6151_s25 + $0x58] sm:$0xff]  ;;  %v456_v13 = vld [vmem:[%s6151_s25 + $0x50] sm:$0xff]  ;;  %v455_v18 = vld [vmem:[%s6151_s25 + $0x48] sm:$0xff] }
 0x13e   :  { %s7300_s13 = sld [smem:[#allocation40_spill]]  ;;  %4806 = vmatprep.subr.mxu0 %v6116_v0  ;;  %v454_v22 = vld [vmem:[%s6151_s25 + $0x40] sm:$0xff]  ;;  %v453_v25 = vld [vmem:[%s6151_s25 + $0x38] sm:$0xff]  ;;  %v452_v28 = vld [vmem:[%s6151_s25 + $0x30] sm:$0xff] }
 0x13f   :  { %4807 = vmatpush3.msra.mxu0 %v460_v2  ;;  %v451_v31 = vld [vmem:[%s6151_s25 + $0x28] sm:$0xff]  ;;  %v450_v34 = vld [vmem:[%s6151_s25 + $0x20] sm:$0xff]  ;;  %v449_v37 = vld [vmem:[%s6151_s25 + $0x18] sm:$0xff]  ;;  %s7302_s11 = sld [smem:[#allocation42_spill]] }
 0x140   :  { %4808 = vmatprep.subr.mxu0 %v6116_v0  ;;  %v448_v40 = vld [vmem:[%s6151_s25 + $0x10] sm:$0xff]  ;;  %v447_v44 = vld [vmem:[%s6151_s25 + $0x8] sm:$0xff]  ;;  %v446_v48 = vld [vmem:[%s6151_s25] sm:$0xff]  ;;  %s7301_s25 = sld [smem:[#allocation39_spill]] }
 0x141   :  { %v628_v4 = vstv %s7297_s21  ;;  %4809 = vmatpush3.msra.mxu0 %v459_v3  ;;  %s7303_s15 = sld [smem:[#allocation35_spill]] }
 0x142   :  { %v444_v6 = vld [vmem:[%s7298_s29] sm:$0x1]  ;;  %4810 = vmatprep.subr.mxu0 %v6116_v0  ;;  %s7304_s8 = sld [smem:[#allocation41_spill]] }
 0x143   :  { %v445_v7 = vld [vmem:[%s7299_s3] sm:$0x1]  ;;  %v629_v9 = vmul.f32 %v628_v4, %v444_v6  ;;  %4811 = vmatpush3.msra.mxu0 %v458_v5  ;;  %s7305_s16 = sld [smem:[#allocation43_spill]] }
 0x144   :  { %v614_v10 = vld [vmem:[%s7300_s13 + $0x4b8] sm:$0xff]  ;;  %v613_v11 = vld [vmem:[%s7300_s13 + $0x4b0] sm:$0xff]  ;;  %v604_v12 = vld [vmem:[%s7300_s13 + $0x468] sm:$0xff]  ;;  %4812 = vmatprep.subr.mxu0 %v6116_v0  ;;  %s7306_s12 = sld [smem:[#allocation46_spill]] }
 0x145   :  { %760 = vmatprep.subr.mxu1 %v614_v10  ;;  %v6487_v14 = vadd.f32 %v629_v9, %v445_v7  ;;  %v603_v15 = vld [vmem:[%s7300_s13 + $0x460] sm:$0xff]  ;;  %v594_v16 = vld [vmem:[%s7300_s13 + $0x418] sm:$0xff]  ;;  %4813 = vmatpush3.msra.mxu0 %v457_v8  ;;  %v593_v17 = vld [vmem:[%s7300_s13 + $0x410] sm:$0xff]  ;;  %s7307_s18 = sld [smem:[#allocation44_spill]] }
 0x146   :  { %761 = vmatpush1.msra.mxu1 %v613_v11  ;;  %4814 = vmatprep.subr.mxu0 %v6116_v0  ;;  %v584_v20 = vld [vmem:[%s7300_s13 + $0x3c8] sm:$0xff]  ;;  %v583_v21 = vld [vmem:[%s7300_s13 + $0x3c0] sm:$0xff]  ;;  %v574_v23 = vld [vmem:[%s7300_s13 + $0x378] sm:$0xff]  ;;  %s7308_s0 = sld [smem:[#allocation45_spill]] }
 0x147   :  { %762 = vmatprep.subr.mxu1 %v604_v12  ;;  %v4357_v19 = vmul.f32 -1.442695, %v6487_v14  ;;  %4815 = vmatpush3.msra.mxu0 %v456_v13  ;;  %v573_v24 = vld [vmem:[%s7300_s13 + $0x370] sm:$0xff]  ;;  %v564_v26 = vld [vmem:[%s7300_s13 + $0x328] sm:$0xff]  ;;  %v563_v27 = vld [vmem:[%s7300_s13 + $0x320] sm:$0xff]  ;;  %s7309_s6 = sld [smem:[#allocation36_spill]] }
 0x148   :  { %763 = vmatpush1.msra.mxu1 %v603_v15  ;;  %4816 = vmatprep.subr.mxu0 %v6116_v0  ;;  %v554_v29 = vld [vmem:[%s7300_s13 + $0x2d8] sm:$0xff]  ;;  %v553_v30 = vld [vmem:[%s7300_s13 + $0x2d0] sm:$0xff]  ;;  %v544_v32 = vld [vmem:[%s7300_s13 + $0x288] sm:$0xff]  ;;  %s7310_s22 = sld [smem:[#allocation47_spill]] }
 0x149   :  { %764 = vmatprep.subr.mxu1 %v594_v16  ;;  %5591 = vpow2.f32 %v4357_v19  ;;  %4817 = vmatpush3.msra.mxu0 %v455_v18  ;;  %v543_v33 = vld [vmem:[%s7300_s13 + $0x280] sm:$0xff]  ;;  %v534_v35 = vld [vmem:[%s7300_s13 + $0x238] sm:$0xff]  ;;  %v533_v36 = vld [vmem:[%s7300_s13 + $0x230] sm:$0xff]  ;;  %s7311_s19 = sld [smem:[#allocation50_spill]] }
 0x14a   :  { %765 = vmatpush1.msra.mxu1 %v593_v17  ;;  %4818 = vmatprep.subr.mxu0 %v6116_v0  ;;  %v524_v38 = vld [vmem:[%s7300_s13 + $0x1e8] sm:$0xff]  ;;  %v523_v39 = vld [vmem:[%s7300_s13 + $0x1e0] sm:$0xff]  ;;  %v514_v41 = vld [vmem:[%s7300_s13 + $0x198] sm:$0xff]  ;;  %s7312_s27 = sld [smem:[#allocation48_spill]] }
 0x14b   :  { %766 = vmatprep.subr.mxu1 %v584_v20  ;;  %4819 = vmatpush3.msra.mxu0 %v454_v22  ;;  %v513_v43 = vld [vmem:[%s7300_s13 + $0x190] sm:$0xff]  ;;  %v504_v46 = vld [vmem:[%s7300_s13 + $0x148] sm:$0xff]  ;;  %v503_v47 = vld [vmem:[%s7300_s13 + $0x140] sm:$0xff]  ;;  %s7313_s23 = sld [smem:[#allocation49_spill]] }
 0x14c   :  { %767 = vmatpush1.msra.mxu1 %v583_v21  ;;  %4820 = vmatprep.subr.mxu0 %v6116_v0  ;;  %v494_v49 = vld [vmem:[%s7300_s13 + $0xf8] sm:$0xff]  ;;  %v616_v50 = vld [vmem:[%s7300_s13 + $0x4c8] sm:$0xff]  ;;  %v493_v51 = vld [vmem:[%s7300_s13 + $0xf0] sm:$0xff]  ;;  %s7314_s4 = sld [smem:[#allocation51_spill]] }
 0x14d   :  { %768 = vmatprep.subr.mxu1 %v574_v23  ;;  %4821 = vmatpush3.msra.mxu0 %v453_v25  ;;  %v484_v52 = vld [vmem:[%s7300_s13 + $0xa8] sm:$0xff]  ;;  %v483_v53 = vld [vmem:[%s7300_s13 + $0xa0] sm:$0xff]  ;;  %v474_v54 = vld [vmem:[%s7300_s13 + $0x58] sm:$0xff]  ;;  %s7315_s26 = sld [smem:[#allocation54_spill]] }
 0x14e   :  { %769 = vmatpush1.msra.mxu1 %v573_v24  ;;  %4822 = vmatprep.subr.mxu0 %v6116_v0  ;;  %v473_v55 = vld [vmem:[%s7300_s13 + $0x50] sm:$0xff]  ;;  %v615_v58 = vld [vmem:[%s7300_s13 + $0x4c0] sm:$0xff]  ;;  %v606_v59 = vld [vmem:[%s7300_s13 + $0x478] sm:$0xff]  ;;  %s7316_s28 = sld [smem:[#allocation52_spill]] }
 0x14f   :  { %770 = vmatprep.subr.mxu1 %v564_v26  ;;  %4823 = vmatpush3.msra.mxu0 %v452_v28  ;;  %v605_v60 = vld [vmem:[%s7300_s13 + $0x470] sm:$0xff]  ;;  %v596_v61 = vld [vmem:[%s7300_s13 + $0x428] sm:$0xff]  ;;  %v595_v62 = vld [vmem:[%s7300_s13 + $0x420] sm:$0xff]  ;;  %s7317_s1 = sld [smem:[#allocation53_spill]] }
 0x150   :  { %771 = vmatpush1.msra.mxu1 %v563_v27  ;;  %4824 = vmatprep.subr.mxu0 %v6116_v0  ;;  %v586_v63 = vld [vmem:[%s7300_s13 + $0x3d8] sm:$0xff]  ;;  %v585_v1 = vld [vmem:[%s7300_s13 + $0x3d0] sm:$0xff]  ;;  %v576_v2 = vld [vmem:[%s7300_s13 + $0x388] sm:$0xff]  ;;  %s7318_s2 = sld [smem:[#allocation55_spill]] }
 0x151   :  { %772 = vmatprep.subr.mxu1 %v554_v29  ;;  %4825 = vmatpush3.msra.mxu0 %v451_v31  ;;  %v575_v3 = vld [vmem:[%s7300_s13 + $0x380] sm:$0xff]  ;;  %v566_v4 = vld [vmem:[%s7300_s13 + $0x338] sm:$0xff]  ;;  %v565_v5 = vld [vmem:[%s7300_s13 + $0x330] sm:$0xff]  ;;  %s7319_s9 = sld [smem:[#allocation58_spill]] }
 0x152   :  { %773 = vmatpush1.msra.mxu1 %v553_v30  ;;  %4826 = vmatprep.subr.mxu0 %v6116_v0  ;;  %v556_v6 = vld [vmem:[%s7300_s13 + $0x2e8] sm:$0xff]  ;;  %v555_v7 = vld [vmem:[%s7300_s13 + $0x2e0] sm:$0xff]  ;;  %v546_v8 = vld [vmem:[%s7300_s13 + $0x298] sm:$0xff]  ;;  %s7320_s30 = sld [smem:[#allocation56_spill]] }
 0x153   :  { %774 = vmatprep.subr.mxu1 %v544_v32  ;;  %4827 = vmatpush3.msra.mxu0 %v450_v34  ;;  %v545_v9 = vld [vmem:[%s7300_s13 + $0x290] sm:$0xff]  ;;  %v536_v10 = vld [vmem:[%s7300_s13 + $0x248] sm:$0xff]  ;;  %v535_v11 = vld [vmem:[%s7300_s13 + $0x240] sm:$0xff]  ;;  %s7321_s7 = sld [smem:[#allocation57_spill]] }
 0x154   :  { %775 = vmatpush1.msra.mxu1 %v543_v33  ;;  %4828 = vmatprep.subr.mxu0 %v6116_v0  ;;  %v526_v12 = vld [vmem:[%s7300_s13 + $0x1f8] sm:$0xff]  ;;  %v525_v13 = vld [vmem:[%s7300_s13 + $0x1f0] sm:$0xff]  ;;  %v515_v15 = vld [vmem:[%s7300_s13 + $0x1a0] sm:$0xff]  ;;  %s7322_s24 = sld [smem:[#allocation59_spill]] }
 0x155   :  { %776 = vmatprep.subr.mxu1 %v534_v35  ;;  %4829 = vmatpush3.msra.mxu0 %v449_v37  ;;  %v506_v16 = vld [vmem:[%s7300_s13 + $0x158] sm:$0xff]  ;;  %v505_v17 = vld [vmem:[%s7300_s13 + $0x150] sm:$0xff]  ;;  %v496_v18 = vld [vmem:[%s7300_s13 + $0x108] sm:$0xff]  ;;  %s7323_s14 = sld [smem:[#allocation62_spill]] }
 0x156   :  { %777 = vmatpush1.msra.mxu1 %v533_v36  ;;  %v5592_v42 = vpop.eup %5591  ;;  %4830 = vmatprep.subr.mxu0 %v6116_v0  ;;  %v495_v19 = vld [vmem:[%s7300_s13 + $0x100] sm:$0xff]  ;;  %v486_v20 = vld [vmem:[%s7300_s13 + $0xb8] sm:$0xff]  ;;  %v485_v21 = vld [vmem:[%s7300_s13 + $0xb0] sm:$0xff]  ;;  %s7324_s20 = sld [smem:[#allocation60_spill]] }
 0x157   :  { %778 = vmatprep.subr.mxu1 %v524_v38  ;;  %v634_v45 = vadd.f32 1.0, %v5592_v42  ;;  %4831 = vmatpush3.msra.mxu0 %v448_v40  ;;  %v476_v22 = vld [vmem:[%s7300_s13 + $0x68] sm:$0xff]  ;;  %v475_v23 = vld [vmem:[%s7300_s13 + $0x60] sm:$0xff]  ;;  %v466_v25 = vld [vmem:[%s7300_s13 + $0x18] sm:$0xff]  ;;  %s7325_s10 = sld [smem:[#allocation61_spill]] }
 0x158   :  { %779 = vmatpush1.msra.mxu1 %v523_v39  ;;  %4832 = vmatprep.subr.mxu0 %v6116_v0  ;;  %v464_v24 = vld [vmem:[%s7300_s13 + $0x8] sm:$0xff]  ;;  %v463_v26 = vld [vmem:[%s7300_s13] sm:$0xff]  ;;  %v465_v27 = vld [vmem:[%s7300_s13 + $0x10] sm:$0xff]  ;;  %s7326_s21 = sld [smem:[#allocation63_spill]] }
 0x159   :  { %780 = vmatprep.subr.mxu1 %v514_v41  ;;  %5593 = vrcp.f32 %v634_v45  ;;  %4833 = vmatpush3.msra.mxu0 %v447_v44  ;;  %v618_v28 = vld [vmem:[%s7300_s13 + $0x4d8] sm:$0xff]  ;;  %v620_v29 = vld [vmem:[%s7300_s13 + $0x4e8] sm:$0xff]  ;;  %v462_v30 = vld [vmem:[%s7301_s25] sm:$0x1]  ;;  %s7327_s29 = sld [smem:[#allocation69_spill]] }
 0x15a   :  { %781 = vmatpush1.msra.mxu1 %v513_v43  ;;  %4834 = vmatprep.subr.mxu0 %v6116_v0  ;;  %v617_v33 = vld [vmem:[%s7300_s13 + $0x4d0] sm:$0xff]  ;;  %v619_v34 = vld [vmem:[%s7300_s13 + $0x4e0] sm:$0xff]  ;;  %v608_v36 = vld [vmem:[%s7300_s13 + $0x488] sm:$0xff]  ;;  %s7328_s3 = sld [smem:[#allocation68_spill]] }
 0x15b   :  { %782 = vmatprep.subr.mxu1 %v504_v46  ;;  %4835 = vmatpush3.msra.mxu0 %v446_v48  ;;  %v610_v37 = vld [vmem:[%s7300_s13 + $0x498] sm:$0xff]  ;;  %v607_v38 = vld [vmem:[%s7300_s13 + $0x480] sm:$0xff]  ;;  %v609_v39 = vld [vmem:[%s7300_s13 + $0x490] sm:$0xff]  ;;  %s7330_s25 = sld [smem:[#allocation64_spill]] }
 0x15c   :  { %783 = vmatpush1.msra.mxu1 %v503_v47  ;;  %831 = vmatprep.subr.mxu0 %v616_v50  ;;  %v598_v40 = vld [vmem:[%s7300_s13 + $0x438] sm:$0xff]  ;;  %v600_v41 = vld [vmem:[%s7300_s13 + $0x448] sm:$0xff]  ;;  %v597_v42 = vld [vmem:[%s7300_s13 + $0x430] sm:$0xff] }
 0x15d   :  { %784 = vmatprep.subr.mxu1 %v494_v49  ;;  %v599_v43 = vld [vmem:[%s7300_s13 + $0x440] sm:$0xff]  ;;  %v588_v44 = vld [vmem:[%s7300_s13 + $0x3e8] sm:$0xff]  ;;  %v590_v45 = vld [vmem:[%s7300_s13 + $0x3f8] sm:$0xff] }
 0x15e   :  { %785 = vmatpush1.msra.mxu1 %v493_v51  ;;  %v587_v46 = vld [vmem:[%s7300_s13 + $0x3e0] sm:$0xff]  ;;  %v589_v47 = vld [vmem:[%s7300_s13 + $0x3f0] sm:$0xff]  ;;  %v578_v48 = vld [vmem:[%s7300_s13 + $0x398] sm:$0xff] }
 0x15f   :  { %786 = vmatprep.subr.mxu1 %v484_v52  ;;  %v580_v49 = vld [vmem:[%s7300_s13 + $0x3a8] sm:$0xff]  ;;  %v577_v50 = vld [vmem:[%s7300_s13 + $0x390] sm:$0xff]  ;;  %v579_v51 = vld [vmem:[%s7300_s13 + $0x3a0] sm:$0xff] }
 0x160   :  { %787 = vmatpush1.msra.mxu1 %v483_v53  ;;  %v568_v52 = vld [vmem:[%s7300_s13 + $0x348] sm:$0xff]  ;;  %v570_v53 = vld [vmem:[%s7300_s13 + $0x358] sm:$0xff] }
 0x161   :  { %788 = vmatprep.subr.mxu1 %v474_v54  ;;  %v567_v54 = vld [vmem:[%s7300_s13 + $0x340] sm:$0xff] }
 0x162   :  { %789 = vmatpush1.msra.mxu1 %v473_v55  ;;  %v569_v55 = vld [vmem:[%s7300_s13 + $0x350] sm:$0xff] }
 0x163   :  { %790 = vmatprep.subr.mxu1 %v464_v24  ;;  %v489_v24 = vld [vmem:[%s7300_s13 + $0xd0] sm:$0xff] }
 0x164   :  { %791 = vmatpush1.msra.mxu1 %v463_v26  ;;  %v480_v26 = vld [vmem:[%s7300_s13 + $0x88] sm:$0xff] }
 0x165   :  { %902 = vmatprep.subr.mxu1 %v618_v28  ;;  %v479_v28 = vld [vmem:[%s7300_s13 + $0x80] sm:$0xff] }
 0x166   :  { %v5594_v56 = vpop.eup %5593 }
 0x167   :  { %v637_v57 = vmul.f32 %v5594_v56, %v6487_v14  ;;  %v516_v14 = vld [vmem:[%s7300_s13 + $0x1a8] sm:$0xff]  ;;  %v558_v56 = vld [vmem:[%s7300_s13 + $0x2f8] sm:$0xff] }
 0x169   :  { %4837 = vmatmul.mubr.f32.vlgmr.msra.gmra.mxu0 %v637_v57  ;;  %v560_v57 = vld [vmem:[%s7300_s13 + $0x308] sm:$0xff] }
 0x16a   :  { %832 = vmatpush1.msra.mxu0 %v615_v58  ;;  %895 = vmatprep.mubr.f32.mxu0 %v6116_v0  ;;  %v557_v58 = vld [vmem:[%s7300_s13 + $0x2f0] sm:$0xff] }
 0x16b   :  { %833 = vmatprep.subr.mxu0 %v606_v59  ;;  %v559_v59 = vld [vmem:[%s7300_s13 + $0x300] sm:$0xff] }
 0x16c   :  { %834 = vmatpush1.msra.mxu0 %v605_v60  ;;  %v548_v60 = vld [vmem:[%s7300_s13 + $0x2a8] sm:$0xff] }
 0x16d   :  { %835 = vmatprep.subr.mxu0 %v596_v61  ;;  %v550_v61 = vld [vmem:[%s7300_s13 + $0x2b8] sm:$0xff] }
 0x16e   :  { %836 = vmatpush1.msra.mxu0 %v595_v62  ;;  %v547_v62 = vld [vmem:[%s7300_s13 + $0x2a0] sm:$0xff] }
 0x16f   :  { %837 = vmatprep.subr.mxu0 %v586_v63  ;;  %v549_v63 = vld [vmem:[%s7300_s13 + $0x2b0] sm:$0xff] }
 0x170   :  { %838 = vmatpush1.msra.mxu0 %v585_v1  ;;  %v538_v1 = vld [vmem:[%s7300_s13 + $0x258] sm:$0xff] }
 0x171   :  { %839 = vmatprep.subr.mxu0 %v576_v2  ;;  %v540_v2 = vld [vmem:[%s7300_s13 + $0x268] sm:$0xff] }
 0x172   :  { %840 = vmatpush1.msra.mxu0 %v575_v3  ;;  %v537_v3 = vld [vmem:[%s7300_s13 + $0x250] sm:$0xff] }
 0x173   :  { %841 = vmatprep.subr.mxu0 %v566_v4  ;;  %v539_v4 = vld [vmem:[%s7300_s13 + $0x260] sm:$0xff] }
 0x174   :  { %842 = vmatpush1.msra.mxu0 %v565_v5  ;;  %v528_v5 = vld [vmem:[%s7300_s13 + $0x208] sm:$0xff] }
 0x175   :  { %843 = vmatprep.subr.mxu0 %v556_v6  ;;  %v530_v6 = vld [vmem:[%s7300_s13 + $0x218] sm:$0xff] }
 0x176   :  { %844 = vmatpush1.msra.mxu0 %v555_v7  ;;  %v527_v7 = vld [vmem:[%s7300_s13 + $0x200] sm:$0xff] }
 0x177   :  { %845 = vmatprep.subr.mxu0 %v546_v8  ;;  %v529_v8 = vld [vmem:[%s7300_s13 + $0x210] sm:$0xff] }
 0x178   :  { %846 = vmatpush1.msra.mxu0 %v545_v9  ;;  %v518_v9 = vld [vmem:[%s7300_s13 + $0x1b8] sm:$0xff] }
 0x179   :  { %847 = vmatprep.subr.mxu0 %v536_v10  ;;  %v520_v10 = vld [vmem:[%s7300_s13 + $0x1c8] sm:$0xff] }
 0x17a   :  { %848 = vmatpush1.msra.mxu0 %v535_v11  ;;  %v517_v11 = vld [vmem:[%s7300_s13 + $0x1b0] sm:$0xff] }
 0x17b   :  { %849 = vmatprep.subr.mxu0 %v526_v12  ;;  %v519_v12 = vld [vmem:[%s7300_s13 + $0x1c0] sm:$0xff] }
 0x17c   :  { %850 = vmatpush1.msra.mxu0 %v525_v13  ;;  %v508_v13 = vld [vmem:[%s7300_s13 + $0x168] sm:$0xff] }
 0x17d   :  { %851 = vmatprep.subr.mxu0 %v516_v14  ;;  %v510_v14 = vld [vmem:[%s7300_s13 + $0x178] sm:$0xff] }
 0x17e   :  { %852 = vmatpush1.msra.mxu0 %v515_v15  ;;  %v507_v15 = vld [vmem:[%s7300_s13 + $0x160] sm:$0xff] }
 0x17f   :  { %853 = vmatprep.subr.mxu0 %v506_v16  ;;  %v509_v16 = vld [vmem:[%s7300_s13 + $0x170] sm:$0xff] }
 0x180   :  { %854 = vmatpush1.msra.mxu0 %v505_v17  ;;  %v498_v17 = vld [vmem:[%s7300_s13 + $0x118] sm:$0xff] }
 0x181   :  { %855 = vmatprep.subr.mxu0 %v496_v18  ;;  %v500_v18 = vld [vmem:[%s7300_s13 + $0x128] sm:$0xff] }
 0x182   :  { %856 = vmatpush1.msra.mxu0 %v495_v19  ;;  %v497_v19 = vld [vmem:[%s7300_s13 + $0x110] sm:$0xff] }
 0x183   :  { %857 = vmatprep.subr.mxu0 %v486_v20  ;;  %v499_v20 = vld [vmem:[%s7300_s13 + $0x120] sm:$0xff] }
 0x184   :  { %858 = vmatpush1.msra.mxu0 %v485_v21  ;;  %v488_v21 = vld [vmem:[%s7300_s13 + $0xc8] sm:$0xff] }
 0x185   :  { %859 = vmatprep.subr.mxu0 %v476_v22  ;;  %v490_v22 = vld [vmem:[%s7300_s13 + $0xd8] sm:$0xff] }
 0x186   :  { %860 = vmatpush1.msra.mxu0 %v475_v23  ;;  %v487_v23 = vld [vmem:[%s7300_s13 + $0xc0] sm:$0xff] }
 0x187   :  { %861 = vmatprep.subr.mxu0 %v466_v25  ;;  %v478_v25 = vld [vmem:[%s7300_s13 + $0x78] sm:$0xff] }
 0x188   :  { %862 = vmatpush1.msra.mxu0 %v465_v27  ;;  %v477_v27 = vld [vmem:[%s7300_s13 + $0x70] sm:$0xff] }
 0x189   :  { %973 = vmatprep.subr.mxu0 %v620_v29  ;;  %v468_v29 = vld [vmem:[%s7300_s13 + $0x28] sm:$0xff] }
 0x229   :  { %v704_v31 = vpop.f32.mrf.mxu0 }
 0x22a   :  { %v6577_v32 = vadd.f32 %v704_v31, %v462_v30  ;;  %v470_v30 = vld [vmem:[%s7300_s13 + $0x38] sm:$0xff]  ;;  %v467_v31 = vld [vmem:[%s7300_s13 + $0x20] sm:$0xff] }
 0x22b   :  { %v4838_v35 = vpop.f32.mrf.mxu0 }
 0x22c   :  { %825 = vmatmul.mubr.f32.vlgmr.msra.gmra.mxu1 %v6577_v32  ;;  %896 = vmatmul.mubr.f32.vlgmr.msra.gmra.mxu0 %v6577_v32  ;;  %v621_v35 = vld [vmem:[%s7300_s13 + $0x4f0] sm:$0xff] }
 0x22d   :  { %903 = vmatpush1.msra.mxu1 %v617_v33  ;;  %974 = vmatpush1.msra.mxu0 %v619_v34  ;;  %v469_v33 = vld [vmem:[%s7300_s13 + $0x30] sm:$0xff]  ;;  %v622_v34 = vld [vmem:[%s7300_s13 + $0x4f8] sm:$0xff] }
 0x22e   :  { %904 = vmatprep.subr.mxu1 %v608_v36  ;;  %975 = vmatprep.subr.mxu0 %v610_v37  ;;  %v612_v36 = vld [vmem:[%s7300_s13 + $0x4a8] sm:$0xff]  ;;  %v611_v37 = vld [vmem:[%s7300_s13 + $0x4a0] sm:$0xff] }
 0x22f   :  { %905 = vmatpush1.msra.mxu1 %v607_v38  ;;  %976 = vmatpush1.msra.mxu0 %v609_v39  ;;  %v602_v38 = vld [vmem:[%s7300_s13 + $0x458] sm:$0xff]  ;;  %v601_v39 = vld [vmem:[%s7300_s13 + $0x450] sm:$0xff] }
 0x230   :  { %906 = vmatprep.subr.mxu1 %v598_v40  ;;  %977 = vmatprep.subr.mxu0 %v600_v41  ;;  %v592_v40 = vld [vmem:[%s7300_s13 + $0x408] sm:$0xff]  ;;  %v591_v41 = vld [vmem:[%s7300_s13 + $0x400] sm:$0xff] }
 0x231   :  { %907 = vmatpush1.msra.mxu1 %v597_v42  ;;  %978 = vmatpush1.msra.mxu0 %v599_v43  ;;  %v582_v42 = vld [vmem:[%s7300_s13 + $0x3b8] sm:$0xff]  ;;  %v581_v43 = vld [vmem:[%s7300_s13 + $0x3b0] sm:$0xff] }
 0x232   :  { %908 = vmatprep.subr.mxu1 %v588_v44  ;;  %979 = vmatprep.subr.mxu0 %v590_v45  ;;  %v571_v44 = vld [vmem:[%s7300_s13 + $0x360] sm:$0xff]  ;;  %v562_v45 = vld [vmem:[%s7300_s13 + $0x318] sm:$0xff] }
 0x233   :  { %909 = vmatpush1.msra.mxu1 %v587_v46  ;;  %980 = vmatpush1.msra.mxu0 %v589_v47  ;;  %v561_v46 = vld [vmem:[%s7300_s13 + $0x310] sm:$0xff]  ;;  %v552_v47 = vld [vmem:[%s7300_s13 + $0x2c8] sm:$0xff] }
 0x234   :  { %910 = vmatprep.subr.mxu1 %v578_v48  ;;  %981 = vmatprep.subr.mxu0 %v580_v49  ;;  %v551_v48 = vld [vmem:[%s7300_s13 + $0x2c0] sm:$0xff]  ;;  %v542_v49 = vld [vmem:[%s7300_s13 + $0x278] sm:$0xff] }
 0x235   :  { %911 = vmatpush1.msra.mxu1 %v577_v50  ;;  %982 = vmatpush1.msra.mxu0 %v579_v51  ;;  %v541_v50 = vld [vmem:[%s7300_s13 + $0x270] sm:$0xff]  ;;  %v532_v51 = vld [vmem:[%s7300_s13 + $0x228] sm:$0xff] }
 0x236   :  { %912 = vmatprep.subr.mxu1 %v568_v52  ;;  %983 = vmatprep.subr.mxu0 %v570_v53  ;;  %v531_v52 = vld [vmem:[%s7300_s13 + $0x220] sm:$0xff]  ;;  %v522_v53 = vld [vmem:[%s7300_s13 + $0x1d8] sm:$0xff] }
 0x237   :  { %913 = vmatpush1.msra.mxu1 %v567_v54  ;;  %984 = vmatpush1.msra.mxu0 %v569_v55  ;;  %v521_v54 = vld [vmem:[%s7300_s13 + $0x1d0] sm:$0xff]  ;;  %v512_v55 = vld [vmem:[%s7300_s13 + $0x188] sm:$0xff] }
 0x238   :  { %914 = vmatprep.subr.mxu1 %v558_v56  ;;  %985 = vmatprep.subr.mxu0 %v560_v57  ;;  %v511_v56 = vld [vmem:[%s7300_s13 + $0x180] sm:$0xff]  ;;  %v502_v57 = vld [vmem:[%s7300_s13 + $0x138] sm:$0xff] }
 0x239   :  { %915 = vmatpush1.msra.mxu1 %v557_v58  ;;  %986 = vmatpush1.msra.mxu0 %v559_v59  ;;  %v501_v58 = vld [vmem:[%s7300_s13 + $0x130] sm:$0xff]  ;;  %v492_v59 = vld [vmem:[%s7300_s13 + $0xe8] sm:$0xff] }
 0x23a   :  { %916 = vmatprep.subr.mxu1 %v548_v60  ;;  %987 = vmatprep.subr.mxu0 %v550_v61  ;;  %v491_v60 = vld [vmem:[%s7300_s13 + $0xe0] sm:$0xff]  ;;  %v482_v61 = vld [vmem:[%s7300_s13 + $0x98] sm:$0xff] }
 0x23b   :  { %917 = vmatpush1.msra.mxu1 %v547_v62  ;;  %988 = vmatpush1.msra.mxu0 %v549_v63  ;;  %v481_v62 = vld [vmem:[%s7300_s13 + $0x90] sm:$0xff]  ;;  %v472_v63 = vld [vmem:[%s7300_s13 + $0x48] sm:$0xff] }
 0x23c   :  { %918 = vmatprep.subr.mxu1 %v538_v1  ;;  %989 = vmatprep.subr.mxu0 %v540_v2  ;;  %v471_v1 = vld [vmem:[%s7300_s13 + $0x40] sm:$0xff] }
 0x23d   :  { %919 = vmatpush1.msra.mxu1 %v537_v3  ;;  %990 = vmatpush1.msra.mxu0 %v539_v4  ;;  %v625_v2 = vld [vmem:[%s7302_s11] sm:$0xff]  ;;  %v441_v4 = vld [vmem:[%s7303_s15 + $0x8] sm:$0xff]  ;;  %s7331_s11 = sld [smem:[#allocation67_spill]] }
 0x23e   :  { %920 = vmatprep.subr.mxu1 %v528_v5  ;;  %991 = vmatprep.subr.mxu0 %v530_v6  ;;  %v440_v3 = vld [vmem:[%s7303_s15] sm:$0xff]  ;;  %v710_v5 = vlaneseq  ;;  %s7332_s15 = sld [smem:[#allocation66_spill]] }
 0x23f   :  { %921 = vmatpush1.msra.mxu1 %v527_v7  ;;  %992 = vmatpush1.msra.mxu0 %v529_v8  ;;  %v624_v8 = vld [vmem:[%s7304_s8 + $0x8] sm:$0x3] }
 0x240   :  { %922 = vmatprep.subr.mxu1 %v518_v9  ;;  %993 = vmatprep.subr.mxu0 %v520_v10  ;;  %v6686_v6 = vshrl.u32 %v710_v5, 7 }
 0x241   :  { %923 = vmatpush1.msra.mxu1 %v517_v11  ;;  %994 = vmatpush1.msra.mxu0 %v519_v12 }
 0x242   :  { %924 = vmatprep.subr.mxu1 %v508_v13  ;;  %995 = vmatprep.subr.mxu0 %v510_v14  ;;  %v716_v7 = vsub.s32 1, %v6686_v6 }
 0x243   :  { %925 = vmatpush1.msra.mxu1 %v507_v15  ;;  %996 = vmatpush1.msra.mxu0 %v509_v16 }
 0x244   :  { %926 = vmatprep.subr.mxu1 %v498_v17  ;;  %997 = vmatprep.subr.mxu0 %v500_v18  ;;  %v749_v9 = vrot.slane %v624_v8, %v716_v7  ;;  %v4358_v17 = vld [vmem:[%s7305_s16] ss:$0 sm:$0xff]  ;;  %s7333_s16 = sld [smem:[#allocation70_spill]] }
 0x245   :  { %927 = vmatpush1.msra.mxu1 %v497_v19  ;;  %998 = vmatpush1.msra.mxu0 %v499_v20  ;;  %v4363_v8 = vld [vmem:[%s7310_s22] ss:$0 sm:$0xff]  ;;  %s7337_s22 = sld [smem:[#allocation77_spill]] }
 0x246   :  { %928 = vmatprep.subr.mxu1 %v488_v21  ;;  %999 = vmatprep.subr.mxu0 %v490_v22  ;;  %v1220_v21 = vld [vmem:[%s7306_s12 + $0x78] sm:$0xff]  ;;  %v1219_v22 = vld [vmem:[%s7306_s12 + $0x70] sm:$0xff] }
 0x247   :  { %929 = vmatpush1.msra.mxu1 %v487_v23  ;;  %1000 = vmatpush1.msra.mxu0 %v489_v24 }
 0x248   :  { %930 = vmatprep.subr.mxu1 %v478_v25  ;;  %1001 = vmatprep.subr.mxu0 %v480_v26 }
 0x249   :  { %931 = vmatpush1.msra.mxu1 %v477_v27  ;;  %1002 = vmatpush1.msra.mxu0 %v479_v28 }
 0x24a   :  { %932 = vmatprep.subr.mxu1 %v468_v29  ;;  %1003 = vmatprep.subr.mxu0 %v470_v30 }
 0x24b   :  { %933 = vmatpush1.msra.mxu1 %v467_v31  ;;  %966 = vmatprep.mubr.f32.mxu1 %v6116_v0  ;;  %v1218_v31 = vld [vmem:[%s7306_s12 + $0x68] sm:$0xff] }
 0x24c   :  { %1004 = vmatpush1.msra.mxu0 %v469_v33  ;;  %1037 = vmatprep.mubr.f32.mxu0 %v6116_v0  ;;  %v1217_v33 = vld [vmem:[%s7306_s12 + $0x60] sm:$0xff] }
 0x24d   :  { %967 = vmatmul.mubr.f32.vlgmr.msra.gmra.mxu1 %v6577_v32  ;;  %1038 = vmatmul.mubr.f32.vlgmr.msra.gmra.mxu0 %v6577_v32 }
 0x24e   :  { %1044 = vmatprep.subr.mxu1 %v622_v34  ;;  %1108 = vmatprep.mubr.f32.mxu1 %v6116_v0  ;;  %v572_v0 = vld [vmem:[%s7300_s13 + $0x368] sm:$0xff]  ;;  %v1216_v34 = vld [vmem:[%s7306_s12 + $0x58] sm:$0xff]  ;;  %s7329_s13 = sld [smem:[#allocation65_spill]] }
 0x24f   :  { %1045 = vmatpush1.msra.mxu1 %v621_v35  ;;  %v1215_v35 = vld [vmem:[%s7306_s12 + $0x50] sm:$0xff] }
 0x250   :  { %1046 = vmatprep.subr.mxu1 %v612_v36  ;;  %v1214_v36 = vld [vmem:[%s7306_s12 + $0x48] sm:$0xff] }
 0x251   :  { %1047 = vmatpush1.msra.mxu1 %v611_v37  ;;  %v1213_v37 = vld [vmem:[%s7306_s12 + $0x40] sm:$0xff] }
 0x252   :  { %1048 = vmatprep.subr.mxu1 %v602_v38  ;;  %v1212_v38 = vld [vmem:[%s7306_s12 + $0x38] sm:$0xff] }
 0x253   :  { %1049 = vmatpush1.msra.mxu1 %v601_v39  ;;  %v1211_v39 = vld [vmem:[%s7306_s12 + $0x30] sm:$0xff] }
 0x254   :  { %1050 = vmatprep.subr.mxu1 %v592_v40  ;;  %v1210_v40 = vld [vmem:[%s7306_s12 + $0x28] sm:$0xff] }
 0x255   :  { %1051 = vmatpush1.msra.mxu1 %v591_v41  ;;  %v1209_v41 = vld [vmem:[%s7306_s12 + $0x20] sm:$0xff] }
 0x256   :  { %1052 = vmatprep.subr.mxu1 %v582_v42  ;;  %v1208_v42 = vld [vmem:[%s7306_s12 + $0x18] sm:$0xff] }
 0x257   :  { %1053 = vmatpush1.msra.mxu1 %v581_v43  ;;  %v1207_v43 = vld [vmem:[%s7306_s12 + $0x10] sm:$0xff] }
 0x258   :  { %1054 = vmatprep.subr.mxu1 %v572_v0  ;;  %v1206_v0 = vld [vmem:[%s7306_s12 + $0x8] sm:$0xff] }
 0x259   :  { %1055 = vmatpush1.msra.mxu1 %v571_v44  ;;  %v1205_v44 = vld [vmem:[%s7306_s12] sm:$0xff]  ;;  %s7334_s12 = sld [smem:[#allocation71_spill]] }
 0x25a   :  { %1056 = vmatprep.subr.mxu1 %v562_v45 }
 0x25b   :  { %1057 = vmatpush1.msra.mxu1 %v561_v46 }
 0x25c   :  { %1058 = vmatprep.subr.mxu1 %v552_v47 }
 0x25d   :  { %1059 = vmatpush1.msra.mxu1 %v551_v48 }
 0x25e   :  { %1060 = vmatprep.subr.mxu1 %v542_v49 }
 0x25f   :  { %1061 = vmatpush1.msra.mxu1 %v541_v50 }
 0x260   :  { %1062 = vmatprep.subr.mxu1 %v532_v51 }
 0x261   :  { %1063 = vmatpush1.msra.mxu1 %v531_v52  ;;  %v4361_v52 = vld [vmem:[%s7307_s18] ss:$0 sm:$0xff]  ;;  %s7335_s18 = sld [smem:[#allocation72_spill]] }
 0x262   :  { %1064 = vmatprep.subr.mxu1 %v522_v53 }
 0x263   :  { %1065 = vmatpush1.msra.mxu1 %v521_v54  ;;  %v4362_v54 = vld [vmem:[%s7308_s0] ss:$0 sm:$0xff]  ;;  %s7336_s0 = sld [smem:[#allocation78_spill]] }
 0x264   :  { %1066 = vmatprep.subr.mxu1 %v512_v55 }
 0x265   :  { %1067 = vmatpush1.msra.mxu1 %v511_v56 }
 0x266   :  { %1068 = vmatprep.subr.mxu1 %v502_v57 }
 0x267   :  { %1069 = vmatpush1.msra.mxu1 %v501_v58 }
 0x268   :  { %1070 = vmatprep.subr.mxu1 %v492_v59 }
 0x269   :  { %1071 = vmatpush1.msra.mxu1 %v491_v60 }
 0x26a   :  { %1072 = vmatprep.subr.mxu1 %v482_v61  ;;  %v6732_v61 = vld [vmem:[%s7309_s6] sm:$0xff] }
 0x26b   :  { %1073 = vmatpush1.msra.mxu1 %v481_v62 }
 0x26c   :  { %1074 = vmatprep.subr.mxu1 %v472_v63 }
 0x26d   :  { %1075 = vmatpush1.msra.mxu1 %v471_v1  ;;  %v6737_v1 = vld [vmem:[%s7309_s6 + $0x8] sm:$0xff] }
 0x26e   :  { %1109 = vmatmul.mubr.f32.vlgmr.msra.gmra.mxu1 %v6577_v32  ;;  %4839 = vmatprep.subr.mxu1 %v625_v2 }
 0x26f   :  { %4840 = vmatpush3.msra.mxu1 %v625_v2  ;;  %4841 = vmatprep.mubr.msk.f32.mxu1 %vm1121_vm1, %v440_v3  ;;  %v6744_v2 = vsub.s32 0, %v6686_v6  ;;  %v6747_v3 = vld [vmem:[%s7304_s8] sm:$0xff] }
 0x270   :  { %4844 = vmatprep.subr.mxu1 %v1220_v21 }
 0x272   :  { %4842 = vmatmul.mubr.msk.f32.vlgmr.msra.gmra.mxu1 %vm1121_vm1, %v441_v4  ;;  %v713_v4 = vrot.slane %v6747_v3, %v6744_v2 }
 0x273   :  { %4845 = vmatpush3.msra.mxu1 %v1220_v21 }
 0x274   :  { %4846 = vmatprep.subr.mxu1 %v1219_v22 }
 0x275   :  { %4847 = vmatpush3.msra.mxu1 %v1219_v22 }
 0x276   :  { %4848 = vmatprep.subr.mxu1 %v1218_v31 }
 0x277   :  { %4849 = vmatpush3.msra.mxu1 %v1218_v31 }
 0x278   :  { %4850 = vmatprep.subr.mxu1 %v1217_v33 }
 0x279   :  { %4851 = vmatpush3.msra.mxu1 %v1217_v33  ;;  %v1239_v33 = vld [vmem:[%s7311_s19 + $0x78] sm:$0xff] }
 0x27a   :  { %4852 = vmatprep.subr.mxu1 %v1216_v34  ;;  %4886 = vmatprep.subr.mxu0 %v1239_v33 }
 0x27b   :  { %4853 = vmatpush3.msra.mxu1 %v1216_v34  ;;  %v1238_v34 = vld [vmem:[%s7311_s19 + $0x70] sm:$0xff]  ;;  %4887 = vmatpush3.msra.mxu0 %v1239_v33 }
 0x27c   :  { %4854 = vmatprep.subr.mxu1 %v1215_v35  ;;  %4888 = vmatprep.subr.mxu0 %v1238_v34 }
 0x27d   :  { %4855 = vmatpush3.msra.mxu1 %v1215_v35  ;;  %v1237_v35 = vld [vmem:[%s7311_s19 + $0x68] sm:$0xff]  ;;  %4889 = vmatpush3.msra.mxu0 %v1238_v34 }
 0x27e   :  { %4856 = vmatprep.subr.mxu1 %v1214_v36  ;;  %4890 = vmatprep.subr.mxu0 %v1237_v35 }
 0x27f   :  { %4857 = vmatpush3.msra.mxu1 %v1214_v36  ;;  %4891 = vmatpush3.msra.mxu0 %v1237_v35 }
 0x280   :  { %4858 = vmatprep.subr.mxu1 %v1213_v37 }
 0x281   :  { %4859 = vmatpush3.msra.mxu1 %v1213_v37 }
 0x282   :  { %4860 = vmatprep.subr.mxu1 %v1212_v38 }
 0x283   :  { %4861 = vmatpush3.msra.mxu1 %v1212_v38 }
 0x284   :  { %4862 = vmatprep.subr.mxu1 %v1211_v39 }
 0x285   :  { %4863 = vmatpush3.msra.mxu1 %v1211_v39 }
 0x286   :  { %4864 = vmatprep.subr.mxu1 %v1210_v40 }
 0x287   :  { %4865 = vmatpush3.msra.mxu1 %v1210_v40 }
 0x288   :  { %4866 = vmatprep.subr.mxu1 %v1209_v41 }
 0x289   :  { %4867 = vmatpush3.msra.mxu1 %v1209_v41 }
 0x28a   :  { %4868 = vmatprep.subr.mxu1 %v1208_v42 }
 0x28b   :  { %4869 = vmatpush3.msra.mxu1 %v1208_v42 }
 0x28c   :  { %4870 = vmatprep.subr.mxu1 %v1207_v43 }
 0x28d   :  { %4871 = vmatpush3.msra.mxu1 %v1207_v43 }
 0x28e   :  { %4872 = vmatprep.subr.mxu1 %v1206_v0 }
 0x28f   :  { %4873 = vmatpush3.msra.mxu1 %v1206_v0  ;;  %v1236_v0 = vld [vmem:[%s7311_s19 + $0x60] sm:$0xff] }
 0x290   :  { %4874 = vmatprep.subr.mxu1 %v1205_v44  ;;  %4892 = vmatprep.subr.mxu0 %v1236_v0 }
 0x291   :  { %4875 = vmatpush3.msra.mxu1 %v1205_v44  ;;  %4893 = vmatpush3.msra.mxu0 %v1236_v0  ;;  %v1235_v44 = vld [vmem:[%s7311_s19 + $0x58] sm:$0xff] }
 0x292   :  { %4894 = vmatprep.subr.mxu0 %v1235_v44 }
 0x293   :  { %4895 = vmatpush3.msra.mxu0 %v1235_v44 }
 0x2ec   :  { %v6692_v32 = vpop.f32.mrf.mxu1 }
 0x2ed   :  { %v827_v5 = vadd.f32 %v6692_v32, %v713_v4  ;;  %v4368_v4 = vld [vmem:[%s7312_s27] ss:$0 sm:$0xff]  ;;  %s7339_s27 = sld [smem:[#allocation73_spill]] }
 0x2ee   :  { %v6694_v10 = vpop.f32.mrf.mxu1 }
 0x30d   :  { %v6696_v11 = vpop.f32.mrf.mxu1 }
 0x30f   :  { %v6698_v12 = vpop.f32.mrf.mxu1 }
 0x32e   :  { %v6700_v13 = vpop.f32.mrf.mxu1 }
 0x330   :  { %v1112_v14 = vpop.f32.mrf.mxu1 }
 0x331   :  { %v6702_v15 = vadd.f32 %v1112_v14, %v749_v9  ;;  %v1446_v14 = vrot.slane %v827_v5, %v6744_v2 }
 0x332   :  { %v4843_v16 = vpop.f32.mrf.mxu1 }
 0x333   :  { %v6708_v20 = vadd.f32 %v4843_v16, %v4358_v17 }
 0x334   :  { %v1194_v18 = vpop.f32.mrf.mxu1 }
 0x335   :  { %v6705_v19 = vadd.f32 %v4358_v17, %v1194_v18 }
 0x337   :  { %1241 = vadd.xlane.f32.xlu0 %v6705_v19 }
 0x33b   :  { %1243 = vadd.xlane.f32.xlu0 %v6708_v20 }
 0x3c0   :  { %v1242_v23 = vpop.xlane.xlu0 %1241 }
 0x3c1   :  { %v1246_v24 = vmul.f32 0.0078125, %v1242_v23 }
 0x3c3   :  { %v1248_v25 = vsub.f32 %v6705_v19, %v1246_v24 }
 0x3c4   :  { %v1244_v26 = vpop.xlane.xlu0 %1243 }
 0x3c5   :  { %v1247_v27 = vmul.f32 0.0078125, %v1244_v26  ;;  %v1250_v28 = vmul.f32 %v1248_v25, %v1248_v25 }
 0x3c7   :  { %v1249_v29 = vsub.f32 %v6708_v20, %v1247_v27  ;;  %1252 = vadd.xlane.f32.xlu1 %v1250_v28 }
 0x3c9   :  { %v1251_v30 = vmul.f32 %v1249_v29, %v1249_v29 }
 0x3cb   :  { %1254 = vadd.xlane.f32.xlu1 %v1251_v30 }
 0x450   :  { %v1253_v45 = vpop.xlane.xlu1 %1252 }
 0x451   :  { %v1256_v46 = vmul.f32 0.0078125, %v1253_v45  ;;  %v1234_v45 = vld [vmem:[%s7311_s19 + $0x50] sm:$0xff] }
 0x452   :  { %4896 = vmatprep.subr.mxu0 %v1234_v45 }
 0x453   :  { %v1258_v47 = vadd.f32 1e-05, %v1256_v46  ;;  %4897 = vmatpush3.msra.mxu0 %v1234_v45  ;;  %v1233_v46 = vld [vmem:[%s7311_s19 + $0x48] sm:$0xff] }
 0x454   :  { %v1255_v48 = vpop.xlane.xlu1 %1254  ;;  %4898 = vmatprep.subr.mxu0 %v1233_v46 }
 0x455   :  { %5595 = vrsqrt.f32 %v1258_v47  ;;  %v1257_v49 = vmul.f32 0.0078125, %v1255_v48  ;;  %v1232_v47 = vld [vmem:[%s7311_s19 + $0x40] sm:$0xff]  ;;  %4899 = vmatpush3.msra.mxu0 %v1233_v46  ;;  %v1231_v48 = vld [vmem:[%s7311_s19 + $0x38] sm:$0xff] }
 0x456   :  { %4900 = vmatprep.subr.mxu0 %v1232_v47 }
 0x457   :  { %v1259_v50 = vadd.f32 1e-05, %v1257_v49  ;;  %4901 = vmatpush3.msra.mxu0 %v1232_v47  ;;  %v1230_v49 = vld [vmem:[%s7311_s19 + $0x30] sm:$0xff]  ;;  %v1696_v47 = vld [vmem:[%s7315_s26 + $0x78] sm:$0xff] }
 0x458   :  { %4902 = vmatprep.subr.mxu0 %v1231_v48 }
 0x459   :  { %5597 = vrsqrt.f32 %v1259_v50  ;;  %4903 = vmatpush3.msra.mxu0 %v1231_v48  ;;  %v1229_v50 = vld [vmem:[%s7311_s19 + $0x28] sm:$0xff]  ;;  %v1695_v48 = vld [vmem:[%s7315_s26 + $0x70] sm:$0xff] }
 0x45a   :  { %4904 = vmatprep.subr.mxu0 %v1230_v49 }
 0x45b   :  { %4905 = vmatpush3.msra.mxu0 %v1230_v49  ;;  %v1694_v49 = vld [vmem:[%s7315_s26 + $0x68] sm:$0xff] }
 0x45c   :  { %4906 = vmatprep.subr.mxu0 %v1229_v50 }
 0x45d   :  { %4907 = vmatpush3.msra.mxu0 %v1229_v50 }
 0x462   :  { %v5596_v51 = vpop.eup %5595 }
 0x463   :  { %v1262_v53 = vmul.f32 %v5596_v51, %v1248_v25  ;;  %v1228_v51 = vld [vmem:[%s7311_s19 + $0x20] sm:$0xff] }
 0x464   :  { %4908 = vmatprep.subr.mxu0 %v1228_v51 }
 0x465   :  { %v1270_v55 = vmul.f32 %v4361_v52, %v1262_v53  ;;  %4909 = vmatpush3.msra.mxu0 %v1228_v51  ;;  %v1226_v53 = vld [vmem:[%s7311_s19 + $0x10] sm:$0xff] }
 0x466   :  { %v5598_v56 = vpop.eup %5597 }
 0x467   :  { %v1263_v57 = vmul.f32 %v5598_v56, %v1249_v29  ;;  %v1278_v58 = vadd.f32 %v4362_v54, %v1270_v55  ;;  %v1224_v55 = vld [vmem:[%s7311_s19] sm:$0xff] }
 0x469   :  { %v1271_v59 = vmul.f32 %v4361_v52, %v1263_v57  ;;  %4876 = vmatprep.mubr.f32.mxu1 %v1278_v58  ;;  %v1227_v52 = vld [vmem:[%s7311_s19 + $0x18] sm:$0xff] }
 0x46a   :  { %4910 = vmatprep.subr.mxu0 %v1227_v52 }
 0x46b   :  { %v1279_v60 = vadd.f32 %v4362_v54, %v1271_v59  ;;  %4911 = vmatpush3.msra.mxu0 %v1227_v52  ;;  %v1225_v54 = vld [vmem:[%s7311_s19 + $0x8] sm:$0xff]  ;;  %s7338_s19 = sld [smem:[#allocation74_spill]] }
 0x46c   :  { %4912 = vmatprep.subr.mxu0 %v1226_v53 }
 0x46d   :  { %4877 = vmatmul.mubr.f32.vlgmr.msra.gmra.mxu1 %v1279_v60  ;;  %4913 = vmatpush3.msra.mxu0 %v1226_v53 }
 0x46e   :  { %4883 = vmatprep.mubr.msk.f32.mxu1 %vm1361_vm2, %v6732_v61  ;;  %4914 = vmatprep.subr.mxu0 %v1225_v54 }
 0x46f   :  { %4915 = vmatpush3.msra.mxu0 %v1225_v54 }
 0x470   :  { %4916 = vmatprep.subr.mxu0 %v1224_v55 }
 0x471   :  { %4917 = vmatpush3.msra.mxu0 %v1224_v55 }
 0x52d   :  { %v4878_v62 = vpop.f32.mrf.mxu1 }
 0x52e   :  { %4879 = vmatprep.subr.mxu1 %v4878_v62 }
 0x52f   :  { %v1346_v63 = vpop.f32.mrf.mxu1  ;;  %4880 = vmatpush3.msra.mxu1 %v4878_v62 }
 0x530   :  { %4881 = vmatprep.subr.mxu1 %v1346_v63 }
 0x531   :  { %4882 = vmatpush3.msra.mxu1 %v1346_v63 }
 0x532   :  { %4884 = vmatmul.mubr.msk.f32.vlgmr.msra.gmra.mxu1 %vm1361_vm2, %v6737_v1 }
 0x533   :  { %4925 = vmatprep.mubr.msk.f32.mxu1 %vm1361_vm2, %v6732_v61 }
 0x5f2   :  { %v4885_v9 = vpop.f32.mrf.mxu1 }
 0x5f3   :  { %v1440_v16 = vadd.f32 %v4885_v9, %v4363_v8 }
 0x5f4   :  { %v1434_v17 = vpop.f32.mrf.mxu1 }
 0x5f5   :  { %v1448_v18 = vadd.f32 %v1446_v14, %v1440_v16  ;;  %v1435_v21 = vadd.f32 %v4363_v8, %v1434_v17  ;;  %v4369_v16 = vld [vmem:[%s7313_s23] ss:$0 sm:$0xff]  ;;  %s7340_s23 = sld [smem:[#allocation76_spill]] }
 0x5f7   :  { %v4367_v22 = vmul.f32 -1.442695, %v1448_v18  ;;  %v1447_v23 = vadd.f32 %v1446_v14, %v1435_v21 }
 0x5f9   :  { %5599 = vpow2.f32 %v4367_v22  ;;  %v4366_v24 = vmul.f32 -1.442695, %v1447_v23  ;;  %v6772_v22 = vpop.f32.mrf.mxu0 }
 0x5fb   :  { %5601 = vpow2.f32 %v4366_v24 }
 0x606   :  { %v5600_v25 = vpop.eup %5599 }
 0x607   :  { %v1456_v26 = vadd.f32 1.0, %v5600_v25 }
 0x608   :  { %v5602_v27 = vpop.eup %5601 }
 0x609   :  { %5603 = vrcp.f32 %v1456_v26  ;;  %v1455_v32 = vadd.f32 1.0, %v5602_v27 }
 0x60b   :  { %5605 = vrcp.f32 %v1455_v32  ;;  %v717_v32 = vrot.slane %v6747_v3, %v716_v7 }
 0x616   :  { %v5604_v28 = vpop.eup %5603 }
 0x617   :  { %v1462_v29 = vmul.f32 %v5604_v28, %v1448_v18  ;;  %v829_v28 = vadd.f32 %v6694_v10, %v717_v32 }
 0x618   :  { %v5606_v30 = vpop.eup %5605 }
 0x619   :  { %1465 = vadd.xlane.f32.xlu1 %v1462_v29  ;;  %v1461_v31 = vmul.f32 %v5606_v30, %v1447_v23  ;;  %v6774_v23 = vpop.f32.mrf.mxu0 }
 0x61b   :  { %1463 = vadd.xlane.f32.xlu0 %v1461_v31  ;;  %v6776_v24 = vpop.f32.mrf.mxu0 }
 0x61d   :  { %v6778_v25 = vpop.f32.mrf.mxu0 }
 0x6a2   :  { %v1466_v36 = vpop.xlane.xlu1 %1465 }
 0x6a3   :  { %v1468_v37 = vmul.f32 0.0078125, %v1466_v36 }
 0x6a4   :  { %v1464_v38 = vpop.xlane.xlu0 %1463 }
 0x6a5   :  { %v1470_v39 = vsub.f32 %v1462_v29, %v1468_v37  ;;  %v1467_v40 = vmul.f32 0.0078125, %v1464_v38  ;;  %v4370_v29 = vld [vmem:[%s7314_s4] ss:$0 sm:$0xff]  ;;  %s7341_s4 = sld [smem:[#allocation75_spill]] }
 0x6a7   :  { %v1469_v41 = vsub.f32 %v1461_v31, %v1467_v40  ;;  %v1472_v42 = vmul.f32 %v1470_v39, %v1470_v39  ;;  %v1660_v31 = vrot.slane %v829_v28, %v6744_v2 }
 0x6a9   :  { %1475 = vadd.xlane.f32.xlu1 %v1472_v42  ;;  %v1471_v43 = vmul.f32 %v1469_v41, %v1469_v41 }
 0x6ab   :  { %1473 = vadd.xlane.f32.xlu0 %v1471_v43 }
 0x732   :  { %v1476_v56 = vpop.xlane.xlu1 %1475 }
 0x733   :  { %v1478_v57 = vmul.f32 0.0078125, %v1476_v56  ;;  %v1693_v56 = vld [vmem:[%s7315_s26 + $0x60] sm:$0xff] }
 0x734   :  { %v1474_v58 = vpop.xlane.xlu0 %1473 }
 0x735   :  { %v1480_v59 = vadd.f32 1e-05, %v1478_v57  ;;  %v1477_v60 = vmul.f32 0.0078125, %v1474_v58  ;;  %v1692_v57 = vld [vmem:[%s7315_s26 + $0x58] sm:$0xff]  ;;  %v1691_v58 = vld [vmem:[%s7315_s26 + $0x50] sm:$0xff] }
 0x737   :  { %5607 = vrsqrt.f32 %v1480_v59  ;;  %v1479_v62 = vadd.f32 1e-05, %v1477_v60  ;;  %v1690_v59 = vld [vmem:[%s7315_s26 + $0x48] sm:$0xff]  ;;  %v1689_v60 = vld [vmem:[%s7315_s26 + $0x40] sm:$0xff] }
 0x739   :  { %5609 = vrsqrt.f32 %v1479_v62  ;;  %v1688_v62 = vld [vmem:[%s7315_s26 + $0x38] sm:$0xff] }
 0x744   :  { %v5608_v63 = vpop.eup %5607 }
 0x745   :  { %v1484_v5 = vmul.f32 %v5608_v63, %v1470_v39  ;;  %v1687_v63 = vld [vmem:[%s7315_s26 + $0x30] sm:$0xff] }
 0x746   :  { %v5610_v8 = vpop.eup %5609 }
 0x747   :  { %v1483_v9 = vmul.f32 %v5610_v8, %v1469_v41  ;;  %v1492_v14 = vmul.f32 %v4368_v4, %v1484_v5  ;;  %v1685_v5 = vld [vmem:[%s7315_s26 + $0x20] sm:$0xff]  ;;  %v1684_v8 = vld [vmem:[%s7315_s26 + $0x18] sm:$0xff] }
 0x749   :  { %v1491_v17 = vmul.f32 %v4368_v4, %v1483_v9  ;;  %v1500_v21 = vadd.f32 %v4369_v16, %v1492_v14  ;;  %v1686_v4 = vld [vmem:[%s7315_s26 + $0x28] sm:$0xff]  ;;  %v1683_v9 = vld [vmem:[%s7315_s26 + $0x10] sm:$0xff] }
 0x74a   :  { %v1682_v14 = vld [vmem:[%s7315_s26 + $0x8] sm:$0xff] }
 0x74b   :  { %v1499_v18 = vadd.f32 %v4369_v16, %v1491_v17  ;;  %v1681_v16 = vld [vmem:[%s7315_s26] sm:$0xff]  ;;  %s7344_s26 = sld [smem:[#allocation81_spill]] }
 0x74d   :  { %4918 = vmatprep.mubr.f32.mxu0 %v1499_v18 }
 0x74e   :  { %4919 = vmatmul.mubr.f32.vlgmr.msra.gmra.mxu0 %v1500_v21 }
 0x80e   :  { %v4920_v26 = vpop.f32.mrf.mxu0 }
 0x80f   :  { %4921 = vmatprep.subr.mxu1 %v4920_v26 }
 0x810   :  { %v1567_v27 = vpop.f32.mrf.mxu0  ;;  %4922 = vmatpush3.msra.mxu1 %v4920_v26 }
 0x811   :  { %4923 = vmatprep.subr.mxu1 %v1567_v27 }
 0x812   :  { %4924 = vmatpush3.msra.mxu1 %v1567_v27 }
 0x813   :  { %4926 = vmatmul.mubr.msk.f32.vlgmr.msra.gmra.mxu1 %vm1361_vm2, %v6737_v1  ;;  %4928 = vmatprep.subr.mxu1 %v1696_v47 }
 0x814   :  { %4929 = vmatpush3.msra.mxu1 %v1696_v47 }
 0x815   :  { %4930 = vmatprep.subr.mxu1 %v1695_v48 }
 0x816   :  { %4931 = vmatpush3.msra.mxu1 %v1695_v48 }
 0x817   :  { %4932 = vmatprep.subr.mxu1 %v1694_v49 }
 0x818   :  { %4933 = vmatpush3.msra.mxu1 %v1694_v49 }
 0x819   :  { %4934 = vmatprep.subr.mxu1 %v1693_v56 }
 0x81a   :  { %4935 = vmatpush3.msra.mxu1 %v1693_v56 }
 0x81b   :  { %4936 = vmatprep.subr.mxu1 %v1692_v57 }
 0x81c   :  { %4937 = vmatpush3.msra.mxu1 %v1692_v57 }
 0x81d   :  { %4938 = vmatprep.subr.mxu1 %v1691_v58 }
 0x81e   :  { %4939 = vmatpush3.msra.mxu1 %v1691_v58 }
 0x81f   :  { %4940 = vmatprep.subr.mxu1 %v1690_v59 }
 0x820   :  { %4941 = vmatpush3.msra.mxu1 %v1690_v59 }
 0x821   :  { %4942 = vmatprep.subr.mxu1 %v1689_v60 }
 0x822   :  { %4943 = vmatpush3.msra.mxu1 %v1689_v60  ;;  %v1715_v60 = vld [vmem:[%s7319_s9 + $0x78] sm:$0xff] }
 0x823   :  { %4944 = vmatprep.subr.mxu1 %v1688_v62  ;;  %4970 = vmatprep.subr.mxu0 %v1715_v60 }
 0x824   :  { %4945 = vmatpush3.msra.mxu1 %v1688_v62  ;;  %v1714_v62 = vld [vmem:[%s7319_s9 + $0x70] sm:$0xff]  ;;  %4971 = vmatpush3.msra.mxu0 %v1715_v60 }
 0x825   :  { %4946 = vmatprep.subr.mxu1 %v1687_v63  ;;  %4972 = vmatprep.subr.mxu0 %v1714_v62 }
 0x826   :  { %4947 = vmatpush3.msra.mxu1 %v1687_v63  ;;  %v1713_v63 = vld [vmem:[%s7319_s9 + $0x68] sm:$0xff]  ;;  %4973 = vmatpush3.msra.mxu0 %v1714_v62 }
 0x827   :  { %4948 = vmatprep.subr.mxu1 %v1686_v4  ;;  %4974 = vmatprep.subr.mxu0 %v1713_v63 }
 0x828   :  { %4949 = vmatpush3.msra.mxu1 %v1686_v4  ;;  %4975 = vmatpush3.msra.mxu0 %v1713_v63 }
 0x829   :  { %4950 = vmatprep.subr.mxu1 %v1685_v5 }
 0x82a   :  { %4951 = vmatpush3.msra.mxu1 %v1685_v5 }
 0x82b   :  { %4952 = vmatprep.subr.mxu1 %v1684_v8 }
 0x82c   :  { %4953 = vmatpush3.msra.mxu1 %v1684_v8 }
 0x82d   :  { %4954 = vmatprep.subr.mxu1 %v1683_v9 }
 0x82e   :  { %4955 = vmatpush3.msra.mxu1 %v1683_v9 }
 0x82f   :  { %4956 = vmatprep.subr.mxu1 %v1682_v14 }
 0x830   :  { %4957 = vmatpush3.msra.mxu1 %v1682_v14 }
 0x831   :  { %4958 = vmatprep.subr.mxu1 %v1681_v16 }
 0x832   :  { %4959 = vmatpush3.msra.mxu1 %v1681_v16 }
 0x8d3   :  { %v4927_v30 = vpop.f32.mrf.mxu1 }
 0x8d4   :  { %v1654_v33 = vadd.f32 %v4927_v30, %v4370_v29 }
 0x8d5   :  { %v1648_v34 = vpop.f32.mrf.mxu1 }
 0x8d6   :  { %v1662_v35 = vadd.f32 %v1660_v31, %v1654_v33  ;;  %v1649_v36 = vadd.f32 %v4370_v29, %v1648_v34  ;;  %v4375_v29 = vld [vmem:[%s7316_s28] ss:$0 sm:$0xff] }
 0x8d8   :  { %v4374_v37 = vmul.f32 -1.442695, %v1662_v35  ;;  %v1661_v38 = vadd.f32 %v1660_v31, %v1649_v36 }
 0x8da   :  { %5611 = vpow2.f32 %v4374_v37  ;;  %v4373_v39 = vmul.f32 -1.442695, %v1661_v38 }
 0x8dc   :  { %5613 = vpow2.f32 %v4373_v39 }
 0x8e7   :  { %v5612_v40 = vpop.eup %5611 }
 0x8e8   :  { %v1670_v41 = vadd.f32 1.0, %v5612_v40 }
 0x8e9   :  { %v5614_v7 = vpop.eup %5613 }
 0x8ea   :  { %5615 = vrcp.f32 %v1670_v41  ;;  %v1669_v10 = vadd.f32 1.0, %v5614_v7  ;;  %v720_v41 = vsub.s32 2, %v6686_v6 }
 0x8ec   :  { %5617 = vrcp.f32 %v1669_v10  ;;  %v721_v7 = vrot.slane %v6747_v3, %v720_v41 }
 0x8ee   :  { %v898_v10 = vadd.f32 %v6772_v22, %v721_v7 }
 0x8f7   :  { %v5616_v42 = vpop.eup %5615 }
 0x8f8   :  { %v1676_v43 = vmul.f32 %v5616_v42, %v1662_v35  ;;  %v4376_v35 = vld [vmem:[%s7317_s1] ss:$0 sm:$0xff] }
 0x8f9   :  { %v5618_v0 = vpop.eup %5617  ;;  %v4377_v42 = vld [vmem:[%s7318_s2] ss:$0 sm:$0xff] }
 0x8fa   :  { %v6789_v44 = vadd.f32 %v1676_v43, %v6708_v20  ;;  %v1675_v45 = vmul.f32 %v5618_v0, %v1661_v38  ;;  %v1914_v0 = vrot.slane %v898_v10, %v6744_v2 }
 0x8fc   :  { %v6792_v46 = vadd.f32 %v1675_v45, %v6705_v19  ;;  %1719 = vadd.xlane.f32.xlu1 %v6789_v44 }
 0x8fe   :  { %1717 = vadd.xlane.f32.xlu0 %v6792_v46 }
 0x985   :  { %v6799_v20 = vpop.xlane.xlu1 %1719 }
 0x986   :  { %v1722_v19 = vmul.f32 0.0078125, %v6799_v20 }
 0x987   :  { %v6802_v50 = vpop.xlane.xlu0 %1717 }
 0x988   :  { %v1721_v51 = vmul.f32 0.0078125, %v6802_v50  ;;  %v1724_v52 = vsub.f32 %v6789_v44, %v1722_v19 }
 0x98a   :  { %v1726_v53 = vmul.f32 %v1724_v52, %v1724_v52  ;;  %v1723_v54 = vsub.f32 %v6792_v46, %v1721_v51 }
 0x98c   :  { %1729 = vadd.xlane.f32.xlu1 %v1726_v53  ;;  %v1725_v55 = vmul.f32 %v1723_v54, %v1723_v54 }
 0x98e   :  { %1727 = vadd.xlane.f32.xlu0 %v1725_v55 }
 0xa15   :  { %v1730_v17 = vpop.xlane.xlu1 %1729 }
 0xa16   :  { %v1732_v18 = vmul.f32 0.0078125, %v1730_v17 }
 0xa17   :  { %v1728_v21 = vpop.xlane.xlu0 %1727 }
 0xa18   :  { %v1734_v26 = vadd.f32 1e-05, %v1732_v18  ;;  %v1731_v27 = vmul.f32 0.0078125, %v1728_v21  ;;  %v1712_v21 = vld [vmem:[%s7319_s9 + $0x60] sm:$0xff] }
 0xa19   :  { %4976 = vmatprep.subr.mxu0 %v1712_v21 }
 0xa1a   :  { %5619 = vrsqrt.f32 %v1734_v26  ;;  %v1733_v32 = vadd.f32 1e-05, %v1731_v27  ;;  %4977 = vmatpush3.msra.mxu0 %v1712_v21  ;;  %v1711_v26 = vld [vmem:[%s7319_s9 + $0x58] sm:$0xff]  ;;  %v1710_v27 = vld [vmem:[%s7319_s9 + $0x50] sm:$0xff] }
 0xa1b   :  { %4978 = vmatprep.subr.mxu0 %v1711_v26 }
 0xa1c   :  { %5621 = vrsqrt.f32 %v1733_v32  ;;  %4979 = vmatpush3.msra.mxu0 %v1711_v26  ;;  %v1709_v32 = vld [vmem:[%s7319_s9 + $0x48] sm:$0xff] }
 0xa1d   :  { %4980 = vmatprep.subr.mxu0 %v1710_v27 }
 0xa1e   :  { %4981 = vmatpush3.msra.mxu0 %v1710_v27 }
 0xa1f   :  { %4982 = vmatprep.subr.mxu0 %v1709_v32 }
 0xa20   :  { %4983 = vmatpush3.msra.mxu0 %v1709_v32 }
 0xa27   :  { %v5620_v28 = vpop.eup %5619 }
 0xa28   :  { %v1738_v30 = vmul.f32 %v5620_v28, %v1724_v52  ;;  %v1708_v28 = vld [vmem:[%s7319_s9 + $0x40] sm:$0xff] }
 0xa29   :  { %v5622_v31 = vpop.eup %5621  ;;  %4984 = vmatprep.subr.mxu0 %v1708_v28 }
 0xa2a   :  { %v1737_v33 = vmul.f32 %v5622_v31, %v1723_v54  ;;  %v1746_v34 = vmul.f32 %v4375_v29, %v1738_v30  ;;  %4985 = vmatpush3.msra.mxu0 %v1708_v28  ;;  %v1706_v30 = vld [vmem:[%s7319_s9 + $0x30] sm:$0xff]  ;;  %v1705_v31 = vld [vmem:[%s7319_s9 + $0x28] sm:$0xff] }
 0xa2c   :  { %v1745_v36 = vmul.f32 %v4375_v29, %v1737_v33  ;;  %v1754_v38 = vadd.f32 %v4376_v35, %v1746_v34  ;;  %v1707_v29 = vld [vmem:[%s7319_s9 + $0x38] sm:$0xff]  ;;  %v1704_v33 = vld [vmem:[%s7319_s9 + $0x20] sm:$0xff] }
 0xa2d   :  { %4986 = vmatprep.subr.mxu0 %v1707_v29  ;;  %v1703_v34 = vld [vmem:[%s7319_s9 + $0x18] sm:$0xff] }
 0xa2e   :  { %v1753_v37 = vadd.f32 %v4376_v35, %v1745_v36  ;;  %4987 = vmatpush3.msra.mxu0 %v1707_v29  ;;  %v1702_v35 = vld [vmem:[%s7319_s9 + $0x10] sm:$0xff]  ;;  %v1701_v36 = vld [vmem:[%s7319_s9 + $0x8] sm:$0xff]  ;;  %v2164_v29 = vld [vmem:[%s7323_s14 + $0x78] sm:$0xff] }
 0xa2f   :  { %4988 = vmatprep.subr.mxu0 %v1706_v30 }
 0xa30   :  { %4960 = vmatprep.mubr.f32.mxu1 %v1753_v37  ;;  %4989 = vmatpush3.msra.mxu0 %v1706_v30  ;;  %v1700_v37 = vld [vmem:[%s7319_s9] sm:$0xff]  ;;  %v2163_v30 = vld [vmem:[%s7323_s14 + $0x70] sm:$0xff] }
 0xa31   :  { %4961 = vmatmul.mubr.f32.vlgmr.msra.gmra.mxu1 %v1754_v38  ;;  %4990 = vmatprep.subr.mxu0 %v1705_v31 }
 0xa32   :  { %4967 = vmatprep.mubr.msk.f32.mxu1 %vm1361_vm2, %v6732_v61  ;;  %4991 = vmatpush3.msra.mxu0 %v1705_v31  ;;  %v2162_v31 = vld [vmem:[%s7323_s14 + $0x68] sm:$0xff] }
 0xa33   :  { %4992 = vmatprep.subr.mxu0 %v1704_v33 }
 0xa34   :  { %4993 = vmatpush3.msra.mxu0 %v1704_v33 }
 0xa35   :  { %4994 = vmatprep.subr.mxu0 %v1703_v34 }
 0xa36   :  { %4995 = vmatpush3.msra.mxu0 %v1703_v34 }
 0xa37   :  { %4996 = vmatprep.subr.mxu0 %v1702_v35 }
 0xa38   :  { %4997 = vmatpush3.msra.mxu0 %v1702_v35 }
 0xa39   :  { %4998 = vmatprep.subr.mxu0 %v1701_v36 }
 0xa3a   :  { %4999 = vmatpush3.msra.mxu0 %v1701_v36 }
 0xa3b   :  { %5000 = vmatprep.subr.mxu0 %v1700_v37 }
 0xa3c   :  { %5001 = vmatpush3.msra.mxu0 %v1700_v37 }
 0xaf1   :  { %v4962_v39 = vpop.f32.mrf.mxu1 }
 0xaf2   :  { %4963 = vmatprep.subr.mxu1 %v4962_v39 }
 0xaf3   :  { %v1821_v40 = vpop.f32.mrf.mxu1  ;;  %4964 = vmatpush3.msra.mxu1 %v4962_v39 }
 0xaf4   :  { %4965 = vmatprep.subr.mxu1 %v1821_v40 }
 0xaf5   :  { %4966 = vmatpush3.msra.mxu1 %v1821_v40 }
 0xaf6   :  { %4968 = vmatmul.mubr.msk.f32.vlgmr.msra.gmra.mxu1 %vm1361_vm2, %v6737_v1 }
 0xaf7   :  { %5009 = vmatprep.mubr.msk.f32.mxu1 %vm1361_vm2, %v6732_v61 }
 0xbb6   :  { %v4969_v43 = vpop.f32.mrf.mxu1 }
 0xbb7   :  { %v1908_v45 = vadd.f32 %v4969_v43, %v4377_v42  ;;  %v4382_v43 = vld [vmem:[%s7320_s30] ss:$0 sm:$0xff] }
 0xbb8   :  { %v1902_v47 = vpop.f32.mrf.mxu1 }
 0xbb9   :  { %v1916_v48 = vadd.f32 %v1914_v0, %v1908_v45  ;;  %v1903_v49 = vadd.f32 %v4377_v42, %v1902_v47 }
 0xbbb   :  { %v4381_v19 = vmul.f32 -1.442695, %v1916_v48  ;;  %v1915_v51 = vadd.f32 %v1914_v0, %v1903_v49  ;;  %v4383_v49 = vld [vmem:[%s7321_s7] ss:$0 sm:$0xff] }
 0xbbd   :  { %5623 = vpow2.f32 %v4381_v19  ;;  %v4380_v52 = vmul.f32 -1.442695, %v1915_v51 }
 0xbbf   :  { %5625 = vpow2.f32 %v4380_v52 }
 0xbca   :  { %v5624_v53 = vpop.eup %5623 }
 0xbcb   :  { %v1924_v54 = vadd.f32 1.0, %v5624_v53 }
 0xbcc   :  { %v5626_v55 = vpop.eup %5625 }
 0xbcd   :  { %5627 = vrcp.f32 %v1924_v54  ;;  %v1923_v22 = vadd.f32 1.0, %v5626_v55  ;;  %v724_v55 = vsub.s32 3, %v6686_v6 }
 0xbcf   :  { %5629 = vrcp.f32 %v1923_v22  ;;  %v725_v22 = vrot.slane %v6747_v3, %v724_v55 }
 0xbda   :  { %v5628_v56 = vpop.eup %5627 }
 0xbdb   :  { %v1930_v57 = vmul.f32 %v5628_v56, %v1916_v48  ;;  %v900_v56 = vadd.f32 %v6774_v23, %v725_v22 }
 0xbdc   :  { %v5630_v58 = vpop.eup %5629 }
 0xbdd   :  { %1933 = vadd.xlane.f32.xlu1 %v1930_v57  ;;  %v1929_v59 = vmul.f32 %v5630_v58, %v1915_v51 }
 0xbdf   :  { %1931 = vadd.xlane.f32.xlu0 %v1929_v59 }
 0xc66   :  { %v1934_v4 = vpop.xlane.xlu1 %1933 }
 0xc67   :  { %v1936_v5 = vmul.f32 0.0078125, %v1934_v4 }
 0xc68   :  { %v1932_v8 = vpop.xlane.xlu0 %1931 }
 0xc69   :  { %v1938_v9 = vsub.f32 %v1930_v57, %v1936_v5  ;;  %v1935_v14 = vmul.f32 0.0078125, %v1932_v8  ;;  %v4384_v57 = vld [vmem:[%s7322_s24] ss:$0 sm:$0xff] }
 0xc6b   :  { %v1937_v16 = vsub.f32 %v1929_v59, %v1935_v14  ;;  %v1940_v17 = vmul.f32 %v1938_v9, %v1938_v9  ;;  %v2128_v59 = vrot.slane %v900_v56, %v6744_v2 }
 0xc6d   :  { %1943 = vadd.xlane.f32.xlu1 %v1940_v17  ;;  %v1939_v18 = vmul.f32 %v1937_v16, %v1937_v16 }
 0xc6f   :  { %1941 = vadd.xlane.f32.xlu0 %v1939_v18 }
 0xcf6   :  { %v1944_v38 = vpop.xlane.xlu1 %1943 }
 0xcf7   :  { %v1946_v39 = vmul.f32 0.0078125, %v1944_v38 }
 0xcf8   :  { %v1942_v40 = vpop.xlane.xlu0 %1941 }
 0xcf9   :  { %v1948_v41 = vadd.f32 1e-05, %v1946_v39  ;;  %v1945_v7 = vmul.f32 0.0078125, %v1942_v40 }
 0xcfb   :  { %5631 = vrsqrt.f32 %v1948_v41  ;;  %v1947_v10 = vadd.f32 1e-05, %v1945_v7  ;;  %v2161_v41 = vld [vmem:[%s7323_s14 + $0x60] sm:$0xff]  ;;  %v2160_v7 = vld [vmem:[%s7323_s14 + $0x58] sm:$0xff] }
 0xcfd   :  { %5633 = vrsqrt.f32 %v1947_v10  ;;  %v2159_v10 = vld [vmem:[%s7323_s14 + $0x50] sm:$0xff] }
 0xd08   :  { %v5632_v42 = vpop.eup %5631 }
 0xd09   :  { %v1952_v0 = vmul.f32 %v5632_v42, %v1938_v9  ;;  %v2158_v42 = vld [vmem:[%s7323_s14 + $0x48] sm:$0xff] }
 0xd0a   :  { %v5634_v45 = vpop.eup %5633 }
 0xd0b   :  { %v1951_v47 = vmul.f32 %v5634_v45, %v1937_v16  ;;  %v1960_v48 = vmul.f32 %v4382_v43, %v1952_v0  ;;  %v2156_v0 = vld [vmem:[%s7323_s14 + $0x38] sm:$0xff]  ;;  %v2155_v45 = vld [vmem:[%s7323_s14 + $0x30] sm:$0xff] }
 0xd0d   :  { %v1959_v19 = vmul.f32 %v4382_v43, %v1951_v47  ;;  %v1968_v52 = vadd.f32 %v4383_v49, %v1960_v48  ;;  %v2157_v43 = vld [vmem:[%s7323_s14 + $0x40] sm:$0xff]  ;;  %v2154_v47 = vld [vmem:[%s7323_s14 + $0x28] sm:$0xff] }
 0xd0e   :  { %v2153_v48 = vld [vmem:[%s7323_s14 + $0x20] sm:$0xff] }
 0xd0f   :  { %v1967_v51 = vadd.f32 %v4383_v49, %v1959_v19  ;;  %v2152_v49 = vld [vmem:[%s7323_s14 + $0x18] sm:$0xff]  ;;  %v2151_v19 = vld [vmem:[%s7323_s14 + $0x10] sm:$0xff] }
 0xd11   :  { %5002 = vmatprep.mubr.f32.mxu0 %v1967_v51  ;;  %v2150_v51 = vld [vmem:[%s7323_s14 + $0x8] sm:$0xff] }
 0xd12   :  { %5003 = vmatmul.mubr.f32.vlgmr.msra.gmra.mxu0 %v1968_v52  ;;  %v2149_v52 = vld [vmem:[%s7323_s14] sm:$0xff] }
 0xd13   :  { %5051 = vmatprep.mubr.msk.f32.mxu0 %vm1361_vm2, %v6732_v61 }
 0xdd2   :  { %v5004_v53 = vpop.f32.mrf.mxu0 }
 0xdd3   :  { %5005 = vmatprep.subr.mxu1 %v5004_v53 }
 0xdd4   :  { %v2035_v54 = vpop.f32.mrf.mxu0  ;;  %5006 = vmatpush3.msra.mxu1 %v5004_v53 }
 0xdd5   :  { %5007 = vmatprep.subr.mxu1 %v2035_v54 }
 0xdd6   :  { %5008 = vmatpush3.msra.mxu1 %v2035_v54 }
 0xdd7   :  { %5010 = vmatmul.mubr.msk.f32.vlgmr.msra.gmra.mxu1 %vm1361_vm2, %v6737_v1  ;;  %5012 = vmatprep.subr.mxu1 %v2164_v29 }
 0xdd8   :  { %5013 = vmatpush3.msra.mxu1 %v2164_v29 }
 0xdd9   :  { %5014 = vmatprep.subr.mxu1 %v2163_v30 }
 0xdda   :  { %5015 = vmatpush3.msra.mxu1 %v2163_v30 }
 0xddb   :  { %5016 = vmatprep.subr.mxu1 %v2162_v31 }
 0xddc   :  { %5017 = vmatpush3.msra.mxu1 %v2162_v31 }
 0xddd   :  { %5018 = vmatprep.subr.mxu1 %v2161_v41 }
 0xdde   :  { %5019 = vmatpush3.msra.mxu1 %v2161_v41 }
 0xddf   :  { %5020 = vmatprep.subr.mxu1 %v2160_v7 }
 0xde0   :  { %5021 = vmatpush3.msra.mxu1 %v2160_v7 }
 0xde1   :  { %5022 = vmatprep.subr.mxu1 %v2159_v10 }
 0xde2   :  { %5023 = vmatpush3.msra.mxu1 %v2159_v10 }
 0xde3   :  { %5024 = vmatprep.subr.mxu1 %v2158_v42 }
 0xde4   :  { %5025 = vmatpush3.msra.mxu1 %v2158_v42  ;;  %v2183_v42 = vld [vmem:[%s7326_s21 + $0x78] sm:$0xff] }
 0xde5   :  { %5026 = vmatprep.subr.mxu1 %v2157_v43 }
 0xde6   :  { %5027 = vmatpush3.msra.mxu1 %v2157_v43  ;;  %v2182_v43 = vld [vmem:[%s7326_s21 + $0x70] sm:$0xff] }
 0xde7   :  { %5028 = vmatprep.subr.mxu1 %v2156_v0 }
 0xde8   :  { %5029 = vmatpush3.msra.mxu1 %v2156_v0  ;;  %v2181_v0 = vld [vmem:[%s7326_s21 + $0x68] sm:$0xff] }
 0xde9   :  { %5030 = vmatprep.subr.mxu1 %v2155_v45 }
 0xdea   :  { %5031 = vmatpush3.msra.mxu1 %v2155_v45 }
 0xdeb   :  { %5032 = vmatprep.subr.mxu1 %v2154_v47 }
 0xdec   :  { %5033 = vmatpush3.msra.mxu1 %v2154_v47 }
 0xded   :  { %5034 = vmatprep.subr.mxu1 %v2153_v48 }
 0xdee   :  { %5035 = vmatpush3.msra.mxu1 %v2153_v48 }
 0xdef   :  { %5036 = vmatprep.subr.mxu1 %v2152_v49 }
 0xdf0   :  { %5037 = vmatpush3.msra.mxu1 %v2152_v49 }
 0xdf1   :  { %5038 = vmatprep.subr.mxu1 %v2151_v19 }
 0xdf2   :  { %5039 = vmatpush3.msra.mxu1 %v2151_v19 }
 0xdf3   :  { %5040 = vmatprep.subr.mxu1 %v2150_v51 }
 0xdf4   :  { %5041 = vmatpush3.msra.mxu1 %v2150_v51 }
 0xdf5   :  { %5042 = vmatprep.subr.mxu1 %v2149_v52 }
 0xdf6   :  { %5043 = vmatpush3.msra.mxu1 %v2149_v52 }
 0xe97   :  { %v5011_v58 = vpop.f32.mrf.mxu1 }
 0xe98   :  { %v2122_v60 = vadd.f32 %v5011_v58, %v4384_v57 }
 0xe99   :  { %v2116_v62 = vpop.f32.mrf.mxu1 }
 0xe9a   :  { %v2130_v63 = vadd.f32 %v2128_v59, %v2122_v60  ;;  %v2117_v4 = vadd.f32 %v4384_v57, %v2116_v62 }
 0xe9c   :  { %v4388_v5 = vmul.f32 -1.442695, %v2130_v63  ;;  %v2129_v8 = vadd.f32 %v2128_v59, %v2117_v4  ;;  %v4389_v59 = vld [vmem:[%s7324_s20] ss:$0 sm:$0xff] }
 0xe9e   :  { %5635 = vpow2.f32 %v4388_v5  ;;  %v4387_v9 = vmul.f32 -1.442695, %v2129_v8  ;;  %v4390_v5 = vld [vmem:[%s7325_s10] ss:$0 sm:$0xff] }
 0xea0   :  { %5637 = vpow2.f32 %v4387_v9 }
 0xeab   :  { %v5636_v14 = vpop.eup %5635 }
 0xeac   :  { %v2138_v16 = vadd.f32 1.0, %v5636_v14 }
 0xead   :  { %v5638_v17 = vpop.eup %5637 }
 0xeae   :  { %5639 = vrcp.f32 %v2138_v16  ;;  %v2137_v23 = vadd.f32 1.0, %v5638_v17 }
 0xeb0   :  { %5641 = vrcp.f32 %v2137_v23  ;;  %v728_v23 = vsub.s32 4, %v6686_v6 }
 0xebb   :  { %v5640_v18 = vpop.eup %5639 }
 0xebc   :  { %v2144_v21 = vmul.f32 %v5640_v18, %v2130_v63  ;;  %v729_v18 = vrot.slane %v6747_v3, %v728_v23 }
 0xebd   :  { %v5642_v26 = vpop.eup %5641 }
 0xebe   :  { %v6861_v27 = vadd.f32 %v2144_v21, %v6789_v44  ;;  %v2143_v32 = vmul.f32 %v5642_v26, %v2129_v8  ;;  %v969_v21 = vadd.f32 %v6696_v11, %v729_v18  ;;  %v4391_v26 = vld [vmem:[#allocation3] ss:$0 sm:$0xff] }
 0xec0   :  { %v6864_v28 = vadd.f32 %v2143_v32, %v6792_v46  ;;  %2187 = vadd.xlane.f32.xlu1 %v6861_v27  ;;  %v2382_v29 = vrot.slane %v969_v21, %v6744_v2 }
 0xec2   :  { %2185 = vadd.xlane.f32.xlu0 %v6864_v28 }
 0xf49   :  { %v6871_v33 = vpop.xlane.xlu1 %2187 }
 0xf4a   :  { %v2190_v34 = vmul.f32 0.0078125, %v6871_v33 }
 0xf4b   :  { %v6874_v35 = vpop.xlane.xlu0 %2185 }
 0xf4c   :  { %v2189_v36 = vmul.f32 0.0078125, %v6874_v35  ;;  %v2192_v37 = vsub.f32 %v6861_v27, %v2190_v34 }
 0xf4e   :  { %v2194_v38 = vmul.f32 %v2192_v37, %v2192_v37  ;;  %v2191_v39 = vsub.f32 %v6864_v28, %v2189_v36 }
 0xf50   :  { %2197 = vadd.xlane.f32.xlu1 %v2194_v38  ;;  %v2193_v40 = vmul.f32 %v2191_v39, %v2191_v39 }
 0xf52   :  { %2195 = vadd.xlane.f32.xlu0 %v2193_v40 }
 0xfd9   :  { %v2198_v53 = vpop.xlane.xlu1 %2197 }
 0xfda   :  { %v2200_v54 = vmul.f32 0.0078125, %v2198_v53 }
 0xfdb   :  { %v2196_v55 = vpop.xlane.xlu0 %2195 }
 0xfdc   :  { %v2202_v22 = vadd.f32 1e-05, %v2200_v54  ;;  %v2199_v56 = vmul.f32 0.0078125, %v2196_v55  ;;  %v2180_v54 = vld [vmem:[%s7326_s21 + $0x60] sm:$0xff]  ;;  %v2179_v55 = vld [vmem:[%s7326_s21 + $0x58] sm:$0xff] }
 0xfde   :  { %5643 = vrsqrt.f32 %v2202_v22  ;;  %v2201_v57 = vadd.f32 1e-05, %v2199_v56  ;;  %v2178_v22 = vld [vmem:[%s7326_s21 + $0x50] sm:$0xff]  ;;  %v2177_v56 = vld [vmem:[%s7326_s21 + $0x48] sm:$0xff] }
 0xfe0   :  { %5645 = vrsqrt.f32 %v2201_v57  ;;  %v2176_v57 = vld [vmem:[%s7326_s21 + $0x40] sm:$0xff] }
 0xfeb   :  { %v5644_v58 = vpop.eup %5643 }
 0xfec   :  { %v2206_v60 = vmul.f32 %v5644_v58, %v2192_v37  ;;  %v2175_v58 = vld [vmem:[%s7326_s21 + $0x38] sm:$0xff] }
 0xfed   :  { %v5646_v62 = vpop.eup %5645 }
 0xfee   :  { %v2205_v63 = vmul.f32 %v5646_v62, %v2191_v39  ;;  %v2214_v4 = vmul.f32 %v4389_v59, %v2206_v60  ;;  %v2173_v60 = vld [vmem:[%s7326_s21 + $0x28] sm:$0xff]  ;;  %v2172_v62 = vld [vmem:[%s7326_s21 + $0x20] sm:$0xff] }
 0xff0   :  { %v2213_v8 = vmul.f32 %v4389_v59, %v2205_v63  ;;  %v2222_v14 = vadd.f32 %v4390_v5, %v2214_v4  ;;  %v2174_v59 = vld [vmem:[%s7326_s21 + $0x30] sm:$0xff]  ;;  %v2171_v63 = vld [vmem:[%s7326_s21 + $0x18] sm:$0xff] }
 0xff1   :  { %v2170_v4 = vld [vmem:[%s7326_s21 + $0x10] sm:$0xff] }
 0xff2   :  { %v2221_v9 = vadd.f32 %v4390_v5, %v2213_v8  ;;  %v2169_v5 = vld [vmem:[%s7326_s21 + $0x8] sm:$0xff]  ;;  %v2168_v8 = vld [vmem:[%s7326_s21] sm:$0xff] }
 0xff4   :  { %5044 = vmatprep.mubr.f32.mxu1 %v2221_v9 }
 0xff5   :  { %5045 = vmatmul.mubr.f32.vlgmr.msra.gmra.mxu1 %v2222_v14 }
 0xff6   :  { %5093 = vmatprep.mubr.msk.f32.mxu1 %vm1361_vm2, %v6732_v61 }
0x10b5   :  { %v5046_v16 = vpop.f32.mrf.mxu1 }
0x10b6   :  { %5047 = vmatprep.subr.mxu0 %v5046_v16 }
0x10b7   :  { %v2289_v17 = vpop.f32.mrf.mxu1  ;;  %5048 = vmatpush3.msra.mxu0 %v5046_v16 }
0x10b8   :  { %5049 = vmatprep.subr.mxu0 %v2289_v17 }
0x10b9   :  { %5050 = vmatpush3.msra.mxu0 %v2289_v17 }
0x10ba   :  { %5052 = vmatmul.mubr.msk.f32.vlgmr.msra.gmra.mxu0 %vm1361_vm2, %v6737_v1  ;;  %5054 = vmatprep.subr.mxu0 %v2183_v42 }
0x10bb   :  { %5055 = vmatpush3.msra.mxu0 %v2183_v42 }
0x10bc   :  { %5056 = vmatprep.subr.mxu0 %v2182_v43 }
0x10bd   :  { %5057 = vmatpush3.msra.mxu0 %v2182_v43 }
0x10be   :  { %5058 = vmatprep.subr.mxu0 %v2181_v0 }
0x10bf   :  { %5059 = vmatpush3.msra.mxu0 %v2181_v0 }
0x10c0   :  { %5060 = vmatprep.subr.mxu0 %v2180_v54 }
0x10c1   :  { %5061 = vmatpush3.msra.mxu0 %v2180_v54 }
0x10c2   :  { %5062 = vmatprep.subr.mxu0 %v2179_v55 }
0x10c3   :  { %5063 = vmatpush3.msra.mxu0 %v2179_v55 }
0x10c4   :  { %5064 = vmatprep.subr.mxu0 %v2178_v22 }
0x10c5   :  { %5065 = vmatpush3.msra.mxu0 %v2178_v22 }
0x10c6   :  { %5066 = vmatprep.subr.mxu0 %v2177_v56 }
0x10c7   :  { %5067 = vmatpush3.msra.mxu0 %v2177_v56 }
0x10c8   :  { %5068 = vmatprep.subr.mxu0 %v2176_v57 }
0x10c9   :  { %5069 = vmatpush3.msra.mxu0 %v2176_v57 }
0x10ca   :  { %5070 = vmatprep.subr.mxu0 %v2175_v58 }
0x10cb   :  { %5071 = vmatpush3.msra.mxu0 %v2175_v58 }
0x10cc   :  { %5072 = vmatprep.subr.mxu0 %v2174_v59 }
0x10cd   :  { %5073 = vmatpush3.msra.mxu0 %v2174_v59  ;;  %v2650_v59 = vld [vmem:[%s7327_s29 + $0x78] sm:$0xff] }
0x10ce   :  { %5074 = vmatprep.subr.mxu0 %v2173_v60 }
0x10cf   :  { %5075 = vmatpush3.msra.mxu0 %v2173_v60  ;;  %v2634_v60 = vld [vmem:[%s7328_s3 + $0x78] sm:$0xff] }
0x10d0   :  { %5076 = vmatprep.subr.mxu0 %v2172_v62 }
0x10d1   :  { %5077 = vmatpush3.msra.mxu0 %v2172_v62 }
0x10d2   :  { %5078 = vmatprep.subr.mxu0 %v2171_v63 }
0x10d3   :  { %5079 = vmatpush3.msra.mxu0 %v2171_v63 }
0x10d4   :  { %5080 = vmatprep.subr.mxu0 %v2170_v4 }
0x10d5   :  { %5081 = vmatpush3.msra.mxu0 %v2170_v4 }
0x10d6   :  { %5082 = vmatprep.subr.mxu0 %v2169_v5 }
0x10d7   :  { %5083 = vmatpush3.msra.mxu0 %v2169_v5 }
0x10d8   :  { %5084 = vmatprep.subr.mxu0 %v2168_v8 }
0x10d9   :  { %5085 = vmatpush3.msra.mxu0 %v2168_v8 }
0x10da   :  { %5131 = vmatprep.subr.mxu0 %v2634_v60 }
0x117a   :  { %v5053_v32 = vpop.f32.mrf.mxu0 }
0x117b   :  { %v2376_v61 = vadd.f32 %v5053_v32, %v4391_v26 }
0x117c   :  { %v2370_v30 = vpop.f32.mrf.mxu0 }
0x117d   :  { %v2384_v31 = vadd.f32 %v2382_v29, %v2376_v61  ;;  %v2371_v34 = vadd.f32 %v4391_v26, %v2370_v30  ;;  %v4396_v26 = vld [vmem:[#allocation5] ss:$0 sm:$0xff] }
0x117f   :  { %v4395_v36 = vmul.f32 -1.442695, %v2384_v31  ;;  %v2383_v37 = vadd.f32 %v2382_v29, %v2371_v34 }
0x1181   :  { %5647 = vpow2.f32 %v4395_v36  ;;  %v4394_v1 = vmul.f32 -1.442695, %v2383_v37 }
0x1183   :  { %5649 = vpow2.f32 %v4394_v1 }
0x118e   :  { %v5648_v38 = vpop.eup %5647 }
0x118f   :  { %v2392_v3 = vadd.f32 1.0, %v5648_v38 }
0x1190   :  { %v5650_v39 = vpop.eup %5649 }
0x1191   :  { %5651 = vrcp.f32 %v2392_v3  ;;  %v2391_v11 = vadd.f32 1.0, %v5650_v39  ;;  %v6919_v3 = vld [vmem:[%s7309_s6 + $0x8] sm:$0xff]  ;;  %v732_v39 = vsub.s32 5, %v6686_v6 }
0x1193   :  { %5653 = vrcp.f32 %v2391_v11  ;;  %v6925_v11 = vld [vmem:[%s7304_s8] sm:$0xff] }
0x119e   :  { %v5652_v40 = vpop.eup %5651 }
0x119f   :  { %v2398_v41 = vmul.f32 %v5652_v40, %v2384_v31  ;;  %v4397_v31 = vld [vmem:[#allocation7] ss:$0 sm:$0xff]  ;;  %v733_v40 = vrot.slane %v6925_v11, %v732_v39  ;;  %v2628_v39 = vld [vmem:[%s7328_s3 + $0x48] sm:$0xff] }
0x11a0   :  { %v5654_v7 = vpop.eup %5653 }
0x11a1   :  { %2401 = vadd.xlane.f32.xlu1 %v2398_v41  ;;  %v2397_v10 = vmul.f32 %v5654_v7, %v2383_v37  ;;  %v4398_v7 = vld [vmem:[#allocation8] ss:$0 sm:$0xff] }
0x11a3   :  { %2399 = vadd.xlane.f32.xlu0 %v2397_v10 }
0x122a   :  { %v2402_v45 = vpop.xlane.xlu1 %2401 }
0x122b   :  { %v2404_v47 = vmul.f32 0.0078125, %v2402_v45 }
0x122c   :  { %v2400_v48 = vpop.xlane.xlu0 %2399 }
0x122d   :  { %v2406_v49 = vsub.f32 %v2398_v41, %v2404_v47  ;;  %v2403_v19 = vmul.f32 0.0078125, %v2400_v48  ;;  %v971_v41 = vadd.f32 %v6698_v12, %v733_v40  ;;  %v2643_v40 = vld [vmem:[%s7327_s29 + $0x40] sm:$0xff] }
0x122f   :  { %v2405_v51 = vsub.f32 %v2397_v10, %v2403_v19  ;;  %v2408_v52 = vmul.f32 %v2406_v49, %v2406_v49  ;;  %v2596_v42 = vrot.slane %v971_v41, %v6744_v2  ;;  %v2627_v41 = vld [vmem:[%s7328_s3 + $0x40] sm:$0xff] }
0x1231   :  { %2411 = vadd.xlane.f32.xlu1 %v2408_v52  ;;  %v2407_v53 = vmul.f32 %v2405_v51, %v2405_v51 }
0x1233   :  { %2409 = vadd.xlane.f32.xlu0 %v2407_v53 }
0x12ba   :  { %v2412_v9 = vpop.xlane.xlu1 %2411 }
0x12bb   :  { %v2414_v14 = vmul.f32 0.0078125, %v2412_v9 }
0x12bc   :  { %v2410_v16 = vpop.xlane.xlu0 %2409 }
0x12bd   :  { %v2416_v17 = vadd.f32 1e-05, %v2414_v14  ;;  %v2413_v23 = vmul.f32 0.0078125, %v2410_v16 }
0x12bf   :  { %5655 = vrsqrt.f32 %v2416_v17  ;;  %v2415_v18 = vadd.f32 1e-05, %v2413_v23 }
0x12c1   :  { %5657 = vrsqrt.f32 %v2415_v18 }
0x12cc   :  { %v5656_v21 = vpop.eup %5655 }
0x12cd   :  { %v2420_v32 = vmul.f32 %v5656_v21, %v2406_v49 }
0x12ce   :  { %v5658_v29 = vpop.eup %5657 }
0x12cf   :  { %v2419_v61 = vmul.f32 %v5658_v29, %v2405_v51  ;;  %v2428_v30 = vmul.f32 %v4396_v26, %v2420_v32  ;;  %v2633_v32 = vld [vmem:[%s7328_s3 + $0x70] sm:$0xff]  ;;  %v2648_v29 = vld [vmem:[%s7327_s29 + $0x68] sm:$0xff] }
0x12d1   :  { %v2427_v34 = vmul.f32 %v4396_v26, %v2419_v61  ;;  %v2436_v37 = vadd.f32 %v4397_v31, %v2428_v30  ;;  %v2649_v26 = vld [vmem:[%s7327_s29 + $0x70] sm:$0xff]  ;;  %v2632_v61 = vld [vmem:[%s7328_s3 + $0x68] sm:$0xff]  ;;  %v2647_v30 = vld [vmem:[%s7327_s29 + $0x60] sm:$0xff] }
0x12d3   :  { %v2435_v36 = vadd.f32 %v4397_v31, %v2427_v34  ;;  %v2631_v31 = vld [vmem:[%s7328_s3 + $0x60] sm:$0xff]  ;;  %v2646_v34 = vld [vmem:[%s7327_s29 + $0x58] sm:$0xff] }
0x12d5   :  { %5086 = vmatprep.mubr.f32.mxu0 %v2435_v36  ;;  %v2630_v36 = vld [vmem:[%s7328_s3 + $0x58] sm:$0xff] }
0x12d6   :  { %5087 = vmatmul.mubr.f32.vlgmr.msra.gmra.mxu0 %v2436_v37  ;;  %v2645_v37 = vld [vmem:[%s7327_s29 + $0x50] sm:$0xff] }
0x12d7   :  { %5132 = vmatpush3.msra.mxu0 %v2634_v60 }
0x12d8   :  { %5133 = vmatprep.subr.mxu0 %v2633_v32 }
0x12d9   :  { %5134 = vmatpush3.msra.mxu0 %v2633_v32  ;;  %v4406_v32 = vld [vmem:[%s7331_s11] ss:$0 sm:$0xff] }
0x12da   :  { %5135 = vmatprep.subr.mxu0 %v2632_v61 }
0x12db   :  { %5136 = vmatpush3.msra.mxu0 %v2632_v61 }
0x12dc   :  { %5137 = vmatprep.subr.mxu0 %v2631_v31 }
0x12dd   :  { %5138 = vmatpush3.msra.mxu0 %v2631_v31 }
0x12de   :  { %5139 = vmatprep.subr.mxu0 %v2630_v36 }
0x12df   :  { %5140 = vmatpush3.msra.mxu0 %v2630_v36 }
0x1396   :  { %v5088_v1 = vpop.f32.mrf.mxu0 }
0x1397   :  { %5089 = vmatprep.subr.mxu1 %v5088_v1 }
0x1398   :  { %v2503_v38 = vpop.f32.mrf.mxu0  ;;  %5090 = vmatpush3.msra.mxu1 %v5088_v1  ;;  %v2629_v1 = vld [vmem:[%s7328_s3 + $0x50] sm:$0xff] }
0x1399   :  { %5091 = vmatprep.subr.mxu1 %v2503_v38  ;;  %5141 = vmatprep.subr.mxu0 %v2629_v1 }
0x139a   :  { %5092 = vmatpush3.msra.mxu1 %v2503_v38  ;;  %5142 = vmatpush3.msra.mxu0 %v2629_v1  ;;  %v2644_v38 = vld [vmem:[%s7327_s29 + $0x48] sm:$0xff] }
0x139b   :  { %5094 = vmatmul.mubr.msk.f32.vlgmr.msra.gmra.mxu1 %vm1361_vm2, %v6919_v3  ;;  %5096 = vmatprep.subr.mxu1 %v2650_v59 }
0x139c   :  { %5097 = vmatpush3.msra.mxu1 %v2650_v59  ;;  %5143 = vmatprep.subr.mxu0 %v2628_v39 }
0x139d   :  { %5098 = vmatprep.subr.mxu1 %v2649_v26  ;;  %5144 = vmatpush3.msra.mxu0 %v2628_v39 }
0x139e   :  { %5099 = vmatpush3.msra.mxu1 %v2649_v26  ;;  %5145 = vmatprep.subr.mxu0 %v2627_v41 }
0x139f   :  { %5100 = vmatprep.subr.mxu1 %v2648_v29  ;;  %5146 = vmatpush3.msra.mxu0 %v2627_v41 }
0x13a0   :  { %5101 = vmatpush3.msra.mxu1 %v2648_v29  ;;  %v4404_v29 = vld [vmem:[%s7332_s15] ss:$0 sm:$0xff] }
0x13a1   :  { %5102 = vmatprep.subr.mxu1 %v2647_v30 }
0x13a2   :  { %5103 = vmatpush3.msra.mxu1 %v2647_v30 }
0x13a3   :  { %5104 = vmatprep.subr.mxu1 %v2646_v34 }
0x13a4   :  { %5105 = vmatpush3.msra.mxu1 %v2646_v34 }
0x13a5   :  { %5106 = vmatprep.subr.mxu1 %v2645_v37 }
0x13a6   :  { %5107 = vmatpush3.msra.mxu1 %v2645_v37 }
0x13a7   :  { %5108 = vmatprep.subr.mxu1 %v2644_v38 }
0x13a8   :  { %5109 = vmatpush3.msra.mxu1 %v2644_v38 }
0x13a9   :  { %5110 = vmatprep.subr.mxu1 %v2643_v40 }
0x13aa   :  { %5111 = vmatpush3.msra.mxu1 %v2643_v40 }
0x145b   :  { %v5095_v10 = vpop.f32.mrf.mxu1 }
0x145c   :  { %v2590_v43 = vadd.f32 %v5095_v10, %v4398_v7  ;;  %v2626_v10 = vld [vmem:[%s7328_s3 + $0x38] sm:$0xff] }
0x145d   :  { %v2584_v0 = vpop.f32.mrf.mxu1  ;;  %5147 = vmatprep.subr.mxu0 %v2626_v10 }
0x145e   :  { %v2598_v45 = vadd.f32 %v2596_v42, %v2590_v43  ;;  %v2585_v47 = vadd.f32 %v4398_v7, %v2584_v0  ;;  %v2642_v7 = vld [vmem:[%s7327_s29 + $0x38] sm:$0xff]  ;;  %v2625_v43 = vld [vmem:[%s7328_s3 + $0x30] sm:$0xff]  ;;  %5148 = vmatpush3.msra.mxu0 %v2626_v10  ;;  %v2640_v0 = vld [vmem:[%s7327_s29 + $0x28] sm:$0xff] }
0x145f   :  { %5112 = vmatprep.subr.mxu1 %v2642_v7  ;;  %5149 = vmatprep.subr.mxu0 %v2625_v43 }
0x1460   :  { %v4402_v48 = vmul.f32 -1.442695, %v2598_v45  ;;  %v2597_v49 = vadd.f32 %v2596_v42, %v2585_v47  ;;  %v2641_v42 = vld [vmem:[%s7327_s29 + $0x30] sm:$0xff]  ;;  %5113 = vmatpush3.msra.mxu1 %v2642_v7  ;;  %5150 = vmatpush3.msra.mxu0 %v2625_v43  ;;  %v2639_v47 = vld [vmem:[%s7327_s29 + $0x20] sm:$0xff]  ;;  %v736_v43 = vsub.s32 6, %v6686_v6 }
0x1461   :  { %5114 = vmatprep.subr.mxu1 %v2641_v42 }
0x1462   :  { %5659 = vpow2.f32 %v4402_v48  ;;  %v4401_v19 = vmul.f32 -1.442695, %v2597_v49  ;;  %5115 = vmatpush3.msra.mxu1 %v2641_v42  ;;  %v2623_v48 = vld [vmem:[%s7328_s3 + $0x20] sm:$0xff] }
0x1463   :  { %5116 = vmatprep.subr.mxu1 %v2640_v0 }
0x1464   :  { %5661 = vpow2.f32 %v4401_v19  ;;  %5117 = vmatpush3.msra.mxu1 %v2640_v0  ;;  %v2622_v19 = vld [vmem:[%s7328_s3 + $0x18] sm:$0xff]  ;;  %v737_v0 = vrot.slane %v6925_v11, %v736_v43 }
0x1465   :  { %5118 = vmatprep.subr.mxu1 %v2639_v47 }
0x1466   :  { %5119 = vmatpush3.msra.mxu1 %v2639_v47  ;;  %v4407_v47 = vld [vmem:[#allocation10] ss:$0 sm:$0xff] }
0x146f   :  { %v5660_v51 = vpop.eup %5659 }
0x1470   :  { %v2606_v52 = vadd.f32 1.0, %v5660_v51  ;;  %v2637_v51 = vld [vmem:[%s7327_s29 + $0x10] sm:$0xff] }
0x1471   :  { %v5662_v53 = vpop.eup %5661 }
0x1472   :  { %5663 = vrcp.f32 %v2606_v52  ;;  %v2605_v12 = vadd.f32 1.0, %v5662_v53  ;;  %v2621_v52 = vld [vmem:[%s7328_s3 + $0x10] sm:$0xff]  ;;  %v2636_v53 = vld [vmem:[%s7327_s29 + $0x8] sm:$0xff] }
0x1474   :  { %5665 = vrcp.f32 %v2605_v12  ;;  %v2620_v12 = vld [vmem:[%s7328_s3 + $0x8] sm:$0xff] }
0x147f   :  { %v5664_v54 = vpop.eup %5663 }
0x1480   :  { %v2612_v55 = vmul.f32 %v5664_v54, %v2598_v45  ;;  %v2624_v45 = vld [vmem:[%s7328_s3 + $0x28] sm:$0xff]  ;;  %v2635_v54 = vld [vmem:[%s7327_s29] sm:$0xff] }
0x1481   :  { %v5666_v22 = vpop.eup %5665  ;;  %5151 = vmatprep.subr.mxu0 %v2624_v45 }
0x1482   :  { %v2611_v56 = vmul.f32 %v5666_v22, %v2597_v49  ;;  %v6931_v57 = vadd.f32 %v2612_v55, %v6861_v27  ;;  %5152 = vmatpush3.msra.mxu0 %v2624_v45  ;;  %v2638_v49 = vld [vmem:[%s7327_s29 + $0x18] sm:$0xff]  ;;  %v2619_v55 = vld [vmem:[%s7328_s3] sm:$0xff]  ;;  %v1040_v45 = vadd.f32 %v6776_v24, %v737_v0 }
0x1483   :  { %5153 = vmatprep.subr.mxu0 %v2623_v48  ;;  %5120 = vmatprep.subr.mxu1 %v2638_v49 }
0x1484   :  { %2706 = vadd.xlane.f32.xlu1 %v6931_v57  ;;  %v6935_v58 = vadd.f32 %v2611_v56, %v6864_v28  ;;  %5154 = vmatpush3.msra.mxu0 %v2623_v48 }
0x1485   :  { %5155 = vmatprep.subr.mxu0 %v2622_v19  ;;  %5121 = vmatpush3.msra.mxu1 %v2638_v49  ;;  %v3007_v49 = vrot.slane %v1040_v45, %v6744_v2 }
0x1486   :  { %2704 = vadd.xlane.f32.xlu0 %v6935_v58  ;;  %5156 = vmatpush3.msra.mxu0 %v2622_v19 }
0x1487   :  { %5122 = vmatprep.subr.mxu1 %v2637_v51  ;;  %5157 = vmatprep.subr.mxu0 %v2621_v52 }
0x1488   :  { %5123 = vmatpush3.msra.mxu1 %v2637_v51  ;;  %5158 = vmatpush3.msra.mxu0 %v2621_v52 }
0x1489   :  { %5124 = vmatprep.subr.mxu1 %v2636_v53  ;;  %5159 = vmatprep.subr.mxu0 %v2620_v12 }
0x148a   :  { %5125 = vmatpush3.msra.mxu1 %v2636_v53  ;;  %5160 = vmatpush3.msra.mxu0 %v2620_v12 }
0x148b   :  { %5126 = vmatprep.subr.mxu1 %v2635_v54  ;;  %5161 = vmatprep.subr.mxu0 %v2619_v55 }
0x148c   :  { %5127 = vmatpush3.msra.mxu1 %v2635_v54  ;;  %5162 = vmatpush3.msra.mxu0 %v2619_v55 }
0x150d   :  { %v2707_v62 = vpop.xlane.xlu1 %2706 }
0x150e   :  { %v2709_v63 = vadd.f32 %v2707_v62, %v6871_v33 }
0x150f   :  { %v2705_v4 = vpop.xlane.xlu0 %2704 }
0x1510   :  { %v2708_v5 = vadd.f32 %v2705_v4, %v6874_v35  ;;  %v2712_v8 = vmul.f32 0.00390625, %v2709_v63 }
0x1512   :  { %v2711_v9 = vmul.f32 0.00390625, %v2708_v5  ;;  %v6949_v17 = vsub.f32 %v6931_v57, %v2712_v8  ;;  %v6952_v23 = vsub.f32 %v6861_v27, %v2712_v8 }
0x1514   :  { %v6943_v14 = vsub.f32 %v6935_v58, %v2711_v9  ;;  %v6946_v16 = vsub.f32 %v6864_v28, %v2711_v9  ;;  %v2724_v18 = vmul.f32 %v6952_v23, %v6952_v23  ;;  %v2716_v21 = vmul.f32 %v6949_v17, %v6949_v17 }
0x1516   :  { %v2723_v33 = vmul.f32 %v6946_v16, %v6946_v16  ;;  %v2715_v35 = vmul.f32 %v6943_v14, %v6943_v14 }
0x1518   :  { %2725 = vadd.xlane.f32.xlu1 %v2723_v33  ;;  %2717 = vadd.xlane.f32.xlu0 %v2715_v35  ;;  %v4405_v35 = vld [vmem:[%s7329_s13] ss:$0 sm:$0xff] }
0x151c   :  { %2727 = vadd.xlane.f32.xlu1 %v2724_v18  ;;  %2719 = vadd.xlane.f32.xlu0 %v2716_v21  ;;  %v4403_v18 = vld [vmem:[%s7330_s25] ss:$0 sm:$0xff] }
0x15a1   :  { %v2726_v22 = vpop.xlane.xlu1 %2725  ;;  %v2718_v56 = vpop.xlane.xlu0 %2717 }
0x15a2   :  { %v2729_v59 = vadd.f32 %v2726_v22, %v2718_v56 }
0x15a4   :  { %v2731_v60 = vmul.f32 0.00390625, %v2729_v59 }
0x15a5   :  { %v2728_v62 = vpop.xlane.xlu1 %2727  ;;  %v2720_v63 = vpop.xlane.xlu0 %2719 }
0x15a6   :  { %v2733_v4 = vadd.f32 1e-05, %v2731_v60  ;;  %v2730_v5 = vadd.f32 %v2728_v62, %v2720_v63 }
0x15a8   :  { %5667 = vrsqrt.f32 %v2733_v4  ;;  %v2732_v8 = vmul.f32 0.00390625, %v2730_v5  ;;  %v2669_v5 = vld [vmem:[%s7333_s16 + $0x78] sm:$0xff] }
0x15a9   :  { %5173 = vmatprep.subr.mxu0 %v2669_v5 }
0x15aa   :  { %v2734_v9 = vadd.f32 1e-05, %v2732_v8  ;;  %v2668_v8 = vld [vmem:[%s7333_s16 + $0x70] sm:$0xff] }
0x15ac   :  { %5669 = vrsqrt.f32 %v2734_v9  ;;  %v2667_v9 = vld [vmem:[%s7333_s16 + $0x68] sm:$0xff] }
0x15b5   :  { %v5668_v33 = vpop.eup %5667 }
0x15b6   :  { %v2755_v21 = vmul.f32 %v5668_v33, %v6946_v16  ;;  %v2737_v26 = vmul.f32 %v5668_v33, %v6943_v14  ;;  %v7001_v14 = vld [vmem:[%s7309_s6] sm:$0xff] }
0x15b8   :  { %v2763_v61 = vmul.f32 %v4405_v35, %v2755_v21  ;;  %v2745_v30 = vmul.f32 %v4403_v18, %v2737_v26 }
0x15b9   :  { %v5670_v31 = vpop.eup %5669 }
0x15ba   :  { %v2756_v34 = vmul.f32 %v5670_v31, %v6952_v23  ;;  %v2771_v36 = vadd.f32 %v4406_v32, %v2763_v61  ;;  %v2738_v37 = vmul.f32 %v5670_v31, %v6949_v17  ;;  %v2753_v1 = vadd.f32 %v4404_v29, %v2745_v30  ;;  %v2666_v30 = vld [vmem:[%s7333_s16 + $0x60] sm:$0xff]  ;;  %v2665_v31 = vld [vmem:[%s7333_s16 + $0x58] sm:$0xff] }
0x15bc   :  { %v2764_v38 = vmul.f32 %v4405_v35, %v2756_v34  ;;  %5128 = vmatprep.mubr.f32.mxu1 %v2771_v36  ;;  %v2746_v39 = vmul.f32 %v4403_v18, %v2738_v37  ;;  %5163 = vmatprep.mubr.f32.mxu0 %v2753_v1  ;;  %v2664_v34 = vld [vmem:[%s7333_s16 + $0x50] sm:$0xff]  ;;  %v2663_v36 = vld [vmem:[%s7333_s16 + $0x48] sm:$0xff]  ;;  %v2662_v37 = vld [vmem:[%s7333_s16 + $0x40] sm:$0xff] }
0x15bd   :  { %v2661_v1 = vld [vmem:[%s7333_s16 + $0x38] sm:$0xff] }
0x15be   :  { %v2772_v40 = vadd.f32 %v4406_v32, %v2764_v38  ;;  %v2754_v16 = vadd.f32 %v4404_v29, %v2746_v39  ;;  %v2660_v38 = vld [vmem:[%s7333_s16 + $0x30] sm:$0xff]  ;;  %v2659_v39 = vld [vmem:[%s7333_s16 + $0x28] sm:$0xff] }
0x15c0   :  { %5129 = vmatmul.mubr.f32.vlgmr.msra.gmra.mxu1 %v2772_v40  ;;  %5164 = vmatmul.mubr.f32.vlgmr.msra.gmra.mxu0 %v2754_v16  ;;  %v2658_v40 = vld [vmem:[%s7333_s16 + $0x20] sm:$0xff]  ;;  %v2657_v16 = vld [vmem:[%s7333_s16 + $0x18] sm:$0xff] }
0x15c1   :  { %5170 = vmatprep.mubr.msk.f32.mxu1 %vm1361_vm2, %v7001_v14  ;;  %5174 = vmatpush3.msra.mxu0 %v2669_v5  ;;  %v2677_v5 = vld [vmem:[%s7334_s12 + $0x30] sm:$0xff] }
0x15c2   :  { %5175 = vmatprep.subr.mxu0 %v2668_v8 }
0x15c3   :  { %5176 = vmatpush3.msra.mxu0 %v2668_v8  ;;  %v2676_v8 = vld [vmem:[%s7334_s12 + $0x28] sm:$0xff] }
0x15c4   :  { %5177 = vmatprep.subr.mxu0 %v2667_v9 }
0x15c5   :  { %5178 = vmatpush3.msra.mxu0 %v2667_v9  ;;  %v2675_v9 = vld [vmem:[%s7334_s12 + $0x20] sm:$0xff] }
0x15c6   :  { %5179 = vmatprep.subr.mxu0 %v2666_v30 }
0x15c7   :  { %5180 = vmatpush3.msra.mxu0 %v2666_v30  ;;  %v2699_v30 = vld [vmem:[%s7335_s18 + $0x60] sm:$0xff] }
0x15c8   :  { %5181 = vmatprep.subr.mxu0 %v2665_v31 }
0x15c9   :  { %5182 = vmatpush3.msra.mxu0 %v2665_v31  ;;  %v2698_v31 = vld [vmem:[%s7335_s18 + $0x58] sm:$0xff] }
0x15ca   :  { %5183 = vmatprep.subr.mxu0 %v2664_v34 }
0x15cb   :  { %5184 = vmatpush3.msra.mxu0 %v2664_v34  ;;  %v2697_v34 = vld [vmem:[%s7335_s18 + $0x50] sm:$0xff] }
0x15cc   :  { %5185 = vmatprep.subr.mxu0 %v2663_v36 }
0x15cd   :  { %5186 = vmatpush3.msra.mxu0 %v2663_v36  ;;  %v2694_v36 = vld [vmem:[%s7335_s18 + $0x38] sm:$0xff] }
0x15ce   :  { %5187 = vmatprep.subr.mxu0 %v2662_v37 }
0x15cf   :  { %5188 = vmatpush3.msra.mxu0 %v2662_v37  ;;  %v2693_v37 = vld [vmem:[%s7335_s18 + $0x30] sm:$0xff] }
0x15d0   :  { %5189 = vmatprep.subr.mxu0 %v2661_v1 }
0x15d1   :  { %5190 = vmatpush3.msra.mxu0 %v2661_v1  ;;  %v2692_v1 = vld [vmem:[%s7335_s18 + $0x28] sm:$0xff] }
0x15d2   :  { %5191 = vmatprep.subr.mxu0 %v2660_v38 }
0x15d3   :  { %5192 = vmatpush3.msra.mxu0 %v2660_v38  ;;  %v2691_v38 = vld [vmem:[%s7335_s18 + $0x20] sm:$0xff] }
0x15d4   :  { %5193 = vmatprep.subr.mxu0 %v2659_v39 }
0x15d5   :  { %5194 = vmatpush3.msra.mxu0 %v2659_v39  ;;  %v2690_v39 = vld [vmem:[%s7335_s18 + $0x18] sm:$0xff] }
0x15d6   :  { %5195 = vmatprep.subr.mxu0 %v2658_v40 }
0x15d7   :  { %5196 = vmatpush3.msra.mxu0 %v2658_v40  ;;  %v2689_v40 = vld [vmem:[%s7335_s18 + $0x10] sm:$0xff] }
0x15d8   :  { %5197 = vmatprep.subr.mxu0 %v2657_v16 }
0x15d9   :  { %5198 = vmatpush3.msra.mxu0 %v2657_v16  ;;  %v2688_v16 = vld [vmem:[%s7335_s18 + $0x8] sm:$0xff] }
0x1680   :  { %v5130_v41 = vpop.f32.mrf.mxu1  ;;  %v5165_v7 = vpop.f32.mrf.mxu0 }
0x1681   :  { %v2920_v23 = vadd.f32 %v5165_v7, %v5130_v41  ;;  %v2656_v41 = vld [vmem:[%s7333_s16 + $0x10] sm:$0xff]  ;;  %v2655_v7 = vld [vmem:[%s7333_s16 + $0x8] sm:$0xff] }
0x1682   :  { %v2839_v10 = vpop.f32.mrf.mxu1  ;;  %v2914_v42 = vpop.f32.mrf.mxu0  ;;  %5199 = vmatprep.subr.mxu0 %v2656_v41 }
0x1683   :  { %v2915_v17 = vadd.f32 %v2914_v42, %v2839_v10  ;;  %5166 = vmatprep.subr.mxu1 %v2920_v23  ;;  %5200 = vmatpush3.msra.mxu0 %v2656_v41  ;;  %v2686_v10 = vld [vmem:[%s7334_s12 + $0x78] sm:$0xff]  ;;  %v2687_v41 = vld [vmem:[%s7335_s18] sm:$0xff] }
0x1684   :  { %5167 = vmatpush3.msra.mxu1 %v2920_v23  ;;  %v2654_v23 = vld [vmem:[%s7333_s16] sm:$0xff]  ;;  %5201 = vmatprep.subr.mxu0 %v2655_v7 }
0x1685   :  { %5168 = vmatprep.subr.mxu1 %v2915_v17  ;;  %5202 = vmatpush3.msra.mxu0 %v2655_v7  ;;  %v740_v7 = vsub.s32 7, %v6686_v6 }
0x1686   :  { %5169 = vmatpush3.msra.mxu1 %v2915_v17  ;;  %5203 = vmatprep.subr.mxu0 %v2654_v23 }
0x1687   :  { %5171 = vmatmul.mubr.msk.f32.vlgmr.msra.gmra.mxu1 %vm1361_vm2, %v6919_v3  ;;  %5204 = vmatpush3.msra.mxu0 %v2654_v23  ;;  %v741_v23 = vrot.slane %v6925_v11, %v740_v7  ;;  %v3427_v7 = vld [vmem:[%s7336_s0 + $0x48] sm:$0xff] }
0x1688   :  { %5212 = vmatprep.mubr.msk.f32.mxu1 %vm1361_vm2, %v7001_v14  ;;  %5250 = vmatprep.subr.mxu0 %v2686_v10 }
0x1747   :  { %v5172_v48 = vpop.f32.mrf.mxu1 }
0x1748   :  { %v3001_v19 = vadd.f32 %v5172_v48, %v4407_v47 }
0x1749   :  { %v2995_v51 = vpop.f32.mrf.mxu1 }
0x174a   :  { %v3009_v52 = vadd.f32 %v3007_v49, %v3001_v19  ;;  %v2996_v53 = vadd.f32 %v4407_v47, %v2995_v51 }
0x174c   :  { %v4411_v12 = vmul.f32 -1.442695, %v3009_v52  ;;  %v3008_v54 = vadd.f32 %v3007_v49, %v2996_v53  ;;  %v4412_v49 = vld [vmem:[#allocation11] ss:$0 sm:$0xff] }
0x174e   :  { %5671 = vpow2.f32 %v4411_v12  ;;  %v4410_v55 = vmul.f32 -1.442695, %v3008_v54  ;;  %v4413_v12 = vld [vmem:[#allocation13] ss:$0 sm:$0xff] }
0x1750   :  { %5673 = vpow2.f32 %v4410_v55 }
0x175b   :  { %v5672_v22 = vpop.eup %5671 }
0x175c   :  { %v3017_v56 = vadd.f32 1.0, %v5672_v22 }
0x175d   :  { %v5674_v59 = vpop.eup %5673 }
0x175e   :  { %5675 = vrcp.f32 %v3017_v56  ;;  %v3016_v24 = vadd.f32 1.0, %v5674_v59  ;;  %v2685_v56 = vld [vmem:[%s7334_s12 + $0x70] sm:$0xff]  ;;  %v2684_v59 = vld [vmem:[%s7334_s12 + $0x68] sm:$0xff] }
0x1760   :  { %5677 = vrcp.f32 %v3016_v24  ;;  %v2683_v24 = vld [vmem:[%s7334_s12 + $0x60] sm:$0xff] }
0x176b   :  { %v5676_v60 = vpop.eup %5675 }
0x176c   :  { %v3023_v62 = vmul.f32 %v5676_v60, %v3009_v52  ;;  %v2682_v60 = vld [vmem:[%s7334_s12 + $0x58] sm:$0xff] }
0x176d   :  { %v5678_v63 = vpop.eup %5677 }
0x176e   :  { %3026 = vadd.xlane.f32.xlu1 %v3023_v62  ;;  %v3022_v4 = vmul.f32 %v5678_v63, %v3008_v54  ;;  %v2680_v63 = vld [vmem:[%s7334_s12 + $0x48] sm:$0xff] }
0x1770   :  { %3024 = vadd.xlane.f32.xlu0 %v3022_v4 }
0x17f7   :  { %v3027_v33 = vpop.xlane.xlu1 %3026 }
0x17f8   :  { %v3029_v35 = vmul.f32 0.0078125, %v3027_v33  ;;  %v2674_v33 = vld [vmem:[%s7334_s12 + $0x18] sm:$0xff] }
0x17f9   :  { %v3025_v18 = vpop.xlane.xlu0 %3024 }
0x17fa   :  { %v3031_v21 = vsub.f32 %v3023_v62, %v3029_v35  ;;  %v3028_v26 = vmul.f32 0.0078125, %v3025_v18  ;;  %v2681_v62 = vld [vmem:[%s7334_s12 + $0x50] sm:$0xff]  ;;  %v2672_v18 = vld [vmem:[%s7334_s12 + $0x8] sm:$0xff] }
0x17fb   :  { %v2673_v35 = vld [vmem:[%s7334_s12 + $0x10] sm:$0xff] }
0x17fc   :  { %v3030_v32 = vsub.f32 %v3022_v4, %v3028_v26  ;;  %v3033_v29 = vmul.f32 %v3031_v21, %v3031_v21  ;;  %v2678_v4 = vld [vmem:[%s7334_s12 + $0x38] sm:$0xff] }
0x17fe   :  { %3036 = vadd.xlane.f32.xlu1 %v3033_v29  ;;  %v3032_v61 = vmul.f32 %v3030_v32, %v3030_v32  ;;  %v2702_v29 = vld [vmem:[%s7335_s18 + $0x78] sm:$0xff] }
0x1800   :  { %3034 = vadd.xlane.f32.xlu0 %v3032_v61  ;;  %v2701_v61 = vld [vmem:[%s7335_s18 + $0x70] sm:$0xff] }
0x1887   :  { %v3037_v42 = vpop.xlane.xlu1 %3036 }
0x1888   :  { %v3039_v17 = vmul.f32 0.0078125, %v3037_v42  ;;  %v4414_v42 = vld [vmem:[#allocation14] ss:$0 sm:$0xff] }
0x1889   :  { %v3035_v43 = vpop.xlane.xlu0 %3034 }
0x188a   :  { %v3041_v0 = vadd.f32 1e-05, %v3039_v17  ;;  %v3038_v45 = vmul.f32 0.0078125, %v3035_v43 }
0x188c   :  { %5679 = vrsqrt.f32 %v3041_v0  ;;  %v3040_v47 = vadd.f32 1e-05, %v3038_v45 }
0x188e   :  { %5681 = vrsqrt.f32 %v3040_v47 }
0x1899   :  { %v5680_v48 = vpop.eup %5679 }
0x189a   :  { %v3045_v19 = vmul.f32 %v5680_v48, %v3031_v21  ;;  %v2671_v21 = vld [vmem:[%s7334_s12] sm:$0xff] }
0x189b   :  { %v5682_v51 = vpop.eup %5681 }
0x189c   :  { %v3044_v52 = vmul.f32 %v5682_v51, %v3030_v32  ;;  %v3053_v53 = vmul.f32 %v4412_v49, %v3045_v19 }
0x189e   :  { %v3052_v54 = vmul.f32 %v4412_v49, %v3044_v52  ;;  %v3061_v22 = vadd.f32 %v4413_v12, %v3053_v53 }
0x18a0   :  { %v3060_v55 = vadd.f32 %v4413_v12, %v3052_v54 }
0x18a2   :  { %5205 = vmatprep.mubr.f32.mxu0 %v3060_v55  ;;  %v4419_v55 = vld [vmem:[#allocation16] ss:$0 sm:$0xff] }
0x18a3   :  { %5206 = vmatmul.mubr.f32.vlgmr.msra.gmra.mxu0 %v3061_v22 }
0x18a4   :  { %5251 = vmatpush3.msra.mxu0 %v2686_v10  ;;  %5282 = vmatprep.mubr.f32.mxu0 %v6935_v58  ;;  %v2679_v58 = vld [vmem:[%s7334_s12 + $0x40] sm:$0xff]  ;;  %v1042_v10 = vadd.f32 %v6778_v25, %v741_v23  ;;  %v3411_v23 = vld [vmem:[%s7337_s22 + $0x48] sm:$0xff] }
0x18a5   :  { %5252 = vmatprep.subr.mxu0 %v2685_v56 }
0x18a6   :  { %5253 = vmatpush3.msra.mxu0 %v2685_v56  ;;  %v3221_v43 = vrot.slane %v1042_v10, %v6744_v2  ;;  %v3426_v10 = vld [vmem:[%s7336_s0 + $0x40] sm:$0xff] }
0x18a7   :  { %5254 = vmatprep.subr.mxu0 %v2684_v59 }
0x18a8   :  { %5255 = vmatpush3.msra.mxu0 %v2684_v59 }
0x18a9   :  { %5256 = vmatprep.subr.mxu0 %v2683_v24 }
0x18aa   :  { %5257 = vmatpush3.msra.mxu0 %v2683_v24 }
0x18ab   :  { %5258 = vmatprep.subr.mxu0 %v2682_v60 }
0x18ac   :  { %5259 = vmatpush3.msra.mxu0 %v2682_v60 }
0x18ad   :  { %5260 = vmatprep.subr.mxu0 %v2681_v62 }
0x18ae   :  { %5261 = vmatpush3.msra.mxu0 %v2681_v62 }
0x18af   :  { %5262 = vmatprep.subr.mxu0 %v2680_v63 }
0x18b0   :  { %5263 = vmatpush3.msra.mxu0 %v2680_v63 }
0x18b1   :  { %5264 = vmatprep.subr.mxu0 %v2679_v58 }
0x18b2   :  { %5265 = vmatpush3.msra.mxu0 %v2679_v58 }
0x18b3   :  { %5266 = vmatprep.subr.mxu0 %v2678_v4 }
0x18b4   :  { %5267 = vmatpush3.msra.mxu0 %v2678_v4 }
0x18b5   :  { %5268 = vmatprep.subr.mxu0 %v2677_v5 }
0x18b6   :  { %5269 = vmatpush3.msra.mxu0 %v2677_v5 }
0x18b7   :  { %5270 = vmatprep.subr.mxu0 %v2676_v8 }
0x18b8   :  { %5271 = vmatpush3.msra.mxu0 %v2676_v8  ;;  %v3433_v8 = vld [vmem:[%s7336_s0 + $0x78] sm:$0xff] }
0x18b9   :  { %5272 = vmatprep.subr.mxu0 %v2675_v9 }
0x18ba   :  { %5273 = vmatpush3.msra.mxu0 %v2675_v9  ;;  %v3417_v9 = vld [vmem:[%s7337_s22 + $0x78] sm:$0xff] }
0x18bb   :  { %5274 = vmatprep.subr.mxu0 %v2674_v33 }
0x18bc   :  { %5275 = vmatpush3.msra.mxu0 %v2674_v33 }
0x18bd   :  { %5276 = vmatprep.subr.mxu0 %v2673_v35 }
0x18be   :  { %5277 = vmatpush3.msra.mxu0 %v2673_v35 }
0x18bf   :  { %5278 = vmatprep.subr.mxu0 %v2672_v18 }
0x18c0   :  { %5279 = vmatpush3.msra.mxu0 %v2672_v18 }
0x18c1   :  { %5280 = vmatprep.subr.mxu0 %v2671_v21 }
0x18c2   :  { %5281 = vmatpush3.msra.mxu0 %v2671_v21 }
0x18c3   :  { %5283 = vmatmul.mubr.f32.vlgmr.msra.gmra.mxu0 %v6931_v57  ;;  %v2700_v57 = vld [vmem:[%s7335_s18 + $0x68] sm:$0xff]  ;;  %5320 = vmatprep.subr.mxu0 %v3417_v9 }
0x18c4   :  { %5321 = vmatpush3.msra.mxu0 %v3417_v9  ;;  %v4422_v9 = vld [vmem:[%s7338_s19] ss:$0 sm:$0xff] }
0x1963   :  { %v5207_v26 = vpop.f32.mrf.mxu0 }
0x1964   :  { %5208 = vmatprep.subr.mxu1 %v5207_v26 }
0x1965   :  { %v3128_v32 = vpop.f32.mrf.mxu0  ;;  %5209 = vmatpush3.msra.mxu1 %v5207_v26 }
0x1966   :  { %5210 = vmatprep.subr.mxu1 %v3128_v32 }
0x1967   :  { %5211 = vmatpush3.msra.mxu1 %v3128_v32 }
0x1968   :  { %5213 = vmatmul.mubr.msk.f32.vlgmr.msra.gmra.mxu1 %vm1361_vm2, %v6919_v3  ;;  %5215 = vmatprep.subr.mxu1 %v2702_v29  ;;  %v2696_v3 = vld [vmem:[%s7335_s18 + $0x48] sm:$0xff] }
0x1969   :  { %5216 = vmatpush3.msra.mxu1 %v2702_v29  ;;  %5247 = vmatprep.mubr.f32.mxu1 %v6864_v28  ;;  %v2695_v28 = vld [vmem:[%s7335_s18 + $0x40] sm:$0xff] }
0x196a   :  { %5217 = vmatprep.subr.mxu1 %v2701_v61 }
0x196b   :  { %5218 = vmatpush3.msra.mxu1 %v2701_v61 }
0x196c   :  { %5219 = vmatprep.subr.mxu1 %v2700_v57 }
0x196d   :  { %5220 = vmatpush3.msra.mxu1 %v2700_v57 }
0x196e   :  { %5221 = vmatprep.subr.mxu1 %v2699_v30 }
0x196f   :  { %5222 = vmatpush3.msra.mxu1 %v2699_v30 }
0x1970   :  { %5223 = vmatprep.subr.mxu1 %v2698_v31 }
0x1971   :  { %5224 = vmatpush3.msra.mxu1 %v2698_v31 }
0x1972   :  { %5225 = vmatprep.subr.mxu1 %v2697_v34 }
0x1973   :  { %5226 = vmatpush3.msra.mxu1 %v2697_v34 }
0x1974   :  { %5227 = vmatprep.subr.mxu1 %v2696_v3 }
0x1975   :  { %5228 = vmatpush3.msra.mxu1 %v2696_v3  ;;  %v3432_v3 = vld [vmem:[%s7336_s0 + $0x70] sm:$0xff] }
0x1976   :  { %5229 = vmatprep.subr.mxu1 %v2695_v28 }
0x1977   :  { %5230 = vmatpush3.msra.mxu1 %v2695_v28  ;;  %v3416_v28 = vld [vmem:[%s7337_s22 + $0x70] sm:$0xff] }
0x1978   :  { %5231 = vmatprep.subr.mxu1 %v2694_v36  ;;  %5322 = vmatprep.subr.mxu0 %v3416_v28 }
0x1979   :  { %5232 = vmatpush3.msra.mxu1 %v2694_v36  ;;  %5323 = vmatpush3.msra.mxu0 %v3416_v28  ;;  %v3431_v36 = vld [vmem:[%s7336_s0 + $0x68] sm:$0xff] }
0x197a   :  { %5233 = vmatprep.subr.mxu1 %v2693_v37 }
0x197b   :  { %5234 = vmatpush3.msra.mxu1 %v2693_v37  ;;  %v3415_v37 = vld [vmem:[%s7337_s22 + $0x68] sm:$0xff] }
0x197c   :  { %5235 = vmatprep.subr.mxu1 %v2692_v1  ;;  %5324 = vmatprep.subr.mxu0 %v3415_v37 }
0x197d   :  { %5236 = vmatpush3.msra.mxu1 %v2692_v1  ;;  %5325 = vmatpush3.msra.mxu0 %v3415_v37  ;;  %v3430_v1 = vld [vmem:[%s7336_s0 + $0x60] sm:$0xff] }
0x197e   :  { %5237 = vmatprep.subr.mxu1 %v2691_v38 }
0x197f   :  { %5238 = vmatpush3.msra.mxu1 %v2691_v38  ;;  %v3414_v38 = vld [vmem:[%s7337_s22 + $0x60] sm:$0xff] }
0x1980   :  { %5239 = vmatprep.subr.mxu1 %v2690_v39  ;;  %5326 = vmatprep.subr.mxu0 %v3414_v38 }
0x1981   :  { %5240 = vmatpush3.msra.mxu1 %v2690_v39  ;;  %5327 = vmatpush3.msra.mxu0 %v3414_v38  ;;  %v3429_v39 = vld [vmem:[%s7336_s0 + $0x58] sm:$0xff] }
0x1982   :  { %5241 = vmatprep.subr.mxu1 %v2689_v40 }
0x1983   :  { %5242 = vmatpush3.msra.mxu1 %v2689_v40  ;;  %v5284_v25 = vpop.f32.mrf.mxu0  ;;  %v3413_v40 = vld [vmem:[%s7337_s22 + $0x58] sm:$0xff] }
0x1984   :  { %5243 = vmatprep.subr.mxu1 %v2688_v16  ;;  %5328 = vmatprep.subr.mxu0 %v3413_v40 }
0x1985   :  { %5244 = vmatpush3.msra.mxu1 %v2688_v16  ;;  %v3379_v54 = vpop.f32.mrf.mxu0  ;;  %5329 = vmatpush3.msra.mxu0 %v3413_v40  ;;  %v3428_v16 = vld [vmem:[%s7336_s0 + $0x50] sm:$0xff] }
0x1986   :  { %5245 = vmatprep.subr.mxu1 %v2687_v41 }
0x1987   :  { %5246 = vmatpush3.msra.mxu1 %v2687_v41  ;;  %v3412_v41 = vld [vmem:[%s7337_s22 + $0x50] sm:$0xff] }
0x1988   :  { %5248 = vmatmul.mubr.f32.vlgmr.msra.gmra.mxu1 %v6861_v27  ;;  %5285 = vmatprep.subr.mxu1 %v3433_v8 }
0x1989   :  { %5286 = vmatpush3.msra.mxu1 %v3433_v8  ;;  %5330 = vmatprep.subr.mxu0 %v3412_v41 }
0x198a   :  { %5287 = vmatprep.subr.mxu1 %v3432_v3  ;;  %5331 = vmatpush3.msra.mxu0 %v3412_v41  ;;  %v5719_v41 = vld [vmem:[%s7304_s8 + $0x8] sm:$0x3]  ;;  %s7343_s8 = sld [smem:[#allocation80_spill]] }
0x198b   :  { %5288 = vmatpush3.msra.mxu1 %v3432_v3  ;;  %5332 = vmatprep.subr.mxu0 %v3411_v23 }
0x198c   :  { %5289 = vmatprep.subr.mxu1 %v3431_v36  ;;  %5333 = vmatpush3.msra.mxu0 %v3411_v23  ;;  %v4424_v23 = vld [vmem:[#allocation17] ss:$0 sm:$0xff] }
0x198d   :  { %5290 = vmatpush3.msra.mxu1 %v3431_v36 }
0x198e   :  { %5291 = vmatprep.subr.mxu1 %v3430_v1 }
0x198f   :  { %5292 = vmatpush3.msra.mxu1 %v3430_v1 }
0x1990   :  { %5293 = vmatprep.subr.mxu1 %v3429_v39 }
0x1991   :  { %5294 = vmatpush3.msra.mxu1 %v3429_v39 }
0x1992   :  { %5295 = vmatprep.subr.mxu1 %v3428_v16 }
0x1993   :  { %5296 = vmatpush3.msra.mxu1 %v3428_v16  ;;  %v7144_v16 = vld [vmem:[%s7309_s6 + $0x8] sm:$0xff]  ;;  %s7342_s6 = sld [smem:[#allocation79_spill]] }
0x1994   :  { %5297 = vmatprep.subr.mxu1 %v3427_v7 }
0x1995   :  { %5298 = vmatpush3.msra.mxu1 %v3427_v7  ;;  %v745_v7 = vrot.slane %v5719_v41, %v6744_v2 }
0x1996   :  { %5299 = vmatprep.subr.mxu1 %v3426_v10 }
0x1997   :  { %5300 = vmatpush3.msra.mxu1 %v3426_v10 }
0x1a28   :  { %v5214_v17 = vpop.f32.mrf.mxu1 }
0x1a29   :  { %v3215_v0 = vadd.f32 %v5214_v17, %v4414_v42  ;;  %v3425_v17 = vld [vmem:[%s7336_s0 + $0x38] sm:$0xff] }
0x1a2a   :  { %v3209_v45 = vpop.f32.mrf.mxu1  ;;  %5301 = vmatprep.subr.mxu1 %v3425_v17 }
0x1a2b   :  { %v3223_v47 = vadd.f32 %v3221_v43, %v3215_v0  ;;  %v3210_v48 = vadd.f32 %v4414_v42, %v3209_v45  ;;  %v3410_v42 = vld [vmem:[%s7337_s22 + $0x40] sm:$0xff]  ;;  %v3424_v0 = vld [vmem:[%s7336_s0 + $0x30] sm:$0xff]  ;;  %5302 = vmatpush3.msra.mxu1 %v3425_v17 }
0x1a2c   :  { %5334 = vmatprep.subr.mxu0 %v3410_v42  ;;  %v3408_v45 = vld [vmem:[%s7337_s22 + $0x30] sm:$0xff]  ;;  %5303 = vmatprep.subr.mxu1 %v3424_v0 }
0x1a2d   :  { %v4418_v49 = vmul.f32 -1.442695, %v3223_v47  ;;  %v3222_v19 = vadd.f32 %v3221_v43, %v3210_v48  ;;  %v3409_v43 = vld [vmem:[%s7337_s22 + $0x38] sm:$0xff]  ;;  %5335 = vmatpush3.msra.mxu0 %v3410_v42  ;;  %v3407_v48 = vld [vmem:[%s7337_s22 + $0x28] sm:$0xff]  ;;  %5304 = vmatpush3.msra.mxu1 %v3424_v0 }
0x1a2e   :  { %5336 = vmatprep.subr.mxu0 %v3409_v43 }
0x1a2f   :  { %5683 = vpow2.f32 %v4418_v49  ;;  %v4417_v51 = vmul.f32 -1.442695, %v3222_v19  ;;  %5337 = vmatpush3.msra.mxu0 %v3409_v43  ;;  %v3422_v49 = vld [vmem:[%s7336_s0 + $0x20] sm:$0xff] }
0x1a30   :  { %5338 = vmatprep.subr.mxu0 %v3408_v45 }
0x1a31   :  { %5685 = vpow2.f32 %v4417_v51  ;;  %5339 = vmatpush3.msra.mxu0 %v3408_v45  ;;  %v3421_v51 = vld [vmem:[%s7336_s0 + $0x18] sm:$0xff] }
0x1a32   :  { %5340 = vmatprep.subr.mxu0 %v3407_v48 }
0x1a33   :  { %5341 = vmatpush3.msra.mxu0 %v3407_v48 }
0x1a3c   :  { %v5684_v27 = vpop.eup %5683 }
0x1a3d   :  { %v3231_v52 = vadd.f32 1.0, %v5684_v27  ;;  %v3405_v27 = vld [vmem:[%s7337_s22 + $0x18] sm:$0xff] }
0x1a3e   :  { %v5686_v6 = vpop.eup %5685 }
0x1a3f   :  { %5687 = vrcp.f32 %v3231_v52  ;;  %v3230_v11 = vadd.f32 1.0, %v5686_v6  ;;  %v3420_v52 = vld [vmem:[%s7336_s0 + $0x10] sm:$0xff] }
0x1a40   :  { %v3404_v6 = vld [vmem:[%s7337_s22 + $0x10] sm:$0xff] }
0x1a41   :  { %5689 = vrcp.f32 %v3230_v11  ;;  %v3419_v11 = vld [vmem:[%s7336_s0 + $0x8] sm:$0xff] }
0x1a48   :  { %v5249_v53 = vpop.f32.mrf.mxu1 }
0x1a49   :  { %v3385_v12 = vadd.f32 %v5284_v25, %v5249_v53  ;;  %v3403_v25 = vld [vmem:[%s7337_s22 + $0x8] sm:$0xff]  ;;  %v3418_v53 = vld [vmem:[%s7336_s0] sm:$0xff] }
0x1a4a   :  { %v3304_v22 = vpop.f32.mrf.mxu1 }
0x1a4b   :  { %v3380_v56 = vadd.f32 %v3379_v54, %v3304_v22  ;;  %v3395_v60 = vadd.f32 %v4419_v55, %v3385_v12  ;;  %v3402_v12 = vld [vmem:[%s7337_s22] sm:$0xff] }
0x1a4c   :  { %v5688_v59 = vpop.eup %5687 }
0x1a4d   :  { %v3237_v24 = vmul.f32 %v5688_v59, %v3223_v47  ;;  %v3394_v58 = vadd.f32 %v4419_v55, %v3380_v56  ;;  %v3423_v47 = vld [vmem:[%s7336_s0 + $0x28] sm:$0xff] }
0x1a4e   :  { %v5690_v62 = vpop.eup %5689  ;;  %5305 = vmatprep.subr.mxu1 %v3423_v47 }
0x1a4f   :  { %v3236_v63 = vmul.f32 %v5690_v62, %v3222_v19  ;;  %v7071_v4 = vadd.f32 %v3395_v60, %v3237_v24  ;;  %v3406_v19 = vld [vmem:[%s7337_s22 + $0x20] sm:$0xff]  ;;  %5306 = vmatpush3.msra.mxu1 %v3423_v47 }
0x1a50   :  { %5307 = vmatprep.subr.mxu1 %v3422_v49  ;;  %5342 = vmatprep.subr.mxu0 %v3406_v19 }
0x1a51   :  { %3489 = vadd.xlane.f32.xlu1 %v7071_v4  ;;  %v7074_v5 = vadd.f32 %v3394_v58, %v3236_v63  ;;  %5308 = vmatpush3.msra.mxu1 %v3422_v49 }
0x1a52   :  { %5343 = vmatpush3.msra.mxu0 %v3406_v19  ;;  %5309 = vmatprep.subr.mxu1 %v3421_v51 }
0x1a53   :  { %3487 = vadd.xlane.f32.xlu0 %v7074_v5  ;;  %5344 = vmatprep.subr.mxu0 %v3405_v27 }
0x1a54   :  { %5310 = vmatpush3.msra.mxu1 %v3421_v51  ;;  %5345 = vmatpush3.msra.mxu0 %v3405_v27 }
0x1a55   :  { %5311 = vmatprep.subr.mxu1 %v3420_v52  ;;  %5346 = vmatprep.subr.mxu0 %v3404_v6 }
0x1a56   :  { %5312 = vmatpush3.msra.mxu1 %v3420_v52  ;;  %5347 = vmatpush3.msra.mxu0 %v3404_v6 }
0x1a57   :  { %5313 = vmatprep.subr.mxu1 %v3419_v11  ;;  %5348 = vmatprep.subr.mxu0 %v3403_v25 }
0x1a58   :  { %5314 = vmatpush3.msra.mxu1 %v3419_v11  ;;  %5349 = vmatpush3.msra.mxu0 %v3403_v25 }
0x1a59   :  { %5315 = vmatprep.subr.mxu1 %v3418_v53  ;;  %5350 = vmatprep.subr.mxu0 %v3402_v12 }
0x1a5a   :  { %5316 = vmatpush3.msra.mxu1 %v3418_v53  ;;  %5351 = vmatpush3.msra.mxu0 %v3402_v12  ;;  %v3452_v53 = vld [vmem:[%s7342_s6 + $0x78] sm:$0xff]  ;;  %v3451_v12 = vld [vmem:[%s7342_s6 + $0x70] sm:$0xff] }
0x1ada   :  { %v3490_v33 = vpop.xlane.xlu1 %3489 }
0x1adb   :  { %v3492_v35 = vadd.f32 %v3490_v33, %v6799_v20  ;;  %v4420_v33 = vld [vmem:[%s7339_s27] ss:$0 sm:$0xff] }
0x1adc   :  { %v3488_v18 = vpop.xlane.xlu0 %3487 }
0x1add   :  { %v3491_v21 = vadd.f32 %v3488_v18, %v6802_v50  ;;  %v3494_v26 = vmul.f32 0.00390625, %v3492_v35 }
0x1adf   :  { %v3493_v32 = vmul.f32 0.00390625, %v3491_v21  ;;  %v7088_v57 = vsub.f32 %v7071_v4, %v3494_v26  ;;  %v7091_v30 = vsub.f32 %v6789_v44, %v3494_v26  ;;  %v4423_v21 = vld [vmem:[%s7340_s23] ss:$0 sm:$0xff] }
0x1ae0   :  { %v4421_v26 = vld [vmem:[%s7341_s4] ss:$0 sm:$0xff] }
0x1ae1   :  { %v7082_v29 = vsub.f32 %v7074_v5, %v3493_v32  ;;  %v7085_v61 = vsub.f32 %v6792_v46, %v3493_v32  ;;  %v3506_v31 = vmul.f32 %v7091_v30, %v7091_v30  ;;  %v3498_v34 = vmul.f32 %v7088_v57, %v7088_v57 }
0x1ae3   :  { %v3505_v20 = vmul.f32 %v7085_v61, %v7085_v61  ;;  %v3497_v50 = vmul.f32 %v7082_v29, %v7082_v29 }
0x1ae5   :  { %3507 = vadd.xlane.f32.xlu1 %v3505_v20  ;;  %3499 = vadd.xlane.f32.xlu0 %v3497_v50 }
0x1ae9   :  { %3509 = vadd.xlane.f32.xlu1 %v3506_v31  ;;  %3501 = vadd.xlane.f32.xlu0 %v3498_v34 }
0x1b6e   :  { %v3508_v54 = vpop.xlane.xlu1 %3507  ;;  %v3500_v55 = vpop.xlane.xlu0 %3499 }
0x1b6f   :  { %v3511_v22 = vadd.f32 %v3508_v54, %v3500_v55  ;;  %v3450_v54 = vld [vmem:[%s7342_s6 + $0x68] sm:$0xff] }
0x1b71   :  { %v3513_v56 = vmul.f32 0.00390625, %v3511_v22 }
0x1b72   :  { %v3510_v59 = vpop.xlane.xlu1 %3509  ;;  %v3502_v24 = vpop.xlane.xlu0 %3501 }
0x1b73   :  { %v3515_v60 = vadd.f32 1e-05, %v3513_v56  ;;  %v3512_v62 = vadd.f32 %v3510_v59, %v3502_v24 }
0x1b75   :  { %5691 = vrsqrt.f32 %v3515_v60  ;;  %v3514_v63 = vmul.f32 0.00390625, %v3512_v62 }
0x1b77   :  { %v3516_v58 = vadd.f32 1e-05, %v3514_v63 }
0x1b79   :  { %5693 = vrsqrt.f32 %v3516_v58  ;;  %v3449_v58 = vld [vmem:[%s7342_s6 + $0x60] sm:$0xff] }
0x1b82   :  { %v5692_v8 = vpop.eup %5691 }
0x1b83   :  { %v3537_v35 = vmul.f32 %v5692_v8, %v7085_v61  ;;  %v3519_v18 = vmul.f32 %v5692_v8, %v7082_v29  ;;  %v3448_v8 = vld [vmem:[%s7342_s6 + $0x58] sm:$0xff] }
0x1b85   :  { %v3545_v32 = vmul.f32 %v4422_v9, %v3537_v35  ;;  %v3527_v20 = vmul.f32 %v4420_v33, %v3519_v18  ;;  %v3445_v35 = vld [vmem:[%s7342_s6 + $0x40] sm:$0xff]  ;;  %v3444_v18 = vld [vmem:[%s7342_s6 + $0x38] sm:$0xff] }
0x1b86   :  { %v5694_v50 = vpop.eup %5693 }
0x1b87   :  { %v3538_v31 = vmul.f32 %v5694_v50, %v7091_v30  ;;  %v3553_v34 = vadd.f32 %v4423_v21, %v3545_v32  ;;  %v3520_v3 = vmul.f32 %v5694_v50, %v7088_v57  ;;  %v3535_v28 = vadd.f32 %v4421_v26, %v3527_v20  ;;  %v3441_v32 = vld [vmem:[%s7342_s6 + $0x20] sm:$0xff]  ;;  %v3440_v20 = vld [vmem:[%s7342_s6 + $0x18] sm:$0xff]  ;;  %v3439_v50 = vld [vmem:[%s7342_s6 + $0x10] sm:$0xff] }
0x1b89   :  { %v3546_v36 = vmul.f32 %v4422_v9, %v3538_v31  ;;  %5317 = vmatprep.mubr.f32.mxu1 %v3553_v34  ;;  %v3528_v37 = vmul.f32 %v4420_v33, %v3520_v3  ;;  %5352 = vmatprep.mubr.f32.mxu0 %v3535_v28  ;;  %v3447_v9 = vld [vmem:[%s7342_s6 + $0x50] sm:$0xff]  ;;  %v3446_v33 = vld [vmem:[%s7342_s6 + $0x48] sm:$0xff]  ;;  %v3437_v34 = vld [vmem:[%s7342_s6] sm:$0xff] }
0x1b8a   :  { %v3438_v31 = vld [vmem:[%s7342_s6 + $0x8] sm:$0xff]  ;;  %v3469_v3 = vld [vmem:[%s7343_s8 + $0x78] sm:$0xff] }
0x1b8b   :  { %v3554_v1 = vadd.f32 %v4423_v21, %v3546_v36  ;;  %v3536_v61 = vadd.f32 %v4421_v26, %v3528_v37  ;;  %v3443_v21 = vld [vmem:[%s7342_s6 + $0x30] sm:$0xff]  ;;  %v3442_v26 = vld [vmem:[%s7342_s6 + $0x28] sm:$0xff] }
0x1b8d   :  { %5318 = vmatmul.mubr.f32.vlgmr.msra.gmra.mxu1 %v3554_v1  ;;  %5353 = vmatmul.mubr.f32.vlgmr.msra.gmra.mxu0 %v3536_v61 }
0x1b8e   :  { %5359 = vmatprep.mubr.msk.f32.mxu1 %vm1361_vm2, %v7001_v14  ;;  %5401 = vmatprep.mubr.msk.f32.mxu0 %vm1361_vm2, %v7001_v14  ;;  %v1111_v14 = vadd.f32 %v6700_v13, %v745_v7  ;;  %v4430_v7 = vld [vmem:[#allocation20] ss:$0 sm:$0xff] }
0x1b90   :  { %v3789_v42 = vrot.slane %v1111_v14, %v6744_v2 }
0x1c4d   :  { %v5319_v29 = vpop.f32.mrf.mxu1  ;;  %v5354_v30 = vpop.f32.mrf.mxu0 }
0x1c4e   :  { %v3702_v57 = vadd.f32 %v5354_v30, %v5319_v29 }
0x1c4f   :  { %v3621_v38 = vpop.f32.mrf.mxu1  ;;  %v3696_v39 = vpop.f32.mrf.mxu0 }
0x1c50   :  { %v3697_v40 = vadd.f32 %v3696_v39, %v3621_v38  ;;  %5355 = vmatprep.subr.mxu1 %v3702_v57 }
0x1c51   :  { %5356 = vmatpush3.msra.mxu1 %v3702_v57  ;;  %v4429_v57 = vld [vmem:[#allocation19] ss:$0 sm:$0xff] }
0x1c52   :  { %5357 = vmatprep.subr.mxu1 %v3697_v40 }
0x1c53   :  { %5358 = vmatpush3.msra.mxu1 %v3697_v40 }
0x1c54   :  { %5360 = vmatmul.mubr.msk.f32.vlgmr.msra.gmra.mxu1 %vm1361_vm2, %v7144_v16  ;;  %5362 = vmatprep.subr.mxu1 %v3452_v53 }
0x1c55   :  { %5363 = vmatpush3.msra.mxu1 %v3452_v53  ;;  %v3485_v53 = vld [vmem:[%s7344_s26 + $0x78] sm:$0xff] }
0x1c56   :  { %5364 = vmatprep.subr.mxu1 %v3451_v12 }
0x1c57   :  { %5365 = vmatpush3.msra.mxu1 %v3451_v12  ;;  %v3484_v12 = vld [vmem:[%s7344_s26 + $0x70] sm:$0xff] }
0x1c58   :  { %5366 = vmatprep.subr.mxu1 %v3450_v54 }
0x1c59   :  { %5367 = vmatpush3.msra.mxu1 %v3450_v54  ;;  %v3482_v54 = vld [vmem:[%s7344_s26 + $0x60] sm:$0xff] }
0x1c5a   :  { %5368 = vmatprep.subr.mxu1 %v3449_v58 }
0x1c5b   :  { %5369 = vmatpush3.msra.mxu1 %v3449_v58  ;;  %v3471_v58 = vld [vmem:[%s7344_s26 + $0x8] sm:$0xff] }
0x1c5c   :  { %5370 = vmatprep.subr.mxu1 %v3448_v8 }
0x1c5d   :  { %5371 = vmatpush3.msra.mxu1 %v3448_v8  ;;  %v3470_v8 = vld [vmem:[%s7344_s26] sm:$0xff] }
0x1c5e   :  { %5372 = vmatprep.subr.mxu1 %v3447_v9 }
0x1c5f   :  { %5373 = vmatpush3.msra.mxu1 %v3447_v9  ;;  %v4195_v9 = vld [vmem:[%s6441_s5 + $0x78] sm:$0xff] }
0x1c60   :  { %5374 = vmatprep.subr.mxu1 %v3446_v33 }
0x1c61   :  { %5375 = vmatpush3.msra.mxu1 %v3446_v33  ;;  %v4194_v33 = vld [vmem:[%s6441_s5 + $0x70] sm:$0xff] }
0x1c62   :  { %5376 = vmatprep.subr.mxu1 %v3445_v35 }
0x1c63   :  { %5377 = vmatpush3.msra.mxu1 %v3445_v35  ;;  %v4193_v35 = vld [vmem:[%s6441_s5 + $0x68] sm:$0xff] }
0x1c64   :  { %5378 = vmatprep.subr.mxu1 %v3444_v18 }
0x1c65   :  { %5379 = vmatpush3.msra.mxu1 %v3444_v18  ;;  %v4192_v18 = vld [vmem:[%s6441_s5 + $0x60] sm:$0xff] }
0x1c66   :  { %5380 = vmatprep.subr.mxu1 %v3443_v21 }
0x1c67   :  { %5381 = vmatpush3.msra.mxu1 %v3443_v21  ;;  %v4191_v21 = vld [vmem:[%s6441_s5 + $0x58] sm:$0xff] }
0x1c68   :  { %5382 = vmatprep.subr.mxu1 %v3442_v26 }
0x1c69   :  { %5383 = vmatpush3.msra.mxu1 %v3442_v26  ;;  %v4189_v26 = vld [vmem:[%s6441_s5 + $0x48] sm:$0xff] }
0x1c6a   :  { %5384 = vmatprep.subr.mxu1 %v3441_v32 }
0x1c6b   :  { %5385 = vmatpush3.msra.mxu1 %v3441_v32  ;;  %v4188_v32 = vld [vmem:[%s6441_s5 + $0x40] sm:$0xff] }
0x1c6c   :  { %5386 = vmatprep.subr.mxu1 %v3440_v20 }
0x1c6d   :  { %5387 = vmatpush3.msra.mxu1 %v3440_v20  ;;  %v4187_v20 = vld [vmem:[%s6441_s5 + $0x38] sm:$0xff] }
0x1c6e   :  { %5388 = vmatprep.subr.mxu1 %v3439_v50 }
0x1c6f   :  { %5389 = vmatpush3.msra.mxu1 %v3439_v50  ;;  %v4186_v50 = vld [vmem:[%s6441_s5 + $0x30] sm:$0xff] }
0x1c70   :  { %5390 = vmatprep.subr.mxu1 %v3438_v31 }
0x1c71   :  { %5391 = vmatpush3.msra.mxu1 %v3438_v31  ;;  %v4185_v31 = vld [vmem:[%s6441_s5 + $0x28] sm:$0xff] }
0x1c72   :  { %5392 = vmatprep.subr.mxu1 %v3437_v34 }
0x1c73   :  { %5393 = vmatpush3.msra.mxu1 %v3437_v34  ;;  %v4184_v34 = vld [vmem:[%s6441_s5 + $0x20] sm:$0xff] }
0x1c74   :  { %5439 = vmatprep.subr.mxu1 %v3469_v3 }
0x1d14   :  { %v5361_v10 = vpop.f32.mrf.mxu1 }
0x1d15   :  { %v3783_v17 = vadd.f32 %v5361_v10, %v4424_v23 }
0x1d16   :  { %v3777_v43 = vpop.f32.mrf.mxu1 }
0x1d17   :  { %v3791_v0 = vadd.f32 %v3789_v42, %v3783_v17  ;;  %v3778_v45 = vadd.f32 %v4424_v23, %v3777_v43  ;;  %v3467_v17 = vld [vmem:[%s7343_s8 + $0x68] sm:$0xff]  ;;  %v3466_v43 = vld [vmem:[%s7343_s8 + $0x60] sm:$0xff] }
0x1d19   :  { %v4428_v47 = vmul.f32 -1.442695, %v3791_v0  ;;  %v3790_v48 = vadd.f32 %v3789_v42, %v3778_v45  ;;  %v3468_v42 = vld [vmem:[%s7343_s8 + $0x70] sm:$0xff] }
0x1d1a   :  { %v3464_v45 = vld [vmem:[%s7343_s8 + $0x50] sm:$0xff] }
0x1d1b   :  { %5695 = vpow2.f32 %v4428_v47  ;;  %v4427_v49 = vmul.f32 -1.442695, %v3790_v48  ;;  %v3463_v47 = vld [vmem:[%s7343_s8 + $0x48] sm:$0xff] }
0x1d1d   :  { %5697 = vpow2.f32 %v4427_v49  ;;  %v3460_v49 = vld [vmem:[%s7343_s8 + $0x30] sm:$0xff] }
0x1d28   :  { %v5696_v19 = vpop.eup %5695 }
0x1d29   :  { %v3799_v51 = vadd.f32 1.0, %v5696_v19  ;;  %v3459_v19 = vld [vmem:[%s7343_s8 + $0x28] sm:$0xff] }
0x1d2a   :  { %v5698_v27 = vpop.eup %5697 }
0x1d2b   :  { %5699 = vrcp.f32 %v3799_v51  ;;  %v3798_v13 = vadd.f32 1.0, %v5698_v27  ;;  %v3458_v51 = vld [vmem:[%s7343_s8 + $0x20] sm:$0xff]  ;;  %v3457_v27 = vld [vmem:[%s7343_s8 + $0x18] sm:$0xff] }
0x1d2d   :  { %5701 = vrcp.f32 %v3798_v13  ;;  %v3456_v13 = vld [vmem:[%s7343_s8 + $0x10] sm:$0xff] }
0x1d38   :  { %v5700_v52 = vpop.eup %5699 }
0x1d39   :  { %v3805_v6 = vmul.f32 %v5700_v52, %v3791_v0  ;;  %v3465_v0 = vld [vmem:[%s7343_s8 + $0x58] sm:$0xff]  ;;  %v3455_v52 = vld [vmem:[%s7343_s8 + $0x8] sm:$0xff] }
0x1d3a   :  { %v5702_v11 = vpop.eup %5701 }
0x1d3b   :  { %3808 = vadd.xlane.f32.xlu1 %v3805_v6  ;;  %v3804_v25 = vmul.f32 %v5702_v11, %v3790_v48  ;;  %v3461_v48 = vld [vmem:[%s7343_s8 + $0x38] sm:$0xff] }
0x1d3d   :  { %3806 = vadd.xlane.f32.xlu0 %v3804_v25 }
0x1dc4   :  { %v3809_v55 = vpop.xlane.xlu1 %3808 }
0x1dc5   :  { %v3811_v22 = vmul.f32 0.0078125, %v3809_v55  ;;  %v3481_v55 = vld [vmem:[%s7344_s26 + $0x58] sm:$0xff] }
0x1dc6   :  { %v3807_v56 = vpop.xlane.xlu0 %3806 }
0x1dc7   :  { %v3813_v59 = vsub.f32 %v3805_v6, %v3811_v22  ;;  %v3810_v24 = vmul.f32 0.0078125, %v3807_v56  ;;  %v3454_v6 = vld [vmem:[%s7343_s8] sm:$0xff]  ;;  %v3480_v22 = vld [vmem:[%s7344_s26 + $0x50] sm:$0xff]  ;;  %v3477_v56 = vld [vmem:[%s7344_s26 + $0x38] sm:$0xff] }
0x1dc9   :  { %v3812_v60 = vsub.f32 %v3804_v25, %v3810_v24  ;;  %v3815_v62 = vmul.f32 %v3813_v59, %v3813_v59  ;;  %v3475_v24 = vld [vmem:[%s7344_s26 + $0x28] sm:$0xff] }
0x1dcb   :  { %3818 = vadd.xlane.f32.xlu1 %v3815_v62  ;;  %v3814_v63 = vmul.f32 %v3812_v60, %v3812_v60  ;;  %v3473_v62 = vld [vmem:[%s7344_s26 + $0x18] sm:$0xff] }
0x1dcd   :  { %3816 = vadd.xlane.f32.xlu0 %v3814_v63  ;;  %v3472_v63 = vld [vmem:[%s7344_s26 + $0x10] sm:$0xff] }
0x1e54   :  { %v3819_v28 = vpop.xlane.xlu1 %3818 }
0x1e55   :  { %v3821_v36 = vmul.f32 0.0078125, %v3819_v28  ;;  %v4182_v28 = vld [vmem:[%s6441_s5 + $0x10] sm:$0xff] }
0x1e56   :  { %v3817_v37 = vpop.xlane.xlu0 %3816 }
0x1e57   :  { %v3823_v1 = vadd.f32 1e-05, %v3821_v36  ;;  %v3820_v61 = vmul.f32 0.0078125, %v3817_v37  ;;  %v4181_v36 = vld [vmem:[%s6441_s5 + $0x8] sm:$0xff]  ;;  %v4180_v37 = vld [vmem:[%s6441_s5] sm:$0xff] }
0x1e59   :  { %5703 = vrsqrt.f32 %v3823_v1  ;;  %v3822_v29 = vadd.f32 1e-05, %v3820_v61  ;;  %v4431_v1 = vld [vmem:[#allocation22] ss:$0 sm:$0xff] }
0x1e5b   :  { %5705 = vrsqrt.f32 %v3822_v29  ;;  %v4003_v29 = vrot.slane %v6702_v15, %v6744_v2 }
0x1e66   :  { %v5704_v30 = vpop.eup %5703 }
0x1e67   :  { %v3827_v38 = vmul.f32 %v5704_v30, %v3813_v59  ;;  %v3476_v59 = vld [vmem:[%s7344_s26 + $0x30] sm:$0xff] }
0x1e68   :  { %v5706_v39 = vpop.eup %5705 }
0x1e69   :  { %v3826_v40 = vmul.f32 %v5706_v39, %v3812_v60  ;;  %v3835_v41 = vmul.f32 %v4429_v57, %v3827_v38  ;;  %v3474_v60 = vld [vmem:[%s7344_s26 + $0x20] sm:$0xff] }
0x1e6b   :  { %v3834_v14 = vmul.f32 %v4429_v57, %v3826_v40  ;;  %v3843_v10 = vadd.f32 %v4430_v7, %v3835_v41 }
0x1e6d   :  { %v3842_v23 = vadd.f32 %v4430_v7, %v3834_v14 }
0x1e6f   :  { %5394 = vmatprep.mubr.f32.mxu1 %v3842_v23 }
0x1e70   :  { %5395 = vmatmul.mubr.f32.vlgmr.msra.gmra.mxu1 %v3843_v10 }
0x1e71   :  { %5440 = vmatpush3.msra.mxu1 %v3469_v3  ;;  %5471 = vmatprep.mubr.f32.mxu1 %v7074_v5  ;;  %v3462_v5 = vld [vmem:[%s7343_s8 + $0x40] sm:$0xff]  ;;  %v4183_v3 = vld [vmem:[%s6441_s5 + $0x18] sm:$0xff] }
0x1e72   :  { %5441 = vmatprep.subr.mxu1 %v3468_v42 }
0x1e73   :  { %5442 = vmatpush3.msra.mxu1 %v3468_v42 }
0x1e74   :  { %5443 = vmatprep.subr.mxu1 %v3467_v17 }
0x1e75   :  { %5444 = vmatpush3.msra.mxu1 %v3467_v17 }
0x1e76   :  { %5445 = vmatprep.subr.mxu1 %v3466_v43 }
0x1e77   :  { %5446 = vmatpush3.msra.mxu1 %v3466_v43 }
0x1e78   :  { %5447 = vmatprep.subr.mxu1 %v3465_v0 }
0x1e79   :  { %5448 = vmatpush3.msra.mxu1 %v3465_v0 }
0x1e7a   :  { %5449 = vmatprep.subr.mxu1 %v3464_v45 }
0x1e7b   :  { %5450 = vmatpush3.msra.mxu1 %v3464_v45 }
0x1e7c   :  { %5451 = vmatprep.subr.mxu1 %v3463_v47 }
0x1e7d   :  { %5452 = vmatpush3.msra.mxu1 %v3463_v47 }
0x1e7e   :  { %5453 = vmatprep.subr.mxu1 %v3462_v5 }
0x1e7f   :  { %5454 = vmatpush3.msra.mxu1 %v3462_v5  ;;  %v4436_v5 = vld [vmem:[#allocation23] ss:$0 sm:$0xff] }
0x1e80   :  { %5455 = vmatprep.subr.mxu1 %v3461_v48 }
0x1e81   :  { %5456 = vmatpush3.msra.mxu1 %v3461_v48 }
0x1e82   :  { %5457 = vmatprep.subr.mxu1 %v3460_v49 }
0x1e83   :  { %5458 = vmatpush3.msra.mxu1 %v3460_v49 }
0x1e84   :  { %5459 = vmatprep.subr.mxu1 %v3459_v19 }
0x1e85   :  { %5460 = vmatpush3.msra.mxu1 %v3459_v19 }
0x1e86   :  { %5461 = vmatprep.subr.mxu1 %v3458_v51 }
0x1e87   :  { %5462 = vmatpush3.msra.mxu1 %v3458_v51 }
0x1e88   :  { %5463 = vmatprep.subr.mxu1 %v3457_v27 }
0x1e89   :  { %5464 = vmatpush3.msra.mxu1 %v3457_v27 }
0x1e8a   :  { %5465 = vmatprep.subr.mxu1 %v3456_v13 }
0x1e8b   :  { %5466 = vmatpush3.msra.mxu1 %v3456_v13 }
0x1e8c   :  { %5467 = vmatprep.subr.mxu1 %v3455_v52 }
0x1e8d   :  { %5468 = vmatpush3.msra.mxu1 %v3455_v52 }
0x1e8e   :  { %5469 = vmatprep.subr.mxu1 %v3454_v6 }
0x1e8f   :  { %5470 = vmatpush3.msra.mxu1 %v3454_v6  ;;  %v4437_v6 = vld [vmem:[#allocation25] ss:$0 sm:$0xff] }
0x1e90   :  { %5472 = vmatmul.mubr.f32.vlgmr.msra.gmra.mxu1 %v7071_v4  ;;  %v3483_v4 = vld [vmem:[%s7344_s26 + $0x68] sm:$0xff] }
0x1f30   :  { %v5396_v11 = vpop.f32.mrf.mxu1 }
0x1f31   :  { %5397 = vmatprep.subr.mxu0 %v5396_v11 }
0x1f32   :  { %v3910_v25 = vpop.f32.mrf.mxu1  ;;  %5398 = vmatpush3.msra.mxu0 %v5396_v11 }
0x1f33   :  { %5399 = vmatprep.subr.mxu0 %v3910_v25 }
0x1f34   :  { %5400 = vmatpush3.msra.mxu0 %v3910_v25 }
0x1f35   :  { %5402 = vmatmul.mubr.msk.f32.vlgmr.msra.gmra.mxu0 %vm1361_vm2, %v7144_v16  ;;  %5404 = vmatprep.subr.mxu0 %v3485_v53  ;;  %v3479_v16 = vld [vmem:[%s7344_s26 + $0x48] sm:$0xff] }
0x1f36   :  { %5405 = vmatpush3.msra.mxu0 %v3485_v53  ;;  %5436 = vmatprep.mubr.f32.mxu0 %v6792_v46  ;;  %v3478_v46 = vld [vmem:[%s7344_s26 + $0x40] sm:$0xff] }
0x1f37   :  { %5406 = vmatprep.subr.mxu0 %v3484_v12 }
0x1f38   :  { %5407 = vmatpush3.msra.mxu0 %v3484_v12 }
0x1f39   :  { %5408 = vmatprep.subr.mxu0 %v3483_v4 }
0x1f3a   :  { %5409 = vmatpush3.msra.mxu0 %v3483_v4 }
0x1f3b   :  { %5410 = vmatprep.subr.mxu0 %v3482_v54 }
0x1f3c   :  { %5411 = vmatpush3.msra.mxu0 %v3482_v54 }
0x1f3d   :  { %5412 = vmatprep.subr.mxu0 %v3481_v55 }
0x1f3e   :  { %5413 = vmatpush3.msra.mxu0 %v3481_v55 }
0x1f3f   :  { %5414 = vmatprep.subr.mxu0 %v3480_v22 }
0x1f40   :  { %5415 = vmatpush3.msra.mxu0 %v3480_v22 }
0x1f41   :  { %5416 = vmatprep.subr.mxu0 %v3479_v16 }
0x1f42   :  { %5417 = vmatpush3.msra.mxu0 %v3479_v16 }
0x1f43   :  { %5418 = vmatprep.subr.mxu0 %v3478_v46 }
0x1f44   :  { %5419 = vmatpush3.msra.mxu0 %v3478_v46 }
0x1f45   :  { %5420 = vmatprep.subr.mxu0 %v3477_v56 }
0x1f46   :  { %5421 = vmatpush3.msra.mxu0 %v3477_v56 }
0x1f47   :  { %5422 = vmatprep.subr.mxu0 %v3476_v59 }
0x1f48   :  { %5423 = vmatpush3.msra.mxu0 %v3476_v59 }
0x1f49   :  { %5424 = vmatprep.subr.mxu0 %v3475_v24 }
0x1f4a   :  { %5425 = vmatpush3.msra.mxu0 %v3475_v24 }
0x1f4b   :  { %5426 = vmatprep.subr.mxu0 %v3474_v60 }
0x1f4c   :  { %5427 = vmatpush3.msra.mxu0 %v3474_v60 }
0x1f4d   :  { %5428 = vmatprep.subr.mxu0 %v3473_v62 }
0x1f4e   :  { %5429 = vmatpush3.msra.mxu0 %v3473_v62 }
0x1f4f   :  { %5430 = vmatprep.subr.mxu0 %v3472_v63 }
0x1f50   :  { %5431 = vmatpush3.msra.mxu0 %v3472_v63  ;;  %v5473_v17 = vpop.f32.mrf.mxu1 }
0x1f51   :  { %5432 = vmatprep.subr.mxu0 %v3471_v58 }
0x1f52   :  { %5433 = vmatpush3.msra.mxu0 %v3471_v58  ;;  %v4161_v0 = vpop.f32.mrf.mxu1 }
0x1f53   :  { %5434 = vmatprep.subr.mxu0 %v3470_v8 }
0x1f54   :  { %5435 = vmatpush3.msra.mxu0 %v3470_v8 }
0x1f55   :  { %5437 = vmatmul.mubr.f32.vlgmr.msra.gmra.mxu0 %v6789_v44  ;;  %5474 = vmatprep.subr.mxu0 %v4195_v9  ;;  %v4190_v44 = vld [vmem:[%s6441_s5 + $0x50] sm:$0xff] }
0x1f56   :  { %5475 = vmatpush3.msra.mxu0 %v4195_v9 }
0x1f57   :  { %5476 = vmatprep.subr.mxu0 %v4194_v33 }
0x1f58   :  { %5477 = vmatpush3.msra.mxu0 %v4194_v33 }
0x1f59   :  { %5478 = vmatprep.subr.mxu0 %v4193_v35 }
0x1f5a   :  { %5479 = vmatpush3.msra.mxu0 %v4193_v35 }
0x1f5b   :  { %5480 = vmatprep.subr.mxu0 %v4192_v18 }
0x1f5c   :  { %5481 = vmatpush3.msra.mxu0 %v4192_v18 }
0x1f5d   :  { %5482 = vmatprep.subr.mxu0 %v4191_v21 }
0x1f5e   :  { %5483 = vmatpush3.msra.mxu0 %v4191_v21 }
0x1f5f   :  { %5484 = vmatprep.subr.mxu0 %v4190_v44 }
0x1f60   :  { %5485 = vmatpush3.msra.mxu0 %v4190_v44 }
0x1f61   :  { %5486 = vmatprep.subr.mxu0 %v4189_v26 }
0x1f62   :  { %5487 = vmatpush3.msra.mxu0 %v4189_v26 }
0x1f63   :  { %5488 = vmatprep.subr.mxu0 %v4188_v32 }
0x1f64   :  { %5489 = vmatpush3.msra.mxu0 %v4188_v32 }
0x1f65   :  { %5490 = vmatprep.subr.mxu0 %v4187_v20 }
0x1f66   :  { %5491 = vmatpush3.msra.mxu0 %v4187_v20 }
0x1f67   :  { %5492 = vmatprep.subr.mxu0 %v4186_v50 }
0x1f68   :  { %5493 = vmatpush3.msra.mxu0 %v4186_v50 }
0x1f69   :  { %5494 = vmatprep.subr.mxu0 %v4185_v31 }
0x1f6a   :  { %5495 = vmatpush3.msra.mxu0 %v4185_v31 }
0x1f6b   :  { %5496 = vmatprep.subr.mxu0 %v4184_v34 }
0x1f6c   :  { %5497 = vmatpush3.msra.mxu0 %v4184_v34 }
0x1f6d   :  { %5498 = vmatprep.subr.mxu0 %v4183_v3 }
0x1f6e   :  { %5499 = vmatpush3.msra.mxu0 %v4183_v3 }
0x1f6f   :  { %5500 = vmatprep.subr.mxu0 %v4182_v28 }
0x1f70   :  { %5501 = vmatpush3.msra.mxu0 %v4182_v28 }
0x1f71   :  { %5502 = vmatprep.subr.mxu0 %v4181_v36 }
0x1f72   :  { %5503 = vmatpush3.msra.mxu0 %v4181_v36 }
0x1f73   :  { %5504 = vmatprep.subr.mxu0 %v4180_v37 }
0x1f74   :  { %5505 = vmatpush3.msra.mxu0 %v4180_v37 }
0x1ff5   :  { %v5403_v61 = vpop.f32.mrf.mxu0 }
0x1ff6   :  { %v3997_v30 = vadd.f32 %v5403_v61, %v4431_v1 }
0x1ff7   :  { %v3991_v57 = vpop.f32.mrf.mxu0 }
0x1ff8   :  { %v4005_v38 = vadd.f32 %v4003_v29, %v3997_v30  ;;  %v3992_v39 = vadd.f32 %v4431_v1, %v3991_v57 }
0x1ffa   :  { %v4435_v40 = vmul.f32 -1.442695, %v4005_v38  ;;  %v4004_v41 = vadd.f32 %v4003_v29, %v3992_v39 }
0x1ffc   :  { %5707 = vpow2.f32 %v4435_v40  ;;  %v4434_v7 = vmul.f32 -1.442695, %v4004_v41 }
0x1ffe   :  { %5709 = vpow2.f32 %v4434_v7 }
0x2009   :  { %v5708_v14 = vpop.eup %5707 }
0x200a   :  { %v4013_v23 = vadd.f32 1.0, %v5708_v14 }
0x200b   :  { %v5710_v10 = vpop.eup %5709 }
0x200c   :  { %5711 = vrcp.f32 %v4013_v23  ;;  %v4012_v42 = vadd.f32 1.0, %v5710_v10 }
0x200e   :  { %5713 = vrcp.f32 %v4012_v42 }
0x2015   :  { %v5438_v43 = vpop.f32.mrf.mxu0 }
0x2016   :  { %v4167_v47 = vadd.f32 %v5473_v17, %v5438_v43 }
0x2017   :  { %v4086_v45 = vpop.f32.mrf.mxu0 }
0x2018   :  { %v4162_v15 = vadd.f32 %v4161_v0, %v4086_v45  ;;  %v4177_v27 = vadd.f32 %v4436_v5, %v4167_v47 }
0x2019   :  { %v5712_v2 = vpop.eup %5711 }
0x201a   :  { %v4019_v49 = vmul.f32 %v5712_v2, %v4005_v38  ;;  %v4176_v51 = vadd.f32 %v4436_v5, %v4162_v15 }
0x201b   :  { %v5714_v48 = vpop.eup %5713 }
0x201c   :  { %v4018_v19 = vmul.f32 %v5714_v48, %v4004_v41  ;;  %v4179_v52 = vadd.f32 %v4177_v27, %v4019_v49 }
0x201e   :  { %v4178_v13 = vadd.f32 %v4176_v51, %v4018_v19 }
0x2020   :  { %5506 = vmatprep.mubr.f32.mxu0 %v4178_v13 }
0x2021   :  { %5507 = vmatmul.mubr.f32.vlgmr.msra.gmra.mxu0 %v4179_v52 }
0x20e1   :  { %v5508_v11 = vpop.f32.mrf.mxu0 }
0x20e2   :  { %v4275_v25 = vadd.f32 %v5508_v11, %v4437_v6 }
0x20e3   :  { %v4269_v53 = vpop.f32.mrf.mxu0 }
0x20e4   :  { %4279 = vst.msk [vmem:[%s6451_s17 + $0x8] sm:$0xff] %vm1121_vm1, %v4275_v25  ;;  %v4270_v12 = vadd.f32 %v4437_v6, %v4269_v53 }
0x20e6   :  { %4278 = vst.msk [vmem:[%s6451_s17] sm:$0xff] %vm1121_vm1, %v4270_v12 }
0x20e7   :  { %4284 = vsyncpa [#allocation4], 1 }
0x20e8   :  { %4285 = vsyncpa [#allocation6], 1 }
0x20e9   :  { %4286 = vsyncpa [#allocation9], 1 }
0x20ea   :  { %4287 = vsyncpa [#allocation12], 1 }
0x20eb   :  { %4288 = vsyncpa [#allocation15], 1 }
0x20ec   :  { %4289 = vsyncpa [#allocation18], 1 }
0x20ed   :  { %4290 = vsyncpa [#allocation21], 1 }
0x20ee   :  { %4291 = vsyncpa [#allocation24], 1 }

</bundles_post_ra>
